<compile_context>
chip_gen: v7x
topology: tpu7x:2x2x1
jax: 0.10.0
libtpu: 0.0.40
codegen_flags: <defaults>
</compile_context>

<pallas_src>
import jax
import jax.numpy as jnp
from jax import lax
from jax.experimental import pallas as pl
from jax.experimental.pallas import tpu as pltpu

ALIGN = 8   # pad channels to a multiple of 8 lanes only (not 128)


def _round_up(v, m):
    return (v + m - 1) // m * m


def _fold_bn(gamma, beta, mean, var, eps):
    scale = gamma / jnp.sqrt(var + eps)
    bias = beta - mean * scale
    return scale.astype(jnp.float32), bias.astype(jnp.float32)


def _make_block_kernel(*, Ho, Wo, Hs2, Ci, Co, stride, dilation, compute_dtype):
    """Fully fused BasicBlock kernel body (one batch element per grid step).

    x_ref  : (1, s*s*Hs2, Ws2, Ci) bf16  space-to-depth'd, conv1-padded input
    w1_ref : (9, Ci, Co)           bf16  conv1 taps (BN1 scale folded)
    w2_ref : (9, Co, Co)           bf16  conv2 taps (BN2 scale folded)
    wp_ref : (Ci, Co)              bf16  1x1 residual conv (convplus)
    b1/b2  : (1, Co)               f32   folded BN biases
    o_ref  : (1, Ho*Wo, Co)        f32
    y1_ref : (Ho+2d, Wo+2d, Co)    f32   VMEM scratch (zero-padded y1)
    """
    s, d = stride, dilation
    M = Ho * Wo

    def kernel(x_ref, w1_ref, w2_ref, wp_ref, b1_ref, b2_ref, o_ref, y1_ref):
        # ---- stage 1: y1 = relu(bn1(conv1(x))) : 9 shifted dots -> f32 acc ----
        acc1 = jnp.zeros((M, Co), jnp.float32)
        center = None
        for kh in range(3):
            for kw in range(3):
                oh, ow = kh * d, kw * d
                r0, c0 = oh // s, ow // s
                plane = (oh % s) * s + (ow % s)
                rb = plane * Hs2 + r0
                tap = x_ref[0, rb:rb + Ho, c0:c0 + Wo, :]          # (Ho, Wo, Ci)
                if kh == 1 and kw == 1:
                    center = tap        # == x[ho*s, wo*s, :] -> residual 1x1 input
                acc1 = acc1 + jnp.dot(tap.reshape(M, Ci), w1_ref[kh * 3 + kw],
                                      preferred_element_type=jnp.float32)
        y1 = jnp.maximum(acc1 + b1_ref[...], 0.0)                   # (M, Co) f32

        # Zero-padded VMEM stash of y1 so every conv2 tap is a contiguous window.
        y1_ref[...] = jnp.zeros_like(y1_ref)
        y1_ref[d:d + Ho, d:d + Wo, :] = y1.reshape(Ho, Wo, Co)

        # ---- stage 2: out = relu(bn2(conv2(y1)) + convplus(x)) -----------------
        acc2 = jnp.dot(center.reshape(M, Ci), wp_ref[...],
                       preferred_element_type=jnp.float32)
        for kh in range(3):
            for kw in range(3):
                tap = y1_ref[kh * d:kh * d + Ho, kw * d:kw * d + Wo, :]
                acc2 = acc2 + jnp.dot(tap.astype(compute_dtype).reshape(M, Co),
                                      w2_ref[kh * 3 + kw],
                                      preferred_element_type=jnp.float32)
        o_ref[0] = jnp.maximum(acc2 + b2_ref[...], 0.0).astype(o_ref.dtype)

    return kernel


def basic_block_forward(x_nchw, params, *, stride=1, dilation=1, eps=1e-5,
                        compute_dtype=jnp.bfloat16, out_dtype=jnp.float32):
    """Fused BasicBlock forward (eval-mode BN).  NCHW float32 in / NCHW out."""
    N, Cin, H, W = x_nchw.shape
    s, d = stride, dilation
    w1, w2, wp = params["w1"], params["w2"], params["wp"]
    Cout = w1.shape[0]
    Ci, Co = _round_up(Cin, ALIGN), _round_up(Cout, ALIGN)

    Ho = (H - 1) // s + 1
    Wo = (W - 1) // s + 1
    M = Ho * Wo

    s1, bb1 = _fold_bn(params["g1"], params["b1"], params["m1"], params["v1"], eps)
    s2, bb2 = _fold_bn(params["g2"], params["b2"], params["m2"], params["v2"], eps)

    # ---- weights: per-tap (Ci, Co) matrices, BN scales folded, bf16 -----------
    w1f = jnp.transpose(w1, (2, 3, 1, 0)).astype(jnp.float32) * s1        # (3,3,Cin,Cout)
    w1f = jnp.pad(w1f, ((0, 0), (0, 0), (0, Ci - Cin), (0, Co - Cout)))
    w1f = w1f.reshape(9, Ci, Co).astype(compute_dtype)
    w2f = jnp.transpose(w2, (2, 3, 1, 0)).astype(jnp.float32) * s2        # (3,3,Cout,Cout)
    w2f = jnp.pad(w2f, ((0, 0), (0, 0), (0, Co - Cout), (0, Co - Cout)))
    w2f = w2f.reshape(9, Co, Co).astype(compute_dtype)
    wpf = jnp.transpose(wp[:, :, 0, 0], (1, 0)).astype(jnp.float32)       # (Cin,Cout)
    wpf = jnp.pad(wpf, ((0, Ci - Cin), (0, Co - Cout))).astype(compute_dtype)
    bias1 = jnp.pad(bb1, (0, Co - Cout)).reshape(1, Co)
    bias2 = jnp.pad(bb2, (0, Co - Cout)).reshape(1, Co)

    # ---- input: cast to bf16 FIRST, pad by conv1's padding (=dilation), then
    #      space-to-depth so every strided/dilated tap is a contiguous window ----
    x_nhwc = jnp.transpose(x_nchw, (0, 2, 3, 1)).astype(compute_dtype)
    Hs = _round_up((Ho - 1) * s + 2 * d + 1, s)
    Ws = _round_up((Wo - 1) * s + 2 * d + 1, s)
    xp = jnp.pad(x_nhwc, ((0, 0),
                          (d, max(0, Hs - H - d)),
                          (d, max(0, Ws - W - d)),
                          (0, Ci - Cin)))[:, :Hs, :Ws, :]
    Hs2, Ws2 = Hs // s, Ws // s
    xd = xp.reshape(N, Hs2, s, Ws2, s, Ci).transpose(0, 2, 4, 1, 3, 5)
    xd = xd.reshape(N, s * s * Hs2, Ws2, Ci)          # (N, s*s*Hs2, Ws2, Ci)

    kernel = _make_block_kernel(Ho=Ho, Wo=Wo, Hs2=Hs2, Ci=Ci, Co=Co,
                                stride=s, dilation=d, compute_dtype=compute_dtype)

    flops = 2 * N * M * Co * (9 * Ci + 9 * Co + Ci)
    bytes_accessed = int(xd.size * xd.dtype.itemsize
                         + (w1f.size + w2f.size + wpf.size) * jnp.dtype(compute_dtype).itemsize
                         + (bias1.size + bias2.size) * 4
                         + N * M * Co * jnp.dtype(out_dtype).itemsize)

    out = pl.pallas_call(
        kernel,
        out_shape=jax.ShapeDtypeStruct((N, M, Co), out_dtype),
        grid_spec=pltpu.PrefetchScalarGridSpec(
            num_scalar_prefetch=0,
            # TODO(synk): add an output-row tile grid axis (with halo DMA) for
            #             images too large to keep resident in VMEM per step.
            grid=(N,),
            in_specs=[
                pl.BlockSpec((1, s * s * Hs2, Ws2, Ci), lambda n: (n, 0, 0, 0)),
                pl.BlockSpec((9, Ci, Co), lambda n: (0, 0, 0)),
                pl.BlockSpec((9, Co, Co), lambda n: (0, 0, 0)),
                pl.BlockSpec((Ci, Co), lambda n: (0, 0)),
                pl.BlockSpec((1, Co), lambda n: (0, 0)),
                pl.BlockSpec((1, Co), lambda n: (0, 0)),
            ],
            out_specs=pl.BlockSpec((1, M, Co), lambda n: (n, 0, 0)),
            scratch_shapes=[pltpu.VMEM((Ho + 2 * d, Wo + 2 * d, Co), jnp.float32)],
        ),
        compiler_params=pltpu.CompilerParams(
            dimension_semantics=("parallel",),
            # No explicit vmem_limit_bytes: footprint is a few hundred KiB, so the
            # default scoped limit is safe on v5e/v6e and on v7x's smaller VMEM.
        ),
        cost_estimate=pl.CostEstimate(
            flops=flops, transcendentals=0, bytes_accessed=bytes_accessed),
    )(xd, w1f, w2f, wpf, bias1, bias2)

    out = out.reshape(N, Ho, Wo, Co)[..., :Cout]
    return jnp.transpose(out, (0, 3, 1, 2))                               # NCHW


def reference(x, params, *, stride=1, dilation=1, eps=1e-5):
    """Plain-JAX/lax reference mirroring the PyTorch BasicBlock (eval-mode BN)."""
    def conv(y, w, s, d, p):
        return lax.conv_general_dilated(
            y.astype(jnp.float32), w.astype(jnp.float32),
            window_strides=(s, s), padding=((p, p), (p, p)),
            rhs_dilation=(d, d), dimension_numbers=("NCHW", "OIHW", "NCHW"),
            precision=lax.Precision.HIGHEST)

    def bn(y, g, b, m, v):
        sc = (g / jnp.sqrt(v + eps)).reshape(1, -1, 1, 1)
        bi = (b - m * g / jnp.sqrt(v + eps)).reshape(1, -1, 1, 1)
        return y * sc + bi

    residual = conv(x, params["wp"], stride, 1, 0)
    out = conv(x, params["w1"], stride, dilation, dilation)
    out = jnp.maximum(bn(out, params["g1"], params["b1"], params["m1"], params["v1"]), 0.0)
    out = conv(out, params["w2"], 1, dilation, dilation)
    out = bn(out, params["g2"], params["b2"], params["m2"], params["v2"])
    return jnp.maximum(out + residual, 0.0)


if __name__ == "__main__":
    key = jax.random.PRNGKey(0)
    kx, k1, k2, k3 = jax.random.split(key, 4)

    N, Cin, H, W = 2, 4, 16, 16    # inplanes = 4
    Cout = 8                       # planes = 8

    x = jax.random.normal(kx, (N, Cin, H, W), dtype=jnp.float32)
    w1 = jax.random.normal(k1, (Cout, Cin, 3, 3), jnp.float32) * (2.0 / (Cin * 9)) ** 0.5
    w2 = jax.random.normal(k2, (Cout, Cout, 3, 3), jnp.float32) * (2.0 / (Cout * 9)) ** 0.5
    wp = jax.random.normal(k3, (Cout, Cin, 1, 1), jnp.float32) * (2.0 / Cin) ** 0.5

    ar = jnp.arange(Cout, dtype=jnp.float32)
    params = dict(
        w1=w1, w2=w2, wp=wp,
        g1=1.0 + 0.10 * ar, b1=0.05 * ar, m1=0.01 * ar, v1=1.0 + 0.02 * ar,
        g2=1.0 - 0.05 * ar, b2=-0.03 * ar, m2=-0.02 * ar, v2=1.0 + 0.03 * ar,
    )

    # bf16 matmul inputs + f32 accumulation -> compare with a relative tolerance.
    REL_TOL = 5e-2
    for (s, d) in ((1, 1), (2, 2), (2, 1)):
        out = jax.block_until_ready(basic_block_forward(x, params, stride=s, dilation=d))
        ref = jax.block_until_ready(reference(x, params, stride=s, dilation=d))
        assert out.shape == ref.shape, (out.shape, ref.shape)
        err = float(jnp.max(jnp.abs(out - ref)))
        scale = float(jnp.max(jnp.abs(ref))) + 1e-6
        assert err <= REL_TOL * scale, (s, d, err, scale)

    print("KERNEL_OK")
</pallas_src>

<mosaic_0001>
module attributes {stable_mosaic.version = 11 : i64} {
  func.func @kernel(%arg0: i32, %arg1: memref<1x18x18x8xbf16, #tpu.memory_space<vmem>>, %arg2: memref<9x8x8xbf16, #tpu.memory_space<vmem>>, %arg3: memref<9x8x8xbf16, #tpu.memory_space<vmem>>, %arg4: memref<8x8xbf16, #tpu.memory_space<vmem>>, %arg5: memref<1x8xf32, #tpu.memory_space<vmem>>, %arg6: memref<1x8xf32, #tpu.memory_space<vmem>>, %arg7: memref<1x256x8xf32, #tpu.memory_space<vmem>>, %arg8: memref<18x18x8xf32, #tpu.memory_space<vmem>>) attributes {dimension_semantics = [#tpu.dimension_semantics<parallel>], iteration_bounds = array<i64: 2>, scalar_prefetch = 0 : i64, scratch_operands = 1 : i64, tpu.core_type = #tpu.core_type<tc>, window_params = [{transform_indices = @transform_0, window_bounds = array<i64: 1, 18, 18, 8>}, {pipeline_mode = #tpu.pipeline_mode<synchronous>, transform_indices = @transform_1, window_bounds = array<i64: 9, 8, 8>}, {pipeline_mode = #tpu.pipeline_mode<synchronous>, transform_indices = @transform_2, window_bounds = array<i64: 9, 8, 8>}, {pipeline_mode = #tpu.pipeline_mode<synchronous>, transform_indices = @transform_3, window_bounds = array<i64: 8, 8>}, {pipeline_mode = #tpu.pipeline_mode<synchronous>, transform_indices = @transform_4, window_bounds = array<i64: 1, 8>}, {pipeline_mode = #tpu.pipeline_mode<synchronous>, transform_indices = @transform_5, window_bounds = array<i64: 1, 8>}, {transform_indices = @transform_6, window_bounds = array<i64: 1, 256, 8>}]} {
    %cst = arith.constant 0.000000e+00 : f32
    %0 = vector.broadcast %cst : f32 to vector<256x8xf32>
    %c0 = arith.constant 0 : index
    %c0_0 = arith.constant 0 : index
    %c0_1 = arith.constant 0 : index
    %c0_2 = arith.constant 0 : index
    %1 = vector.load %arg1[%c0, %c0_0, %c0_1, %c0_2] : memref<1x18x18x8xbf16, #tpu.memory_space<vmem>>, vector<1x16x16x8xbf16>
    %2 = vector.shape_cast %1 : vector<1x16x16x8xbf16> to vector<16x16x8xbf16>
    %3 = vector.shape_cast %2 : vector<16x16x8xbf16> to vector<256x8xbf16>
    %c0_3 = arith.constant 0 : index
    %c0_4 = arith.constant 0 : index
    %c0_5 = arith.constant 0 : index
    %4 = vector.load %arg2[%c0_3, %c0_4, %c0_5] : memref<9x8x8xbf16, #tpu.memory_space<vmem>>, vector<1x8x8xbf16>
    %5 = vector.shape_cast %4 : vector<1x8x8xbf16> to vector<8x8xbf16>
    %cst_6 = arith.constant dense<0.000000e+00> : vector<256x8xf32>
    %6 = tpu.matmul %3, %5, %cst_6 {dimension_numbers = #tpu.dot_dimension_numbers<[1], [0], [0], [1], [0, 0, 1, 1], [], []>} : vector<256x8xbf16>, vector<8x8xbf16>, vector<256x8xf32> -> vector<256x8xf32>
    %7 = arith.addf %0, %6 : vector<256x8xf32>
    %c0_7 = arith.constant 0 : index
    %c0_8 = arith.constant 0 : index
    %c1 = arith.constant 1 : index
    %c0_9 = arith.constant 0 : index
    %8 = vector.load %arg1[%c0_7, %c0_8, %c1, %c0_9] : memref<1x18x18x8xbf16, #tpu.memory_space<vmem>>, vector<1x16x16x8xbf16>
    %9 = vector.shape_cast %8 : vector<1x16x16x8xbf16> to vector<16x16x8xbf16>
    %10 = vector.shape_cast %9 : vector<16x16x8xbf16> to vector<256x8xbf16>
    %c1_10 = arith.constant 1 : index
    %c0_11 = arith.constant 0 : index
    %c0_12 = arith.constant 0 : index
    %11 = vector.load %arg2[%c1_10, %c0_11, %c0_12] : memref<9x8x8xbf16, #tpu.memory_space<vmem>>, vector<1x8x8xbf16>
    %12 = vector.shape_cast %11 : vector<1x8x8xbf16> to vector<8x8xbf16>
    %cst_13 = arith.constant dense<0.000000e+00> : vector<256x8xf32>
    %13 = tpu.matmul %10, %12, %cst_13 {dimension_numbers = #tpu.dot_dimension_numbers<[1], [0], [0], [1], [0, 0, 1, 1], [], []>} : vector<256x8xbf16>, vector<8x8xbf16>, vector<256x8xf32> -> vector<256x8xf32>
    %14 = arith.addf %7, %13 : vector<256x8xf32>
    %c0_14 = arith.constant 0 : index
    %c0_15 = arith.constant 0 : index
    %c2 = arith.constant 2 : index
    %c0_16 = arith.constant 0 : index
    %15 = vector.load %arg1[%c0_14, %c0_15, %c2, %c0_16] : memref<1x18x18x8xbf16, #tpu.memory_space<vmem>>, vector<1x16x16x8xbf16>
    %16 = vector.shape_cast %15 : vector<1x16x16x8xbf16> to vector<16x16x8xbf16>
    %17 = vector.shape_cast %16 : vector<16x16x8xbf16> to vector<256x8xbf16>
    %c2_17 = arith.constant 2 : index
    %c0_18 = arith.constant 0 : index
    %c0_19 = arith.constant 0 : index
    %18 = vector.load %arg2[%c2_17, %c0_18, %c0_19] : memref<9x8x8xbf16, #tpu.memory_space<vmem>>, vector<1x8x8xbf16>
    %19 = vector.shape_cast %18 : vector<1x8x8xbf16> to vector<8x8xbf16>
    %cst_20 = arith.constant dense<0.000000e+00> : vector<256x8xf32>
    %20 = tpu.matmul %17, %19, %cst_20 {dimension_numbers = #tpu.dot_dimension_numbers<[1], [0], [0], [1], [0, 0, 1, 1], [], []>} : vector<256x8xbf16>, vector<8x8xbf16>, vector<256x8xf32> -> vector<256x8xf32>
    %21 = arith.addf %14, %20 : vector<256x8xf32>
    %c0_21 = arith.constant 0 : index
    %c1_22 = arith.constant 1 : index
    %c0_23 = arith.constant 0 : index
    %c0_24 = arith.constant 0 : index
    %22 = vector.load %arg1[%c0_21, %c1_22, %c0_23, %c0_24] : memref<1x18x18x8xbf16, #tpu.memory_space<vmem>>, vector<1x16x16x8xbf16>
    %23 = vector.shape_cast %22 : vector<1x16x16x8xbf16> to vector<16x16x8xbf16>
    %24 = vector.shape_cast %23 : vector<16x16x8xbf16> to vector<256x8xbf16>
    %c3 = arith.constant 3 : index
    %c0_25 = arith.constant 0 : index
    %c0_26 = arith.constant 0 : index
    %25 = vector.load %arg2[%c3, %c0_25, %c0_26] : memref<9x8x8xbf16, #tpu.memory_space<vmem>>, vector<1x8x8xbf16>
    %26 = vector.shape_cast %25 : vector<1x8x8xbf16> to vector<8x8xbf16>
    %cst_27 = arith.constant dense<0.000000e+00> : vector<256x8xf32>
    %27 = tpu.matmul %24, %26, %cst_27 {dimension_numbers = #tpu.dot_dimension_numbers<[1], [0], [0], [1], [0, 0, 1, 1], [], []>} : vector<256x8xbf16>, vector<8x8xbf16>, vector<256x8xf32> -> vector<256x8xf32>
    %28 = arith.addf %21, %27 : vector<256x8xf32>
    %c0_28 = arith.constant 0 : index
    %c1_29 = arith.constant 1 : index
    %c1_30 = arith.constant 1 : index
    %c0_31 = arith.constant 0 : index
    %29 = vector.load %arg1[%c0_28, %c1_29, %c1_30, %c0_31] : memref<1x18x18x8xbf16, #tpu.memory_space<vmem>>, vector<1x16x16x8xbf16>
    %30 = vector.shape_cast %29 : vector<1x16x16x8xbf16> to vector<16x16x8xbf16>
    %31 = vector.shape_cast %30 : vector<16x16x8xbf16> to vector<256x8xbf16>
    %c4 = arith.constant 4 : index
    %c0_32 = arith.constant 0 : index
    %c0_33 = arith.constant 0 : index
    %32 = vector.load %arg2[%c4, %c0_32, %c0_33] : memref<9x8x8xbf16, #tpu.memory_space<vmem>>, vector<1x8x8xbf16>
    %33 = vector.shape_cast %32 : vector<1x8x8xbf16> to vector<8x8xbf16>
    %cst_34 = arith.constant dense<0.000000e+00> : vector<256x8xf32>
    %34 = tpu.matmul %31, %33, %cst_34 {dimension_numbers = #tpu.dot_dimension_numbers<[1], [0], [0], [1], [0, 0, 1, 1], [], []>} : vector<256x8xbf16>, vector<8x8xbf16>, vector<256x8xf32> -> vector<256x8xf32>
    %35 = arith.addf %28, %34 : vector<256x8xf32>
    %c0_35 = arith.constant 0 : index
    %c1_36 = arith.constant 1 : index
    %c2_37 = arith.constant 2 : index
    %c0_38 = arith.constant 0 : index
    %36 = vector.load %arg1[%c0_35, %c1_36, %c2_37, %c0_38] : memref<1x18x18x8xbf16, #tpu.memory_space<vmem>>, vector<1x16x16x8xbf16>
    %37 = vector.shape_cast %36 : vector<1x16x16x8xbf16> to vector<16x16x8xbf16>
    %38 = vector.shape_cast %37 : vector<16x16x8xbf16> to vector<256x8xbf16>
    %c5 = arith.constant 5 : index
    %c0_39 = arith.constant 0 : index
    %c0_40 = arith.constant 0 : index
    %39 = vector.load %arg2[%c5, %c0_39, %c0_40] : memref<9x8x8xbf16, #tpu.memory_space<vmem>>, vector<1x8x8xbf16>
    %40 = vector.shape_cast %39 : vector<1x8x8xbf16> to vector<8x8xbf16>
    %cst_41 = arith.constant dense<0.000000e+00> : vector<256x8xf32>
    %41 = tpu.matmul %38, %40, %cst_41 {dimension_numbers = #tpu.dot_dimension_numbers<[1], [0], [0], [1], [0, 0, 1, 1], [], []>} : vector<256x8xbf16>, vector<8x8xbf16>, vector<256x8xf32> -> vector<256x8xf32>
    %42 = arith.addf %35, %41 : vector<256x8xf32>
    %c0_42 = arith.constant 0 : index
    %c2_43 = arith.constant 2 : index
    %c0_44 = arith.constant 0 : index
    %c0_45 = arith.constant 0 : index
    %43 = vector.load %arg1[%c0_42, %c2_43, %c0_44, %c0_45] : memref<1x18x18x8xbf16, #tpu.memory_space<vmem>>, vector<1x16x16x8xbf16>
    %44 = vector.shape_cast %43 : vector<1x16x16x8xbf16> to vector<16x16x8xbf16>
    %45 = vector.shape_cast %44 : vector<16x16x8xbf16> to vector<256x8xbf16>
    %c6 = arith.constant 6 : index
    %c0_46 = arith.constant 0 : index
    %c0_47 = arith.constant 0 : index
    %46 = vector.load %arg2[%c6, %c0_46, %c0_47] : memref<9x8x8xbf16, #tpu.memory_space<vmem>>, vector<1x8x8xbf16>
    %47 = vector.shape_cast %46 : vector<1x8x8xbf16> to vector<8x8xbf16>
    %cst_48 = arith.constant dense<0.000000e+00> : vector<256x8xf32>
    %48 = tpu.matmul %45, %47, %cst_48 {dimension_numbers = #tpu.dot_dimension_numbers<[1], [0], [0], [1], [0, 0, 1, 1], [], []>} : vector<256x8xbf16>, vector<8x8xbf16>, vector<256x8xf32> -> vector<256x8xf32>
    %49 = arith.addf %42, %48 : vector<256x8xf32>
    %c0_49 = arith.constant 0 : index
    %c2_50 = arith.constant 2 : index
    %c1_51 = arith.constant 1 : index
    %c0_52 = arith.constant 0 : index
    %50 = vector.load %arg1[%c0_49, %c2_50, %c1_51, %c0_52] : memref<1x18x18x8xbf16, #tpu.memory_space<vmem>>, vector<1x16x16x8xbf16>
    %51 = vector.shape_cast %50 : vector<1x16x16x8xbf16> to vector<16x16x8xbf16>
    %52 = vector.shape_cast %51 : vector<16x16x8xbf16> to vector<256x8xbf16>
    %c7 = arith.constant 7 : index
    %c0_53 = arith.constant 0 : index
    %c0_54 = arith.constant 0 : index
    %53 = vector.load %arg2[%c7, %c0_53, %c0_54] : memref<9x8x8xbf16, #tpu.memory_space<vmem>>, vector<1x8x8xbf16>
    %54 = vector.shape_cast %53 : vector<1x8x8xbf16> to vector<8x8xbf16>
    %cst_55 = arith.constant dense<0.000000e+00> : vector<256x8xf32>
    %55 = tpu.matmul %52, %54, %cst_55 {dimension_numbers = #tpu.dot_dimension_numbers<[1], [0], [0], [1], [0, 0, 1, 1], [], []>} : vector<256x8xbf16>, vector<8x8xbf16>, vector<256x8xf32> -> vector<256x8xf32>
    %56 = arith.addf %49, %55 : vector<256x8xf32>
    %c0_56 = arith.constant 0 : index
    %c2_57 = arith.constant 2 : index
    %c2_58 = arith.constant 2 : index
    %c0_59 = arith.constant 0 : index
    %57 = vector.load %arg1[%c0_56, %c2_57, %c2_58, %c0_59] : memref<1x18x18x8xbf16, #tpu.memory_space<vmem>>, vector<1x16x16x8xbf16>
    %58 = vector.shape_cast %57 : vector<1x16x16x8xbf16> to vector<16x16x8xbf16>
    %59 = vector.shape_cast %58 : vector<16x16x8xbf16> to vector<256x8xbf16>
    %c8 = arith.constant 8 : index
    %c0_60 = arith.constant 0 : index
    %c0_61 = arith.constant 0 : index
    %60 = vector.load %arg2[%c8, %c0_60, %c0_61] : memref<9x8x8xbf16, #tpu.memory_space<vmem>>, vector<1x8x8xbf16>
    %61 = vector.shape_cast %60 : vector<1x8x8xbf16> to vector<8x8xbf16>
    %cst_62 = arith.constant dense<0.000000e+00> : vector<256x8xf32>
    %62 = tpu.matmul %59, %61, %cst_62 {dimension_numbers = #tpu.dot_dimension_numbers<[1], [0], [0], [1], [0, 0, 1, 1], [], []>} : vector<256x8xbf16>, vector<8x8xbf16>, vector<256x8xf32> -> vector<256x8xf32>
    %63 = arith.addf %56, %62 : vector<256x8xf32>
    %c0_63 = arith.constant 0 : index
    %c0_64 = arith.constant 0 : index
    %64 = vector.load %arg5[%c0_63, %c0_64] : memref<1x8xf32, #tpu.memory_space<vmem>>, vector<1x8xf32>
    %65 = vector.broadcast %64 : vector<1x8xf32> to vector<256x8xf32>
    %66 = arith.addf %63, %65 : vector<256x8xf32>
    %cst_65 = arith.constant 0.000000e+00 : f32
    %67 = vector.broadcast %cst_65 : f32 to vector<256x8xf32>
    %68 = arith.maximumf %66, %67 : vector<256x8xf32>
    %cst_66 = arith.constant 0.000000e+00 : f32
    %69 = vector.broadcast %cst_66 : f32 to vector<18x18x8xf32>
    %c0_67 = arith.constant 0 : index
    %c0_68 = arith.constant 0 : index
    %c0_69 = arith.constant 0 : index
    %70 = vector.load %arg8[%c0_67, %c0_68, %c0_69] : memref<18x18x8xf32, #tpu.memory_space<vmem>>, vector<18x18x8xf32>
    tpu.vector_store %arg8[%c0_67, %c0_68, %c0_69], %69 {strides = array<i32>} : memref<18x18x8xf32, #tpu.memory_space<vmem>>, vector<18x18x8xf32>,
    %71 = vector.shape_cast %68 : vector<256x8xf32> to vector<16x16x8xf32>
    %c1_70 = arith.constant 1 : index
    %c1_71 = arith.constant 1 : index
    %c0_72 = arith.constant 0 : index
    %72 = vector.load %arg8[%c1_70, %c1_71, %c0_72] : memref<18x18x8xf32, #tpu.memory_space<vmem>>, vector<16x16x8xf32>
    tpu.vector_store %arg8[%c1_70, %c1_71, %c0_72], %71 {strides = array<i32>} : memref<18x18x8xf32, #tpu.memory_space<vmem>>, vector<16x16x8xf32>,
    %73 = vector.shape_cast %30 : vector<16x16x8xbf16> to vector<256x8xbf16>
    %c0_73 = arith.constant 0 : index
    %c0_74 = arith.constant 0 : index
    %74 = vector.load %arg4[%c0_73, %c0_74] : memref<8x8xbf16, #tpu.memory_space<vmem>>, vector<8x8xbf16>
    %cst_75 = arith.constant dense<0.000000e+00> : vector<256x8xf32>
    %75 = tpu.matmul %73, %74, %cst_75 {dimension_numbers = #tpu.dot_dimension_numbers<[1], [0], [0], [1], [0, 0, 1, 1], [], []>} : vector<256x8xbf16>, vector<8x8xbf16>, vector<256x8xf32> -> vector<256x8xf32>
    %c0_76 = arith.constant 0 : index
    %c0_77 = arith.constant 0 : index
    %c0_78 = arith.constant 0 : index
    %76 = vector.load %arg8[%c0_76, %c0_77, %c0_78] : memref<18x18x8xf32, #tpu.memory_space<vmem>>, vector<16x16x8xf32>
    %77 = arith.truncf %76 : vector<16x16x8xf32> to vector<16x16x8xbf16>
    %78 = vector.shape_cast %77 : vector<16x16x8xbf16> to vector<256x8xbf16>
    %c0_79 = arith.constant 0 : index
    %c0_80 = arith.constant 0 : index
    %c0_81 = arith.constant 0 : index
    %79 = vector.load %arg3[%c0_79, %c0_80, %c0_81] : memref<9x8x8xbf16, #tpu.memory_space<vmem>>, vector<1x8x8xbf16>
    %80 = vector.shape_cast %79 : vector<1x8x8xbf16> to vector<8x8xbf16>
    %cst_82 = arith.constant dense<0.000000e+00> : vector<256x8xf32>
    %81 = tpu.matmul %78, %80, %cst_82 {dimension_numbers = #tpu.dot_dimension_numbers<[1], [0], [0], [1], [0, 0, 1, 1], [], []>} : vector<256x8xbf16>, vector<8x8xbf16>, vector<256x8xf32> -> vector<256x8xf32>
    %82 = arith.addf %75, %81 : vector<256x8xf32>
    %c0_83 = arith.constant 0 : index
    %c1_84 = arith.constant 1 : index
    %c0_85 = arith.constant 0 : index
    %83 = vector.load %arg8[%c0_83, %c1_84, %c0_85] : memref<18x18x8xf32, #tpu.memory_space<vmem>>, vector<16x16x8xf32>
    %84 = arith.truncf %83 : vector<16x16x8xf32> to vector<16x16x8xbf16>
    %85 = vector.shape_cast %84 : vector<16x16x8xbf16> to vector<256x8xbf16>
    %c1_86 = arith.constant 1 : index
    %c0_87 = arith.constant 0 : index
    %c0_88 = arith.constant 0 : index
    %86 = vector.load %arg3[%c1_86, %c0_87, %c0_88] : memref<9x8x8xbf16, #tpu.memory_space<vmem>>, vector<1x8x8xbf16>
    %87 = vector.shape_cast %86 : vector<1x8x8xbf16> to vector<8x8xbf16>
    %cst_89 = arith.constant dense<0.000000e+00> : vector<256x8xf32>
    %88 = tpu.matmul %85, %87, %cst_89 {dimension_numbers = #tpu.dot_dimension_numbers<[1], [0], [0], [1], [0, 0, 1, 1], [], []>} : vector<256x8xbf16>, vector<8x8xbf16>, vector<256x8xf32> -> vector<256x8xf32>
    %89 = arith.addf %82, %88 : vector<256x8xf32>
    %c0_90 = arith.constant 0 : index
    %c2_91 = arith.constant 2 : index
    %c0_92 = arith.constant 0 : index
    %90 = vector.load %arg8[%c0_90, %c2_91, %c0_92] : memref<18x18x8xf32, #tpu.memory_space<vmem>>, vector<16x16x8xf32>
    %91 = arith.truncf %90 : vector<16x16x8xf32> to vector<16x16x8xbf16>
    %92 = vector.shape_cast %91 : vector<16x16x8xbf16> to vector<256x8xbf16>
    %c2_93 = arith.constant 2 : index
    %c0_94 = arith.constant 0 : index
    %c0_95 = arith.constant 0 : index
    %93 = vector.load %arg3[%c2_93, %c0_94, %c0_95] : memref<9x8x8xbf16, #tpu.memory_space<vmem>>, vector<1x8x8xbf16>
    %94 = vector.shape_cast %93 : vector<1x8x8xbf16> to vector<8x8xbf16>
    %cst_96 = arith.constant dense<0.000000e+00> : vector<256x8xf32>
    %95 = tpu.matmul %92, %94, %cst_96 {dimension_numbers = #tpu.dot_dimension_numbers<[1], [0], [0], [1], [0, 0, 1, 1], [], []>} : vector<256x8xbf16>, vector<8x8xbf16>, vector<256x8xf32> -> vector<256x8xf32>
    %96 = arith.addf %89, %95 : vector<256x8xf32>
    %c1_97 = arith.constant 1 : index
    %c0_98 = arith.constant 0 : index
    %c0_99 = arith.constant 0 : index
    %97 = vector.load %arg8[%c1_97, %c0_98, %c0_99] : memref<18x18x8xf32, #tpu.memory_space<vmem>>, vector<16x16x8xf32>
    %98 = arith.truncf %97 : vector<16x16x8xf32> to vector<16x16x8xbf16>
    %99 = vector.shape_cast %98 : vector<16x16x8xbf16> to vector<256x8xbf16>
    %c3_100 = arith.constant 3 : index
    %c0_101 = arith.constant 0 : index
    %c0_102 = arith.constant 0 : index
    %100 = vector.load %arg3[%c3_100, %c0_101, %c0_102] : memref<9x8x8xbf16, #tpu.memory_space<vmem>>, vector<1x8x8xbf16>
    %101 = vector.shape_cast %100 : vector<1x8x8xbf16> to vector<8x8xbf16>
    %cst_103 = arith.constant dense<0.000000e+00> : vector<256x8xf32>
    %102 = tpu.matmul %99, %101, %cst_103 {dimension_numbers = #tpu.dot_dimension_numbers<[1], [0], [0], [1], [0, 0, 1, 1], [], []>} : vector<256x8xbf16>, vector<8x8xbf16>, vector<256x8xf32> -> vector<256x8xf32>
    %103 = arith.addf %96, %102 : vector<256x8xf32>
    %c1_104 = arith.constant 1 : index
    %c1_105 = arith.constant 1 : index
    %c0_106 = arith.constant 0 : index
    %104 = vector.load %arg8[%c1_104, %c1_105, %c0_106] : memref<18x18x8xf32, #tpu.memory_space<vmem>>, vector<16x16x8xf32>
    %105 = arith.truncf %104 : vector<16x16x8xf32> to vector<16x16x8xbf16>
    %106 = vector.shape_cast %105 : vector<16x16x8xbf16> to vector<256x8xbf16>
    %c4_107 = arith.constant 4 : index
    %c0_108 = arith.constant 0 : index
    %c0_109 = arith.constant 0 : index
    %107 = vector.load %arg3[%c4_107, %c0_108, %c0_109] : memref<9x8x8xbf16, #tpu.memory_space<vmem>>, vector<1x8x8xbf16>
    %108 = vector.shape_cast %107 : vector<1x8x8xbf16> to vector<8x8xbf16>
    %cst_110 = arith.constant dense<0.000000e+00> : vector<256x8xf32>
    %109 = tpu.matmul %106, %108, %cst_110 {dimension_numbers = #tpu.dot_dimension_numbers<[1], [0], [0], [1], [0, 0, 1, 1], [], []>} : vector<256x8xbf16>, vector<8x8xbf16>, vector<256x8xf32> -> vector<256x8xf32>
    %110 = arith.addf %103, %109 : vector<256x8xf32>
    %c1_111 = arith.constant 1 : index
    %c2_112 = arith.constant 2 : index
    %c0_113 = arith.constant 0 : index
    %111 = vector.load %arg8[%c1_111, %c2_112, %c0_113] : memref<18x18x8xf32, #tpu.memory_space<vmem>>, vector<16x16x8xf32>
    %112 = arith.truncf %111 : vector<16x16x8xf32> to vector<16x16x8xbf16>
    %113 = vector.shape_cast %112 : vector<16x16x8xbf16> to vector<256x8xbf16>
    %c5_114 = arith.constant 5 : index
    %c0_115 = arith.constant 0 : index
    %c0_116 = arith.constant 0 : index
    %114 = vector.load %arg3[%c5_114, %c0_115, %c0_116] : memref<9x8x8xbf16, #tpu.memory_space<vmem>>, vector<1x8x8xbf16>
    %115 = vector.shape_cast %114 : vector<1x8x8xbf16> to vector<8x8xbf16>
    %cst_117 = arith.constant dense<0.000000e+00> : vector<256x8xf32>
    %116 = tpu.matmul %113, %115, %cst_117 {dimension_numbers = #tpu.dot_dimension_numbers<[1], [0], [0], [1], [0, 0, 1, 1], [], []>} : vector<256x8xbf16>, vector<8x8xbf16>, vector<256x8xf32> -> vector<256x8xf32>
    %117 = arith.addf %110, %116 : vector<256x8xf32>
    %c2_118 = arith.constant 2 : index
    %c0_119 = arith.constant 0 : index
    %c0_120 = arith.constant 0 : index
    %118 = vector.load %arg8[%c2_118, %c0_119, %c0_120] : memref<18x18x8xf32, #tpu.memory_space<vmem>>, vector<16x16x8xf32>
    %119 = arith.truncf %118 : vector<16x16x8xf32> to vector<16x16x8xbf16>
    %120 = vector.shape_cast %119 : vector<16x16x8xbf16> to vector<256x8xbf16>
    %c6_121 = arith.constant 6 : index
    %c0_122 = arith.constant 0 : index
    %c0_123 = arith.constant 0 : index
    %121 = vector.load %arg3[%c6_121, %c0_122, %c0_123] : memref<9x8x8xbf16, #tpu.memory_space<vmem>>, vector<1x8x8xbf16>
    %122 = vector.shape_cast %121 : vector<1x8x8xbf16> to vector<8x8xbf16>
    %cst_124 = arith.constant dense<0.000000e+00> : vector<256x8xf32>
    %123 = tpu.matmul %120, %122, %cst_124 {dimension_numbers = #tpu.dot_dimension_numbers<[1], [0], [0], [1], [0, 0, 1, 1], [], []>} : vector<256x8xbf16>, vector<8x8xbf16>, vector<256x8xf32> -> vector<256x8xf32>
    %124 = arith.addf %117, %123 : vector<256x8xf32>
    %c2_125 = arith.constant 2 : index
    %c1_126 = arith.constant 1 : index
    %c0_127 = arith.constant 0 : index
    %125 = vector.load %arg8[%c2_125, %c1_126, %c0_127] : memref<18x18x8xf32, #tpu.memory_space<vmem>>, vector<16x16x8xf32>
    %126 = arith.truncf %125 : vector<16x16x8xf32> to vector<16x16x8xbf16>
    %127 = vector.shape_cast %126 : vector<16x16x8xbf16> to vector<256x8xbf16>
    %c7_128 = arith.constant 7 : index
    %c0_129 = arith.constant 0 : index
    %c0_130 = arith.constant 0 : index
    %128 = vector.load %arg3[%c7_128, %c0_129, %c0_130] : memref<9x8x8xbf16, #tpu.memory_space<vmem>>, vector<1x8x8xbf16>
    %129 = vector.shape_cast %128 : vector<1x8x8xbf16> to vector<8x8xbf16>
    %cst_131 = arith.constant dense<0.000000e+00> : vector<256x8xf32>
    %130 = tpu.matmul %127, %129, %cst_131 {dimension_numbers = #tpu.dot_dimension_numbers<[1], [0], [0], [1], [0, 0, 1, 1], [], []>} : vector<256x8xbf16>, vector<8x8xbf16>, vector<256x8xf32> -> vector<256x8xf32>
    %131 = arith.addf %124, %130 : vector<256x8xf32>
    %c2_132 = arith.constant 2 : index
    %c2_133 = arith.constant 2 : index
    %c0_134 = arith.constant 0 : index
    %132 = vector.load %arg8[%c2_132, %c2_133, %c0_134] : memref<18x18x8xf32, #tpu.memory_space<vmem>>, vector<16x16x8xf32>
    %133 = arith.truncf %132 : vector<16x16x8xf32> to vector<16x16x8xbf16>
    %134 = vector.shape_cast %133 : vector<16x16x8xbf16> to vector<256x8xbf16>
    %c8_135 = arith.constant 8 : index
    %c0_136 = arith.constant 0 : index
    %c0_137 = arith.constant 0 : index
    %135 = vector.load %arg3[%c8_135, %c0_136, %c0_137] : memref<9x8x8xbf16, #tpu.memory_space<vmem>>, vector<1x8x8xbf16>
    %136 = vector.shape_cast %135 : vector<1x8x8xbf16> to vector<8x8xbf16>
    %cst_138 = arith.constant dense<0.000000e+00> : vector<256x8xf32>
    %137 = tpu.matmul %134, %136, %cst_138 {dimension_numbers = #tpu.dot_dimension_numbers<[1], [0], [0], [1], [0, 0, 1, 1], [], []>} : vector<256x8xbf16>, vector<8x8xbf16>, vector<256x8xf32> -> vector<256x8xf32>
    %138 = arith.addf %131, %137 : vector<256x8xf32>
    %c0_139 = arith.constant 0 : index
    %c0_140 = arith.constant 0 : index
    %139 = vector.load %arg6[%c0_139, %c0_140] : memref<1x8xf32, #tpu.memory_space<vmem>>, vector<1x8xf32>
    %140 = vector.broadcast %139 : vector<1x8xf32> to vector<256x8xf32>
    %141 = arith.addf %138, %140 : vector<256x8xf32>
    %cst_141 = arith.constant 0.000000e+00 : f32
    %142 = vector.broadcast %cst_141 : f32 to vector<256x8xf32>
    %143 = arith.maximumf %141, %142 : vector<256x8xf32>
    %c0_142 = arith.constant 0 : index
    %c0_143 = arith.constant 0 : index
    %c0_144 = arith.constant 0 : index
    %144 = vector.load %arg7[%c0_142, %c0_143, %c0_144] : memref<1x256x8xf32, #tpu.memory_space<vmem>>, vector<1x256x8xf32>
    %145 = vector.shape_cast %144 : vector<1x256x8xf32> to vector<256x8xf32>
    %146 = vector.shape_cast %143 : vector<256x8xf32> to vector<1x256x8xf32>
    tpu.vector_store %arg7[%c0_142, %c0_143, %c0_144], %146 {strides = array<i32>} : memref<1x256x8xf32, #tpu.memory_space<vmem>>, vector<1x256x8xf32>,
    return
  }
  func.func @transform_0(%arg0: i32) -> (i32, i32, i32, i32) {
    %c0_i32 = arith.constant 0 : i32
    %c0_i32_0 = arith.constant 0 : i32
    %c0_i32_1 = arith.constant 0 : i32
    %c0_i32_2 = arith.constant 0 : i32
    return %arg0, %c0_i32, %c0_i32_0, %c0_i32_1 : i32, i32, i32, i32
  }
  func.func @transform_1(%arg0: i32) -> (i32, i32, i32) {
    %c0_i32 = arith.constant 0 : i32
    %c0_i32_0 = arith.constant 0 : i32
    %c0_i32_1 = arith.constant 0 : i32
    %c0_i32_2 = arith.constant 0 : i32
    return %c0_i32, %c0_i32_0, %c0_i32_1 : i32, i32, i32
  }
  func.func @transform_2(%arg0: i32) -> (i32, i32, i32) {
    %c0_i32 = arith.constant 0 : i32
    %c0_i32_0 = arith.constant 0 : i32
    %c0_i32_1 = arith.constant 0 : i32
    %c0_i32_2 = arith.constant 0 : i32
    return %c0_i32, %c0_i32_0, %c0_i32_1 : i32, i32, i32
  }
  func.func @transform_3(%arg0: i32) -> (i32, i32) {
    %c0_i32 = arith.constant 0 : i32
    %c0_i32_0 = arith.constant 0 : i32
    %c0_i32_1 = arith.constant 0 : i32
    return %c0_i32, %c0_i32_0 : i32, i32
  }
  func.func @transform_4(%arg0: i32) -> (i32, i32) {
    %c0_i32 = arith.constant 0 : i32
    %c0_i32_0 = arith.constant 0 : i32
    %c0_i32_1 = arith.constant 0 : i32
    return %c0_i32, %c0_i32_0 : i32, i32
  }
  func.func @transform_5(%arg0: i32) -> (i32, i32) {
    %c0_i32 = arith.constant 0 : i32
    %c0_i32_0 = arith.constant 0 : i32
    %c0_i32_1 = arith.constant 0 : i32
    return %c0_i32, %c0_i32_0 : i32, i32
  }
  func.func @transform_6(%arg0: i32) -> (i32, i32, i32) {
    %c0_i32 = arith.constant 0 : i32
    %c0_i32_0 = arith.constant 0 : i32
    %c0_i32_1 = arith.constant 0 : i32
    return %arg0, %c0_i32, %c0_i32_0 : i32, i32, i32
  }
}

</mosaic_0001>

<bundles_post_ra>
// kernel: tpu_custom_call.1
= control target key start
LH: loop header
LB: loop body
LE: loop exit
PB: predicated region body
PF: predicated region fallthrough
CT: control target
= control target key end

     0   :  { %s10266_s21 = smov 0   ;;  %s12823_s0 = inlined_call_operand.vmem [shape: bf16[2,18,18,8], index: 0, kind: input, shape index: {}]   ;;  %s12824_s1 = inlined_call_operand.vmem [shape: bf16[9,8,8], index: 1, kind: input, shape index: {}]   ;;  %s12825_s2 = inlined_call_operand.vmem [shape: bf16[9,8,8], index: 2, kind: input, shape index: {}]   ;;  %s12826_s3 = inlined_call_operand.vmem [shape: bf16[8,8], index: 3, kind: input, shape index: {}]   ;;  %s12827_s4 = inlined_call_operand.vmem [shape: f32[1,8], index: 4, kind: input, shape index: {}]   ;;  %s12828_s5 = inlined_call_operand.vmem [shape: f32[1,8], index: 5, kind: input, shape index: {}]   ;;  %s12829_s6 = inlined_call_operand.vmem [shape: f32[2,256,8], index: 6, kind: output, shape index: {}]  }
   0x1 LB: > { %s7908_s22 = sadd.s32 4294967295, %s10228_s21   ;;  %p7912_p0 = scmp.ge.s32.totalorder %s10228_s21, 1  ;;  %s10228_s21 = sphi %s10266_s21, %s16_s21  }
   0x2   : > { %p212_p1 = scmp.lt.s32.totalorder %s10228_s21, 3 }
   0x4   : > { %p213_p2 = pnand %p7912_p0, %p212_p1 }
   0x6   : > { %216 = sbr.rel (%p213_p2) target bundleno = 1631 (0x65f), region = 44 }
   0xd   : > { %v7916_v0 = vld [vmem:[%s12824_s1 + $0x4] sm:$0xf]  ;;  %vm788_vm0 = vcmask 1043456   ;;  %p242_p3 = scmp.lt.s32.totalorder %s7908_s22, 1  ;;  %v285_v2 = vld [vmem:[%s12824_s1] sm:$0xf] }
   0xe   : > { %10140 = vmatprep.subr.msk.bf16.mxu0 %vm788_vm0, %v7916_v0  ;;  %v790_v1 = vsel %vm788_vm0, %v7916_v0, 0  ;;  %vm302_vm1 = vsmask.f32 3328  ;;  %vm303_vm2 = vsmask.f32 7440  ;;  %vm739_vm3 = vcmask 64512  }
   0xf   : > { %8949 = vmatpush3.bf16.msra.mxu0 %v790_v1  ;;  %s13006_s22 = smov (!%p242_p3, %s7908_s22), 1  ;;  %v10312_v14 = vsel %vm788_vm0, %v285_v2, 0  ;;  %vm10324_vm4 = vmor %vm302_vm1, %vm303_vm2  ;;  %v12873_v28 = vmov 0  ;;  %vm1293_vm5 = vcmask 1042432   ;;  %vm1294_vm6 = vcmask 1046532  }
  0x10   : > { %10141 = vmatprep.subr.msk.bf16.mxu0 %vm788_vm0, %v285_v2  ;;  %s10160_s27 = smul.u32 216, %s13006_s22  ;;  %v12874_v28 = vsel %vm10324_vm4, 4294967295, %v12873_v28  ;;  %vm10639_vm7 = vmor %vm1293_vm5, %vm1294_vm6  ;;  %vm4885_vm8 = vcmask 58368   ;;  %s8624_s25 = sshll.u32 %s13006_s22, 8 }
  0x11   : > { %12875 = vst [vmem:[#allocation3_spill] sm:$0xff] %v12874_v28  ;;  %s12710_s28 = scalar_lea.vmem %s12829_s6, %s8624_s25 }
  0x12   : > { %s10289_s30 = scalar_lea.vmem %s12823_s0, %s10160_s27 }
  0x13   : > { %v10292_v3 = vld [vmem:[%s10289_s30] sm:$0xf]  ;;  %v10295_v4 = vld [vmem:[%s10289_s30 + $0x4] sm:$0xf]  ;;  %v286_v5 = vld [vmem:[%s10289_s30 + $0x8] sm:$0x1] }
  0x14   : > { %v306_v6 = vshrl.u32 %v10292_v3, 16  ;;  %v309_v7 = vshll.u32 %v10292_v3, 16  ;;  %v315_v8 = vshll.u32 %v10295_v4, 16  ;;  %v319_v9 = vshrl.u32 %v10295_v4, 16  ;;  %v10303_v10 = vld [vmem:[%s10289_s30 + $0xc] sm:$0xf] }
  0x15   : > { %v325_v11 = vshll.u32 %v286_v5, 16  ;;  %v10306_v12 = vld [vmem:[%s10289_s30 + $0x10] sm:$0xf]  ;;  %v10309_v13 = vld [vmem:[%s10289_s30 + $0x14] sm:$0x1]  ;;  %v330_v20 = vshrl.u32 %v10303_v10, 16 }
  0x16   : > { %v308_v15 = vrot.slane %v306_v6, 4  ;;  %v311_v16 = vrot.slane %v309_v7, 5  ;;  %v317_v17 = vrot.slane %v315_v8, 5  ;;  %v321_v18 = vrot.slane %v319_v9, 4  ;;  %v10320_v27 = vld [vmem:[%s10289_s30 + $0x18] sm:$0xf] }
  0x17   : > { %v327_v19 = vrot.slane %v325_v11, 5  ;;  %v333_v21 = vshll.u32 %v10303_v10, 16  ;;  %v339_v22 = vshll.u32 %v10306_v12, 16  ;;  %v343_v25 = vshrl.u32 %v10306_v12, 16  ;;  %v10329_v32 = vld [vmem:[%s10289_s30 + $0x1c] sm:$0xf] }
  0x18   : > { %v312_v23 = vor.u32 %v311_v16, %v308_v15  ;;  %v322_v24 = vor.u32 %v321_v18, %v317_v17  ;;  %v349_v26 = vshll.u32 %v10309_v13, 16  ;;  %v332_v29 = vrot.slane %v330_v20, 4  ;;  %v288_v40 = vld [vmem:[%s10289_s30 + $0x20] sm:$0x1]  ;;  %v10343_v47 = vld [vmem:[%s10289_s30 + $0x24] sm:$0xf] }
  0x19   : > { %v335_v30 = vrot.slane %v333_v21, 5  ;;  %v341_v31 = vrot.slane %v339_v22, 5  ;;  %v345_v36 = vrot.slane %v343_v25, 4  ;;  %v354_v41 = vshrl.u32 %v10320_v27, 16  ;;  %v10346_v52 = vld [vmem:[%s10289_s30 + $0x28] sm:$0xf] }
  0x1a   : > { %v313_v34 = vrot.slane %v312_v23, 4  ;;  %v323_v35 = vrot.slane %v322_v24, 4  ;;  %v351_v39 = vrot.slane %v349_v26, 5  ;;  %v357_v42 = vshll.u32 %v10320_v27, 16  ;;  %v10353_v59 = vld [vmem:[%s10289_s30 + $0x2c] sm:$0x1] }
  0x1b   : > { %v336_v38 = vor.u32 %v335_v30, %v332_v29  ;;  %v346_v45 = vor.u32 %v345_v36, %v341_v31  ;;  %v363_v46 = vshll.u32 %v10329_v32, 16  ;;  %v356_v50 = vrot.slane %v354_v41, 4  ;;  %v10361_v2 = vld [vmem:[%s10289_s30 + $0x30] sm:$0xf]  ;;  %v10364_v9 = vld [vmem:[%s10289_s30 + $0x34] sm:$0xf] }
  0x1c   : > { %v318_v43 = vsel %vm10324_vm4, %v313_v34, %v317_v17  ;;  %v328_v44 = vsel %vm10324_vm4, %v323_v35, %v327_v19  ;;  %v359_v51 = vrot.slane %v357_v42, 5  ;;  %v367_v55 = vshrl.u32 %v10329_v32, 16  ;;  %v10371_v18 = vld [vmem:[%s12824_s1 + $0x8] sm:$0xf]  ;;  %v10377_v21 = vld [vmem:[%s10289_s30 + $0x38] sm:$0x1] }
  0x1d   : > { %v7917_v48 = vcombine.low %v318_v43, %v328_v44  ;;  %v337_v49 = vrot.slane %v336_v38, 4  ;;  %v347_v53 = vrot.slane %v346_v45, 4  ;;  %v365_v54 = vrot.slane %v363_v46, 5  ;;  %v10385_v36 = vld [vmem:[%s10289_s30 + $0x3c] sm:$0xf] }
  0x1e   : > { %v373_v56 = vshll.u32 %v288_v40, 16  ;;  %v360_v58 = vor.u32 %v359_v51, %v356_v50  ;;  %v378_v60 = vshrl.u32 %v10343_v47, 16  ;;  %v381_v61 = vshll.u32 %v10343_v47, 16  ;;  %v10393_v41 = vld [vmem:[%s10289_s30 + $0x40] sm:$0xf] }
  0x1f   : > { %8950 = vmatprep.mubr.msk.bf16.mxu0 %vm739_vm3, %v7917_v48  ;;  %v342_v57 = vsel %vm10324_vm4, %v337_v49, %v341_v31  ;;  %v352_v62 = vsel %vm10324_vm4, %v347_v53, %v351_v39  ;;  %v369_v63 = vrot.slane %v367_v55, 4  ;;  %v387_v1 = vshll.u32 %v10346_v52, 16  ;;  %v10398_v46 = vld [vmem:[%s10289_s30 + $0x44] sm:$0x1] }
  0x20   : > { %v375_v0 = vrot.slane %v373_v56, 5  ;;  %v7918_v5 = vcombine.low %v342_v57, %v352_v62  ;;  %v361_v6 = vrot.slane %v360_v58, 4  ;;  %v380_v7 = vrot.slane %v378_v60, 4  ;;  %v10406_v57 = vld [vmem:[%s10289_s30 + $0x48] sm:$0xf] }
  0x21   : > { %v383_v8 = vrot.slane %v381_v61, 5  ;;  %v370_v11 = vor.u32 %v369_v63, %v365_v54  ;;  %v389_v15 = vrot.slane %v387_v1, 5  ;;  %v391_v16 = vshrl.u32 %v10346_v52, 16  ;;  %v10412_v63 = vld [vmem:[%s10289_s30 + $0x4c] sm:$0xf] }
  0x22   : > { %v397_v17 = vshll.u32 %v10353_v59, 16  ;;  %8951 = vmatmul.mubr.msk.bf16.vlgmr.msra.gmra.mrb[0].mxu0 %vm739_vm3, %v7918_v5  ;;  %v366_v19 = vsel %vm10324_vm4, %v361_v6, %v365_v54  ;;  %v402_v22 = vshrl.u32 %v10361_v2, 16  ;;  %v405_v23 = vshll.u32 %v10361_v2, 16 }
  0x23   : > { %v384_v20 = vor.u32 %v383_v8, %v380_v7  ;;  %8983 = vmatpush3.bf16.msra.mxu0 %v10312_v14  ;;  %v371_v24 = vrot.slane %v370_v11, 4  ;;  %v393_v25 = vrot.slane %v391_v16, 4  ;;  %v411_v29 = vshll.u32 %v10364_v9, 16 }
  0x24   : > { %v399_v26 = vrot.slane %v397_v17, 5  ;;  %v404_v31 = vrot.slane %v402_v22, 4  ;;  %v407_v34 = vrot.slane %v405_v23, 5  ;;  %v415_v35 = vshrl.u32 %v10364_v9, 16  ;;  %10142 = vmatprep.subr.msk.bf16.mxu0 %vm788_vm0, %v10371_v18  ;;  %v10427_v23 = vld [vmem:[%s10289_s30 + $0x54] sm:$0xf] }
  0x25   : > { %v385_v30 = vrot.slane %v384_v20, 4  ;;  %v376_v38 = vsel %vm10324_vm4, %v371_v24, %v375_v0  ;;  %v394_v14 = vor.u32 %v393_v25, %v389_v15  ;;  %v413_v39 = vrot.slane %v411_v29, 5 }
  0x26   : > { %v421_v40 = vshll.u32 %v10377_v21, 16  ;;  %v7919_v42 = vcombine.low %v366_v19, %v376_v38  ;;  %v408_v44 = vor.u32 %v407_v34, %v404_v31  ;;  %v417_v45 = vrot.slane %v415_v35, 4 }
  0x27   : > { %v390_v43 = vsel %vm10324_vm4, %v385_v30, %v389_v15  ;;  %v395_v48 = vrot.slane %v394_v14, 4  ;;  %v426_v50 = vshrl.u32 %v10385_v36, 16  ;;  %v429_v51 = vshll.u32 %v10385_v36, 16  ;;  %v10417_v15 = vld [vmem:[%s10289_s30 + $0x50] sm:$0x1] }
  0x28   : > { %v423_v49 = vrot.slane %v421_v40, 5  ;;  %8954 = vmatprep.mubr.msk.bf16.mxu0 %vm739_vm3, %v7919_v42  ;;  %v409_v53 = vrot.slane %v408_v44, 4  ;;  %v418_v54 = vor.u32 %v417_v45, %v413_v39  ;;  %v435_v55 = vshll.u32 %v10393_v41, 16  ;;  %v10430_v30 = vld [vmem:[%s10289_s30 + $0x58] sm:$0xf] }
  0x29   : > { %v439_v56 = vshrl.u32 %v10393_v41, 16  ;;  %v400_v58 = vsel %vm10324_vm4, %v395_v48, %v399_v26  ;;  %v428_v60 = vrot.slane %v426_v50, 4  ;;  %v431_v61 = vrot.slane %v429_v51, 5  ;;  %v10439_v48 = vld [vmem:[%s10289_s30 + $0x5c] sm:$0x1] }
  0x2a   : > { %v445_v62 = vshll.u32 %v10398_v46, 16  ;;  %v7920_v0 = vcombine.low %v390_v43, %v400_v58  ;;  %v414_v1 = vsel %vm10324_vm4, %v409_v53, %v413_v39  ;;  %v419_v5 = vrot.slane %v418_v54, 4  ;;  %12876 = vst [vmem:[#allocation4_spill] sm:$0xff] %v10439_v48  ;;  %v10443_v50 = vld [vmem:[%s10289_s30 + $0x60] sm:$0xf] }
  0x2b   : > { %v437_v6 = vrot.slane %v435_v55, 5  ;;  %v432_v7 = vor.u32 %v431_v61, %v428_v60  ;;  %v441_v8 = vrot.slane %v439_v56, 4  ;;  %v450_v16 = vshrl.u32 %v10406_v57, 16  ;;  %v10449_v56 = vld [vmem:[%s10289_s30 + $0x64] sm:$0xf] }
  0x2c   : > { %v447_v11 = vrot.slane %v445_v62, 5  ;;  %8955 = vmatmul.mubr.msk.bf16.gmra.mrb[4].mxu0 %vm739_vm3, %v7920_v0  ;;  %v424_v17 = vsel %vm10324_vm4, %v419_v5, %v423_v49  ;;  %v453_v19 = vshll.u32 %v10406_v57, 16  ;;  %v459_v20 = vshll.u32 %v10412_v63, 16 }
  0x2d   : > { %v463_v22 = vshrl.u32 %v10412_v63, 16  ;;  %v7921_v24 = vcombine.low %v414_v1, %v424_v17  ;;  %v433_v25 = vrot.slane %v432_v7, 4  ;;  %v442_v26 = vor.u32 %v441_v8, %v437_v6 }
  0x2e   : > { %v452_v29 = vrot.slane %v450_v16, 4  ;;  %v455_v31 = vrot.slane %v453_v19, 5  ;;  %v461_v34 = vrot.slane %v459_v20, 5  ;;  %v469_v38 = vshll.u32 %v10417_v15, 16  ;;  %v10464_v19 = vld [vmem:[%s10289_s30 + $0x6c] sm:$0xf] }
  0x2f   : > { %v465_v35 = vrot.slane %v463_v22, 4  ;;  %8958 = vmatprep.mubr.msk.bf16.mxu0 %vm739_vm3, %v7921_v24  ;;  %v438_v14 = vsel %vm10324_vm4, %v433_v25, %v437_v6  ;;  %v443_v39 = vrot.slane %v442_v26, 4  ;;  %v474_v40 = vshrl.u32 %v10427_v23, 16  ;;  %v10467_v26 = vld [vmem:[%s10289_s30 + $0x70] sm:$0xf] }
  0x30   : > { %v477_v42 = vshll.u32 %v10427_v23, 16  ;;  %v456_v43 = vor.u32 %v455_v31, %v452_v29  ;;  %v471_v45 = vrot.slane %v469_v38, 5  ;;  %v483_v49 = vshll.u32 %v10430_v30, 16 }
  0x31   : > { %v466_v44 = vor.u32 %v465_v35, %v461_v34  ;;  %v448_v51 = vsel %vm10324_vm4, %v443_v39, %v447_v11  ;;  %v476_v53 = vrot.slane %v474_v40, 4  ;;  %v487_v55 = vshrl.u32 %v10430_v30, 16  ;;  %v10459_v11 = vld [vmem:[%s10289_s30 + $0x68] sm:$0x1]  ;;  %v10475_v40 = vld [vmem:[%s10289_s30 + $0x74] sm:$0x1] }
  0x32   : > { %v479_v54 = vrot.slane %v477_v42, 5  ;;  %v7922_v58 = vcombine.low %v438_v14, %v448_v51  ;;  %v457_v60 = vrot.slane %v456_v43, 4  ;;  %v485_v62 = vrot.slane %v483_v49, 5  ;;  %12877 = vst [vmem:[#allocation5_spill] sm:$0xff] %v10459_v11  ;;  %12878 = vst [vmem:[#allocation6_spill] sm:$0xff] %v10475_v40 }
  0x33   : > { %v467_v61 = vrot.slane %v466_v44, 4  ;;  %v489_v1 = vrot.slane %v487_v55, 4  ;;  %v493_v5 = vshll.u32 %v10439_v48, 16  ;;  %v498_v6 = vshrl.u32 %v10443_v50, 16  ;;  %v10481_v51 = vld [vmem:[%s10289_s30 + $0x78] sm:$0xf] }
  0x34   : > { %v480_v0 = vor.u32 %v479_v54, %v476_v53  ;;  %8959 = vmatmul.mubr.msk.bf16.gmra.mrb[8].mxu0 %vm739_vm3, %v7922_v58  ;;  %v462_v7 = vsel %vm10324_vm4, %v457_v60, %v461_v34  ;;  %v501_v16 = vshll.u32 %v10443_v50, 16  ;;  %v507_v17 = vshll.u32 %v10449_v56, 16 }
  0x35   : > { %v472_v8 = vsel %vm10324_vm4, %v467_v61, %v471_v45  ;;  %v490_v24 = vor.u32 %v489_v1, %v485_v62  ;;  %v495_v25 = vrot.slane %v493_v5, 5  ;;  %v500_v29 = vrot.slane %v498_v6, 4  ;;  %v10487_v1 = vld [vmem:[%s10289_s30 + $0x7c] sm:$0xf]  ;;  %v10490_v5 = vld [vmem:[%s10289_s30 + $0x80] sm:$0x1] }
  0x36   : > { %v7923_v20 = vcombine.low %v462_v7, %v472_v8  ;;  %v481_v22 = vrot.slane %v480_v0, 4  ;;  %v503_v31 = vrot.slane %v501_v16, 5  ;;  %v509_v34 = vrot.slane %v507_v17, 5  ;;  %12879 = vst [vmem:[#allocation7_spill] sm:$0xff] %v10490_v5  ;;  %v10495_v17 = vld [vmem:[%s10289_s30 + $0x84] sm:$0xf] }
  0x37   : > { %v511_v35 = vshrl.u32 %v10449_v56, 16  ;;  %v491_v14 = vrot.slane %v490_v24, 4  ;;  %v517_v39 = vshll.u32 %v10459_v11, 16  ;;  %v522_v42 = vshrl.u32 %v10464_v19, 16 }
  0x38   : > { %8962 = vmatprep.mubr.msk.bf16.mxu0 %vm739_vm3, %v7923_v20  ;;  %v486_v38 = vsel %vm10324_vm4, %v481_v22, %v485_v62  ;;  %v504_v43 = vor.u32 %v503_v31, %v500_v29  ;;  %v525_v45 = vshll.u32 %v10464_v19, 16  ;;  %v531_v49 = vshll.u32 %v10467_v26, 16  ;;  %v10502_v29 = vld [vmem:[%s10289_s30 + $0x88] sm:$0xf] }
  0x39   : > { %v513_v44 = vrot.slane %v511_v35, 4  ;;  %v496_v53 = vsel %vm10324_vm4, %v491_v14, %v495_v25  ;;  %v519_v54 = vrot.slane %v517_v39, 5  ;;  %v524_v55 = vrot.slane %v522_v42, 4 }
  0x3a   : > { %v535_v58 = vshrl.u32 %v10467_v26, 16  ;;  %v7924_v60 = vcombine.low %v486_v38, %v496_v53  ;;  %v505_v61 = vrot.slane %v504_v43, 4  ;;  %v527_v0 = vrot.slane %v525_v45, 5 }
  0x3b   : > { %v514_v62 = vor.u32 %v513_v44, %v509_v34  ;;  %v533_v6 = vrot.slane %v531_v49, 5  ;;  %v541_v8 = vshll.u32 %v10475_v40, 16  ;;  %v546_v16 = vshrl.u32 %v10481_v51, 16  ;;  %v10509_v44 = vld [vmem:[%s10289_s30 + $0x8c] sm:$0x1] }
  0x3c   : > { %v537_v7 = vrot.slane %v535_v58, 4  ;;  %8963 = vmatmul.mubr.msk.bf16.gmra.mrb[12].mxu0 %vm739_vm3, %v7924_v60  ;;  %v510_v20 = vsel %vm10324_vm4, %v505_v61, %v509_v34  ;;  %v528_v24 = vor.u32 %v527_v0, %v524_v55  ;;  %v549_v25 = vshll.u32 %v10481_v51, 16  ;;  %12880 = vst [vmem:[#allocation8_spill] sm:$0xff] %v10509_v44  ;;  %v10513_v58 = vld [vmem:[%s10289_s30 + $0x90] sm:$0xf] }
  0x3d   : > { %v515_v22 = vrot.slane %v514_v62, 4  ;;  %v543_v35 = vrot.slane %v541_v8, 5  ;;  %v548_v38 = vrot.slane %v546_v16, 4  ;;  %v555_v14 = vshll.u32 %v10487_v1, 16  ;;  %v10519_v0 = vld [vmem:[%s10289_s30 + $0x94] sm:$0xf] }
  0x3e   : > { %v538_v31 = vor.u32 %v537_v7, %v533_v6  ;;  %v529_v42 = vrot.slane %v528_v24, 4  ;;  %v551_v43 = vrot.slane %v549_v25, 5  ;;  %v559_v34 = vshrl.u32 %v10487_v1, 16  ;;  %v10586_v40 = vld [vmem:[%s10289_s30 + $0xbc] sm:$0x1] }
  0x3f   : > { %v520_v39 = vsel %vm10324_vm4, %v515_v22, %v519_v54  ;;  %v557_v53 = vrot.slane %v555_v14, 5  ;;  %v565_v55 = vshll.u32 %v10490_v5, 16  ;;  %v570_v54 = vshrl.u32 %v10495_v17, 16 }
  0x40   : > { %v7925_v45 = vcombine.low %v510_v20, %v520_v39  ;;  %v539_v49 = vrot.slane %v538_v31, 4  ;;  %v534_v60 = vsel %vm10324_vm4, %v529_v42, %v533_v6  ;;  %v552_v61 = vor.u32 %v551_v43, %v548_v38  ;;  %v10529_v42 = vld [vmem:[%s10289_s30 + $0x98] sm:$0x1]  ;;  %v10532_v43 = vld [vmem:[%s10289_s30 + $0x9c] sm:$0xf] }
  0x41   : > { %v561_v62 = vrot.slane %v559_v34, 4  ;;  %v567_v8 = vrot.slane %v565_v55, 5  ;;  %v573_v16 = vshll.u32 %v10495_v17, 16  ;;  %v579_v20 = vshll.u32 %v10502_v29, 16  ;;  %12881 = vst [vmem:[#allocation9_spill] sm:$0xff] %v10529_v42 }
  0x42   : > { %8966 = vmatprep.mubr.msk.bf16.mxu0 %vm739_vm3, %v7925_v45  ;;  %v544_v7 = vsel %vm10324_vm4, %v539_v49, %v543_v35  ;;  %v553_v6 = vrot.slane %v552_v61, 4  ;;  %v572_v25 = vrot.slane %v570_v54, 4  ;;  %v583_v14 = vshrl.u32 %v10502_v29, 16 }
  0x43   : > { %v7926_v22 = vcombine.low %v534_v60, %v544_v7  ;;  %v562_v24 = vor.u32 %v561_v62, %v557_v53  ;;  %v575_v31 = vrot.slane %v573_v16, 5  ;;  %v581_v38 = vrot.slane %v579_v20, 5 }
  0x44   : > { %v589_v39 = vshll.u32 %v10509_v44, 16  ;;  %v558_v35 = vsel %vm10324_vm4, %v553_v6, %v557_v53  ;;  %v594_v45 = vshrl.u32 %v10513_v58, 16  ;;  %v597_v49 = vshll.u32 %v10513_v58, 16  ;;  %v10544_v53 = vld [vmem:[%s10289_s30 + $0xa0] sm:$0xf] }
  0x45   : > { %8967 = vmatmul.mubr.msk.bf16.gmra.mrb[16].mxu0 %vm739_vm3, %v7926_v22  ;;  %v563_v34 = vrot.slane %v562_v24, 4  ;;  %v576_v55 = vor.u32 %v575_v31, %v572_v25  ;;  %v585_v60 = vrot.slane %v583_v14, 4  ;;  %v603_v62 = vshll.u32 %v10519_v0, 16  ;;  %v10547_v25 = vld [vmem:[%s10289_s30 + $0xa4] sm:$0x1] }
  0x46   : > { %v591_v61 = vrot.slane %v589_v39, 5  ;;  %v596_v7 = vrot.slane %v594_v45, 4  ;;  %v599_v16 = vrot.slane %v597_v49, 5  ;;  %v607_v20 = vshrl.u32 %v10519_v0, 16  ;;  %12882 = vst [vmem:[#allocation10_spill] sm:$0xff] %v10547_v25 }
  0x47   : > { %v568_v54 = vsel %vm10324_vm4, %v563_v34, %v567_v8  ;;  %v577_v6 = vrot.slane %v576_v55, 4  ;;  %v586_v24 = vor.u32 %v585_v60, %v581_v38  ;;  %v605_v33 = vrot.slane %v603_v62, 5  ;;  %v10552_v8 = vld [vmem:[%s10289_s30 + $0xa8] sm:$0xf]  ;;  %v10560_v55 = vld [vmem:[%s10289_s30 + $0xac] sm:$0xf] }
  0x48   : > { %v7927_v22 = vcombine.low %v558_v35, %v568_v54  ;;  %v600_v31 = vor.u32 %v599_v16, %v596_v7  ;;  %v609_v14 = vrot.slane %v607_v20, 4  ;;  %v613_v39 = vshll.u32 %v10529_v42, 16 }
  0x49   : > { %v618_v37 = vshrl.u32 %v10532_v43, 16  ;;  %v582_v34 = vsel %vm10324_vm4, %v577_v6, %v581_v38  ;;  %v587_v35 = vrot.slane %v586_v24, 4  ;;  %v621_v45 = vshll.u32 %v10532_v43, 16  ;;  %v10566_v38 = vld [vmem:[%s10289_s30 + $0xb0] sm:$0x1] }
  0x4a   : > { %8970 = vmatprep.mubr.msk.bf16.mxu0 %vm739_vm3, %v7927_v22  ;;  %v627_v49 = vshll.u32 %v10544_v53, 16  ;;  %v601_v60 = vrot.slane %v600_v31, 4  ;;  %v610_v62 = vor.u32 %v609_v14, %v605_v33  ;;  %v615_v54 = vrot.slane %v613_v39, 5  ;;  %12883 = vst [vmem:[#allocation11_spill] sm:$0xff] %v10566_v38 }
  0x4b   : > { %v620_v7 = vrot.slane %v618_v37, 4  ;;  %v592_v16 = vsel %vm10324_vm4, %v587_v35, %v591_v61  ;;  %v623_v20 = vrot.slane %v621_v45, 5  ;;  %v631_v22 = vshrl.u32 %v10544_v53, 16 }
  0x4c   : > { %v629_v42 = vrot.slane %v627_v49, 5  ;;  %v7928_v6 = vcombine.low %v582_v34, %v592_v16  ;;  %v606_v24 = vsel %vm10324_vm4, %v601_v60, %v605_v33  ;;  %v611_v44 = vrot.slane %v610_v62, 4  ;;  %v10579_v49 = vld [vmem:[%s10289_s30 + $0xb4] sm:$0xf] }
  0x4d   : > { %v637_v31 = vshll.u32 %v10547_v25, 16  ;;  %v624_v14 = vor.u32 %v623_v20, %v620_v7  ;;  %v633_v37 = vrot.slane %v631_v22, 4  ;;  %v642_v39 = vshrl.u32 %v10552_v8, 16  ;;  %v10582_v20 = vld [vmem:[%s10289_s30 + $0xb8] sm:$0xf] }
  0x4e   : > { %v645_v61 = vshll.u32 %v10552_v8, 16  ;;  %8971 = vmatmul.mubr.msk.bf16.gmra.mrb[20].mxu0 %vm739_vm3, %v7928_v6  ;;  %v616_v35 = vsel %vm10324_vm4, %v611_v44, %v615_v54  ;;  %v651_v45 = vshll.u32 %v10560_v55, 16  ;;  %v655_v33 = vshrl.u32 %v10560_v55, 16 }
  0x4f   : > { %v639_v34 = vrot.slane %v637_v31, 5  ;;  %v7929_v60 = vcombine.low %v606_v24, %v616_v35  ;;  %v625_v62 = vrot.slane %v624_v14, 4  ;;  %v634_v7 = vor.u32 %v633_v37, %v629_v42 }
  0x50   : > { %v644_v16 = vrot.slane %v642_v39, 4  ;;  %v647_v22 = vrot.slane %v645_v61, 5  ;;  %v653_v25 = vrot.slane %v651_v45, 5  ;;  %v657_v5 = vrot.slane %v655_v33, 4 }
  0x51   : > { %v661_v6 = vshll.u32 %v10566_v38, 16  ;;  %8974 = vmatprep.mubr.msk.bf16.mxu0 %vm739_vm3, %v7929_v60  ;;  %v630_v44 = vsel %vm10324_vm4, %v625_v62, %v629_v42  ;;  %v635_v54 = vrot.slane %v634_v7, 4  ;;  %v666_v24 = vshrl.u32 %v10579_v49, 16 }
  0x52   : > { %v669_v31 = vshll.u32 %v10579_v49, 16  ;;  %v648_v14 = vor.u32 %v647_v22, %v644_v16  ;;  %v658_v37 = vor.u32 %v657_v5, %v653_v25  ;;  %v675_v61 = vshll.u32 %v10582_v20, 16 }
  0x53   : > { %v663_v39 = vrot.slane %v661_v6, 5  ;;  %v640_v35 = vsel %vm10324_vm4, %v635_v54, %v639_v34  ;;  %v668_v45 = vrot.slane %v666_v24, 4  ;;  %v679_v60 = vshrl.u32 %v10582_v20, 16 }
  0x54   : > { %v671_v33 = vrot.slane %v669_v31, 5  ;;  %v7930_v38 = vcombine.low %v630_v44, %v640_v35  ;;  %v649_v11 = vrot.slane %v648_v14, 4  ;;  %v659_v42 = vrot.slane %v658_v37, 4  ;;  %v1254_v35 = vld [vmem:[%s10289_s30 + $0x6c] sm:$0xe] }
  0x55   : > { %v677_v62 = vrot.slane %v675_v61, 5  ;;  %v681_v48 = vrot.slane %v679_v60, 4  ;;  %v685_v16 = vshll.u32 %v10586_v40, 16  ;;  %v7950_v5 = vcombine.low %v10303_v10, %v10306_v12 }
  0x56   : > { %v672_v7 = vor.u32 %v671_v33, %v668_v45  ;;  %v1308_v22 = vrot.slane %v10309_v13, 5  ;;  %8975 = vmatmul.mubr.msk.bf16.gmra.mrb[24].mxu0 %vm739_vm3, %v7930_v38  ;;  %v654_v34 = vsel %vm10324_vm4, %v649_v11, %v653_v25  ;;  %v664_v6 = vsel %vm10324_vm4, %v659_v42, %v663_v39  ;;  %v1246_v25 = vld [vmem:[%s10289_s30 + $0xc] sm:$0xe]  ;;  %v1253_v33 = vld [vmem:[%s10289_s30 + $0x60] sm:$0xe] }
  0x57   : > { %v7952_v44 = vcombine.low %v10343_v47, %v10346_v52  ;;  %v7931_v54 = vcombine.low %v654_v34, %v664_v6  ;;  %v682_v31 = vor.u32 %v681_v48, %v677_v62  ;;  %v687_v14 = vrot.slane %v685_v16, 5  ;;  %v1248_v6 = vld [vmem:[%s10289_s30 + $0x24] sm:$0xe]  ;;  %v1257_v38 = vld [vmem:[%s10289_s30 + $0x90] sm:$0xe] }
  0x58   : > { %v673_v24 = vrot.slane %v672_v7, 4  ;;  %v7953_v37 = vcombine.low %v10361_v2, %v10364_v9  ;;  %v1249_v7 = vld [vmem:[%s10289_s30 + $0x30] sm:$0xe]  ;;  %v1329_v60 = vrot.slane %v10377_v21, 5  ;;  %v12894_v2 = vld [vmem:[#allocation9_spill] sm:$0xff] }
  0x59   : > { %8978 = vmatprep.mubr.msk.bf16.mxu0 %vm739_vm3, %v7931_v54  ;;  %v683_v39 = vrot.slane %v682_v31, 4  ;;  %v12886_v31 = vrot.slane %v10306_v12, 5  ;;  %v5020_v54 = vld [vmem:[%s12825_s2] sm:$0xf] }
  0x5a   : > { %v678_v48 = vsel %vm10324_vm4, %v673_v24, %v677_v62  ;;  %v7982_v24 = vrot.slane %v1246_v25, 9  ;;  %v7984_v25 = vrot.slane %v1248_v6, 9  ;;  %v7985_v6 = vrot.slane %v1249_v7, 9  ;;  %10150 = vmatprep.subr.msk.bf16.mxu1 %vm788_vm0, %v5020_v54 }
  0x5b   : > { %v688_v62 = vsel %vm10324_vm4, %v683_v39, %v687_v14  ;;  %v1307_v14 = vrot.slane %v12886_v31, 4  ;;  %v12887_v39 = vcombine.low %v10292_v3, %v10295_v4  ;;  %v1251_v4 = vld [vmem:[%s10289_s30 + $0x48] sm:$0xe]  ;;  %v7951_v3 = vcombine.low %v10320_v27, %v10329_v32 }
  0x5c   : > { %v7932_v34 = vcombine.low %v678_v48, %v688_v62  ;;  %v12888_v48 = vmov %v12886_v31  ;;  %v1319_v31 = vrot.slane %v10346_v52, 5  ;;  %v1336_v32 = vrot.slane %v10398_v46, 5 }
  0x5d   : > { %v10654_v62 = vsel %vm10639_vm7, %v7982_v24, %v12888_v48  ;;  %v10658_v16 = vsel %vm10639_vm7, %v1307_v14, %v1308_v22  ;;  %v1322_v24 = vrot.slane %v10353_v59, 5  ;;  %v1252_v48 = vld [vmem:[%s10289_s30 + $0x54] sm:$0xe]  ;;  %v1507_v22 = vsel %vm788_vm0, %v10371_v18, 0 }
  0x5e   : > { %8979 = vmatmul.mubr.msk.bf16.gmra.mrb[28].mxu0 %vm739_vm3, %v7932_v34  ;;  %v1250_v34 = vld [vmem:[%s10289_s30 + $0x3c] sm:$0xe]  ;;  %v1321_v42 = vrot.slane %v1319_v31, 4  ;;  %v1326_v14 = vrot.slane %v10364_v9, 5  ;;  %v1333_v18 = vrot.slane %v10393_v41, 5  ;;  %v1343_v46 = vrot.slane %v10417_v15, 5 }
  0x5f   : > { %8984 = vmatprep.mubr.msk.bf16.mxu0 %vm739_vm3, %v12887_v39  ;;  %v10668_v39 = vsel %vm10639_vm7, %v7984_v25, %v1319_v31  ;;  %v10681_v25 = vld [vmem:[%s12824_s1 + $0xc] sm:$0xf]  ;;  %v7986_v31 = vrot.slane %v1250_v34, 9  ;;  %v7987_v34 = vrot.slane %v1251_v4, 9  ;;  %v1385_v9 = vrot.slane %v12894_v2, 5 }
  0x60   : > { %v10685_v59 = vsel %vm10639_vm7, %v1321_v42, %v1322_v24  ;;  %v10692_v21 = vsel %vm10639_vm7, %v7985_v6, %v1326_v14  ;;  %v1328_v27 = vrot.slane %v1326_v14, 4  ;;  %v1335_v42 = vrot.slane %v1333_v18, 4  ;;  %v12895_v2 = vld [vmem:[#allocation10_spill] sm:$0xff] }
  0x61   : > { %v10698_v45 = vsel %vm10639_vm7, %v7986_v31, %v1333_v18  ;;  %v1340_v24 = vrot.slane %v10412_v63, 5  ;;  %v7988_v14 = vrot.slane %v1252_v48, 9  ;;  %v1347_v31 = vrot.slane %v10430_v30, 5 }
  0x62   : > { %v10708_v6 = vsel %vm10639_vm7, %v1328_v27, %v1329_v60  ;;  %v10717_v10 = vsel %vm10639_vm7, %v1335_v42, %v1336_v32  ;;  %v1255_v60 = vld [vmem:[%s10289_s30 + $0x78] sm:$0xe]  ;;  %v1256_v27 = vld [vmem:[%s10289_s30 + $0x84] sm:$0xe]  ;;  %v7989_v42 = vrot.slane %v1253_v33, 9  ;;  %v1392_v47 = vrot.slane %v12895_v2, 5 }
  0x63   : > { %v10721_v12 = vsel %vm10639_vm7, %v7987_v34, %v1340_v24  ;;  %v1349_v48 = vrot.slane %v1347_v31, 4  ;;  %v1354_v34 = vrot.slane %v10449_v56, 5  ;;  %v12897_v2 = vcombine.low %v10385_v36, %v10393_v41 }
  0x65   : > { %v10751_v33 = vsel %vm10639_vm7, %v7989_v42, %v1354_v34  ;;  %v7992_v42 = vrot.slane %v1256_v27, 9 }
  0x66   : > { %8985 = vmatmul.mubr.msk.bf16.vlgmr.msra.gmra.mrb[0].mxu0 %vm739_vm3, %v7950_v5  ;;  %v1342_v5 = vrot.slane %v1340_v24, 4  ;;  %v12890_v24 = vld [vmem:[#allocation5_spill] sm:$0xff] }
  0x67   : > { %9017 = vmatpush3.bf16.msra.mxu0 %v1507_v22  ;;  %8988 = vmatprep.mubr.msk.bf16.mxu0 %vm739_vm3, %v7951_v3  ;;  %v10730_v3 = vsel %vm10639_vm7, %v7988_v14, %v1347_v31  ;;  %v12889_v22 = vld [vmem:[#allocation4_spill] sm:$0xff]  ;;  %v1357_v4 = vrot.slane %v12890_v24, 5  ;;  %v7990_v31 = vrot.slane %v1254_v35, 9  ;;  %v12891_v24 = vld [vmem:[#allocation6_spill] sm:$0xff]  ;;  %v1368_v35 = vrot.slane %v10487_v1, 5 }
  0x68   : > { %10143 = vmatprep.subr.msk.bf16.mxu0 %vm788_vm0, %v10681_v25  ;;  %v1350_v18 = vrot.slane %v12889_v22, 5  ;;  %v10736_v32 = vsel %vm10639_vm7, %v1342_v5, %v1343_v46  ;;  %v1361_v22 = vrot.slane %v10467_v26, 5  ;;  %v1356_v5 = vrot.slane %v1354_v34, 4  ;;  %v12892_v46 = vld [vmem:[#allocation7_spill] sm:$0xff] }
  0x69   : > { %v1364_v7 = vrot.slane %v12891_v24, 5  ;;  %v1371_v11 = vrot.slane %v12892_v46, 5  ;;  %v1375_v34 = vrot.slane %v10502_v29, 5  ;;  %v1370_v27 = vrot.slane %v1368_v35, 4 }
  0x6a   : > { %v10744_v14 = vsel %vm10639_vm7, %v1349_v48, %v1350_v18  ;;  %v10756_v15 = vsel %vm10639_vm7, %v7990_v31, %v1361_v22  ;;  %v1363_v48 = vrot.slane %v1361_v22, 4  ;;  %v7991_v18 = vrot.slane %v1255_v60, 9  ;;  %v1258_v22 = vld [vmem:[%s10289_s30 + $0x9c] sm:$0xe] }
  0x6b   : > { %v10761_v61 = vsel %vm10639_vm7, %v1356_v5, %v1357_v4  ;;  %v10789_v52 = vsel %vm10639_vm7, %v7992_v42, %v1375_v34  ;;  %v10794_v5 = vsel %vm10639_vm7, %v1370_v27, %v1371_v11  ;;  %v7993_v24 = vrot.slane %v1257_v38, 9  ;;  %v12896_v11 = vld [vmem:[#allocation11_spill] sm:$0xff] }
  0x6c   : > { %v10774_v31 = vsel %vm10639_vm7, %v1363_v48, %v1364_v7  ;;  %v10778_v4 = vsel %vm10639_vm7, %v7991_v18, %v1368_v35  ;;  %v12893_v7 = vld [vmem:[#allocation8_spill] sm:$0xff]  ;;  %v1382_v48 = vrot.slane %v10519_v0, 5  ;;  %v7994_v42 = vrot.slane %v1258_v22, 9 }
  0x6d   : > { %v1378_v46 = vrot.slane %v12893_v7, 5  ;;  %v1260_v7 = vld [vmem:[%s10289_s30 + $0xb4] sm:$0xe]  ;;  %v1396_v22 = vrot.slane %v10560_v55, 5  ;;  %v1399_v13 = vrot.slane %v12896_v11, 5  ;;  %v12898_v11 = vcombine.low %v10406_v57, %v10412_v63 }
  0x6e   : > { %8989 = vmatmul.mubr.msk.bf16.gmra.mrb[4].mxu0 %vm739_vm3, %v7952_v44  ;;  %v1377_v44 = vrot.slane %v1375_v34, 4  ;;  %v1389_v34 = vrot.slane %v10544_v53, 5  ;;  %v10811_v38 = vsel %vm10639_vm7, %v7993_v24, %v1382_v48  ;;  %v1384_v27 = vrot.slane %v1382_v48, 4 }
  0x6f   : > { %8992 = vmatprep.mubr.msk.bf16.mxu0 %vm739_vm3, %v7953_v37  ;;  %v1259_v37 = vld [vmem:[%s10289_s30 + $0xa8] sm:$0xe]  ;;  %v7996_v28 = vrot.slane %v1260_v7, 9  ;;  %v1403_v24 = vrot.slane %v10582_v20, 5  ;;  %v12901_v57 = vcombine.low %v10464_v19, %v10467_v26  ;;  %v12902_v63 = vcombine.low %v10481_v51, %v10487_v1  ;;  %v1245_v19 = vld [vmem:[%s10289_s30] sm:$0xe] }
  0x70   : > { %v10803_v35 = vsel %vm10639_vm7, %v1377_v44, %v1378_v46  ;;  %v10816_v18 = vsel %vm10639_vm7, %v7994_v42, %v1389_v34  ;;  %v1391_v44 = vrot.slane %v1389_v34, 4  ;;  %v7995_v46 = vrot.slane %v1259_v37, 9  ;;  %v10219_v26 = vld [vmem:[%s10289_s30 + $0x8] sm:$0x1] }
  0x71   : > { %v10821_v60 = vsel %vm10639_vm7, %v1384_v27, %v1385_v9  ;;  %v1398_v34 = vrot.slane %v1396_v22, 4  ;;  %v1404_v7 = vsel %vm10639_vm7, %v7996_v28, %v1403_v24  ;;  %v12899_v28 = vcombine.low %v10427_v23, %v10430_v30 }
  0x72   : > { %v8010_v48 = vcombine.low %v10811_v38, %v10821_v60  ;;  %v1393_v42 = vsel %vm10639_vm7, %v1391_v44, %v1392_v47  ;;  %v1397_v37 = vsel %vm10639_vm7, %v7995_v46, %v1396_v22  ;;  %v1405_v60 = vrot.slane %v1403_v24, 4  ;;  %v1247_v46 = vld [vmem:[%s10289_s30 + $0x18] sm:$0xe] }
  0x73   : > { %v8011_v9 = vcombine.low %v10816_v18, %v1393_v42  ;;  %v1406_v47 = vrot.slane %v10586_v40, 5  ;;  %v1400_v36 = vsel %vm10639_vm7, %v1398_v34, %v1399_v13  ;;  %v12900_v40 = vcombine.low %v10443_v50, %v10449_v56  ;;  %v10218_v50 = vld [vmem:[%s10289_s30 + $0x4] sm:$0xf] }
  0x74   : > { %v8012_v41 = vcombine.low %v1397_v37, %v1400_v36  ;;  %v12903_v23 = vcombine.low %v10495_v17, %v10502_v29  ;;  %v12904_v30 = vcombine.low %v10513_v58, %v10519_v0  ;;  %v1298_v56 = vrot.slane %v10218_v50, 5  ;;  %v10220_v0 = vld [vmem:[%s10289_s30 + $0x1c] sm:$0xf] }
  0x75   : > { %v1407_v18 = vsel %vm10639_vm7, %v1405_v60, %v1406_v47  ;;  %v1301_v13 = vrot.slane %v10219_v26, 5  ;;  %v7981_v51 = vrot.slane %v1245_v19, 9  ;;  %v12905_v27 = vcombine.low %v10532_v43, %v10544_v53  ;;  %v10221_v43 = vld [vmem:[%s10289_s30 + $0x20] sm:$0x1]  ;;  %v10192_v47 = vld [vmem:[%s10289_s30 + $0x54] sm:$0xff]  }
  0x76   : > { %8993 = vmatmul.mubr.msk.bf16.gmra.mrb[8].mxu0 %vm739_vm3, %v12897_v2  ;;  %v8013_v38 = vcombine.low %v1404_v7, %v1407_v18  ;;  %v1300_v1 = vrot.slane %v1298_v56, 4  ;;  %v12906_v17 = vcombine.low %v10552_v8, %v10560_v55  ;;  %v1312_v44 = vrot.slane %v10220_v0, 5  ;;  %v8143_v7 = vld [vmem:[%s12824_s1 + $0x10] sm:$0xf]  ;;  %v10993_v18 = vld [vmem:[%s10289_s30 + $0x68] sm:$0x1] }
  0x77   : > { %8996 = vmatprep.mubr.msk.bf16.mxu0 %vm739_vm3, %v12898_v11  ;;  %v1299_v29 = vsel %vm10639_vm7, %v7981_v51, %v1298_v56  ;;  %v7983_v24 = vrot.slane %v1247_v46, 9  ;;  %v1315_v53 = vrot.slane %v10221_v43, 5  ;;  %v12907_v37 = vcombine.low %v10579_v49, %v10582_v20  ;;  %v10194_v56 = vld [vmem:[%s10289_s30 + $0x6c] sm:$0xff]   ;;  %v11023_v0 = vld [vmem:[%s10289_s30 + $0x80] sm:$0x1] }
  0x78   : > { %v1302_v58 = vsel %vm10639_vm7, %v1300_v1, %v1301_v13  ;;  %v1314_v42 = vrot.slane %v1312_v44, 4  ;;  %v1866_v2 = vsel %vm788_vm0, %v10681_v25, 0  ;;  %v12908_v49 = vcombine.low %v10654_v62, %v10658_v16  ;;  %v11007_v19 = vld [vmem:[%s10289_s30 + $0x10] sm:$0xf]  ;;  %v8098_v13 = vld [vmem:[%s10289_s30 + $0x18] sm:$0xf] }
  0x79   : > { %v7998_v22 = vcombine.low %v1299_v29, %v1302_v58  ;;  %v1313_v8 = vsel %vm10639_vm7, %v7983_v24, %v1312_v44  ;;  %v12909_v20 = vcombine.low %v10668_v39, %v10685_v59  ;;  %v12910_v25 = vcombine.low %v10692_v21, %v10708_v6  ;;  %v11020_v58 = vld [vmem:[%s10289_s30 + $0x7c] sm:$0xf]  ;;  %v10201_v51 = vld [vmem:[%s10289_s30 + $0xc0] sm:$0xff]  }
  0x7a   : > { %v1316_v55 = vsel %vm10639_vm7, %v1314_v42, %v1315_v53  ;;  %v12911_v16 = vcombine.low %v10698_v45, %v10717_v10  ;;  %v12912_v62 = vcombine.low %v10721_v12, %v10736_v32  ;;  %v12913_v39 = vcombine.low %v10730_v3, %v10744_v14  ;;  %v10187_v10 = vld [vmem:[%s10289_s30 + $0x18] sm:$0xff]   ;;  %v10188_v12 = vld [vmem:[%s10289_s30 + $0x24] sm:$0xff]   ;;  %v10957_v3 = vld [vmem:[%s12824_s1 + $0x14] sm:$0xf] }
  0x7b   : > { %v8000_v34 = vcombine.low %v1313_v8, %v1316_v55  ;;  %v12914_v59 = vcombine.low %v10751_v33, %v10761_v61  ;;  %v12915_v45 = vcombine.low %v10756_v15, %v10774_v31  ;;  %v12916_v21 = vcombine.low %v10778_v4, %v10794_v5  ;;  %v10186_v61 = vld [vmem:[%s10289_s30 + $0xc] sm:$0xff]   ;;  %v10190_v14 = vld [vmem:[%s10289_s30 + $0x3c] sm:$0xff]   ;;  %v8181_v4 = vld [vmem:[%s10289_s30 + $0x48] sm:$0xe] }
  0x7c   : > { %v12917_v6 = vcombine.low %v10789_v52, %v10803_v35  ;;  %v2592_v15 = vsel %vm788_vm0, %v8143_v7, 0  ;;  %v10189_v32 = vld [vmem:[%s10289_s30 + $0x30] sm:$0xff]   ;;  %v10967_v33 = vld [vmem:[%s10289_s30 + $0x4c] sm:$0xf]  ;;  %v8197_v35 = vrot.slane %v8181_v4, 9  ;;  %v2123_v29 = vshrl.u32 %v11007_v19, 16 }
  0x7d   : > { %v10970_v31 = vld [vmem:[%s10289_s30 + $0x50] sm:$0x1]  ;;  %v2888_v52 = vrot.slane %v10967_v33, 5  ;;  %v2134_v44 = vshrl.u32 %v8098_v13, 16  ;;  %v2137_v46 = vshll.u32 %v8098_v13, 16  ;;  %v2916_v24 = vrot.slane %v11020_v58, 5 }
  0x7e   : > { %8997 = vmatmul.mubr.msk.bf16.gmra.mrb[12].mxu0 %vm739_vm3, %v12899_v28  ;;  %v2891_v5 = vrot.slane %v10970_v31, 5  ;;  %v2919_v42 = vrot.slane %v11023_v0, 5  ;;  %v11030_v43 = vld [vmem:[%s10289_s30 + $0x1c] sm:$0xf]  ;;  %v11065_v4 = vld [vmem:[%s10289_s30 + $0x98] sm:$0x1] }
  0x7f   : > { %9000 = vmatprep.mubr.msk.bf16.mxu0 %vm739_vm3, %v12900_v40  ;;  %v10979_v60 = vsel %vm10639_vm7, %v8197_v35, %v2888_v52  ;;  %v2905_v40 = vrot.slane %v10993_v18, 5  ;;  %v2918_v8 = vrot.slane %v2916_v24, 4  ;;  %v10195_v55 = vld [vmem:[%s10289_s30 + $0x78] sm:$0xff]   ;;  %v8187_v35 = vld [vmem:[%s10289_s30 + $0x90] sm:$0xe] }
  0x86   : > { %9001 = vmatmul.mubr.msk.bf16.gmra.mrb[16].mxu0 %vm739_vm3, %v12901_v57 }
  0x87   : > { %9004 = vmatprep.mubr.msk.bf16.mxu0 %vm739_vm3, %v12902_v63 }
  0x8e   : > { %9005 = vmatmul.mubr.msk.bf16.gmra.mrb[20].mxu0 %vm739_vm3, %v12903_v23  ;;  %v10193_v23 = vld [vmem:[%s10289_s30 + $0x60] sm:$0xff]  }
  0x8f   : > { %9008 = vmatprep.mubr.msk.bf16.mxu0 %vm739_vm3, %v12904_v30  ;;  %v8095_v30 = vld [vmem:[%s10289_s30 + $0xc] sm:$0xf] }
  0x90   : > { %v2110_v1 = vshrl.u32 %v8095_v30, 16 }
  0x96   : > { %9009 = vmatmul.mubr.msk.bf16.gmra.mrb[24].mxu0 %vm739_vm3, %v12905_v27  ;;  %v2113_v27 = vshll.u32 %v8095_v30, 16 }
  0x97   : > { %9012 = vmatprep.mubr.msk.bf16.mxu0 %vm739_vm3, %v12906_v17  ;;  %v2119_v17 = vshll.u32 %v11007_v19, 16 }
  0x9e   : > { %9013 = vmatmul.mubr.msk.bf16.gmra.mrb[28].mxu0 %vm739_vm3, %v12907_v37  ;;  %v2112_v37 = vrot.slane %v2110_v1, 4  ;;  %v8104_v1 = vld [vmem:[%s10289_s30 + $0x30] sm:$0xf] }
  0x9f   : > { %9018 = vmatprep.mubr.msk.bf16.mxu0 %vm739_vm3, %v7998_v22  ;;  %v8185_v22 = vld [vmem:[%s10289_s30 + $0x78] sm:$0xe] }
  0xa0   : > { %v8201_v53 = vrot.slane %v8185_v22, 9 }
  0xa6   : > { %9019 = vmatmul.mubr.msk.bf16.vlgmr.msra.gmra.mrb[0].mxu0 %vm739_vm3, %v12908_v49  ;;  %v2125_v49 = vrot.slane %v2123_v29, 4  ;;  %v10198_v29 = vld [vmem:[%s10289_s30 + $0x9c] sm:$0xff]  }
  0xa7   : > { %9051 = vmatpush3.bf16.msra.mxu0 %v1866_v2  ;;  %9022 = vmatprep.mubr.msk.bf16.mxu0 %vm739_vm3, %v8000_v34  ;;  %v11034_v34 = vld [vmem:[%s10289_s30 + $0x14] sm:$0x1]  ;;  %v2115_v2 = vrot.slane %v2113_v27, 5 }
  0xa8   : > { %10144 = vmatprep.subr.msk.bf16.mxu0 %vm788_vm0, %v8143_v7  ;;  %v11036_v7 = vrot.slane %v2119_v17, 5  ;;  %v11079_v27 = vld [vmem:[%s10289_s30 + $0x34] sm:$0xf] }
  0xae   : > { %9023 = vmatmul.mubr.msk.bf16.gmra.mrb[4].mxu0 %vm739_vm3, %v12909_v20  ;;  %v11040_v20 = vsel %vm10639_vm7, %v8201_v53, %v2916_v24 }
  0xaf   : > { %9026 = vmatprep.mubr.msk.bf16.mxu0 %vm739_vm3, %v12910_v25  ;;  %12918 = vst [vmem:[#allocation4_spill] sm:$0xff] %v11040_v20  ;;  %v10196_v25 = vld [vmem:[%s10289_s30 + $0x84] sm:$0xff]  }
  0xb6   : > { %9027 = vmatmul.mubr.msk.bf16.gmra.mrb[8].mxu0 %vm739_vm3, %v12911_v16  ;;  %v2136_v16 = vrot.slane %v2134_v44, 4 }
  0xb7   : > { %9030 = vmatprep.mubr.msk.bf16.mxu0 %vm739_vm3, %v12912_v62  ;;  %v2139_v62 = vrot.slane %v2137_v46, 5 }
  0xbe   : > { %9031 = vmatmul.mubr.msk.bf16.gmra.mrb[12].mxu0 %vm739_vm3, %v12913_v39  ;;  %v2143_v39 = vshll.u32 %v11030_v43, 16 }
  0xbf   : > { %9034 = vmatprep.mubr.msk.bf16.mxu0 %vm739_vm3, %v12914_v59  ;;  %v11046_v59 = vsel %vm10639_vm7, %v2918_v8, %v2919_v42  ;;  %v11162_v8 = vld [vmem:[%s10289_s30 + $0xc4] sm:$0xf] }
  0xc0   : > { %12919 = vst [vmem:[#allocation5_spill] sm:$0xff] %v11046_v59 }
  0xc6   : > { %9035 = vmatmul.mubr.msk.bf16.gmra.mrb[16].mxu0 %vm739_vm3, %v12915_v45  ;;  %v2147_v45 = vshrl.u32 %v11030_v43, 16 }
  0xc7   : > { %9038 = vmatprep.mubr.msk.bf16.mxu0 %vm739_vm3, %v12916_v21 }
  0xce   : > { %9039 = vmatmul.mubr.msk.bf16.gmra.mrb[20].mxu0 %vm739_vm3, %v12917_v6  ;;  %v2129_v6 = vshll.u32 %v11034_v34, 16 }
  0xcf   : > { %9042 = vmatprep.mubr.msk.bf16.mxu0 %vm739_vm3, %v8010_v48  ;;  %v2890_v48 = vrot.slane %v2888_v52, 4  ;;  %v2140_v52 = vor.u32 %v2139_v62, %v2136_v16  ;;  %v2191_v16 = vshll.u32 %v11079_v27, 16 }
  0xd0   : > { %v2131_v46 = vrot.slane %v2129_v6, 5  ;;  %v11107_v6 = vld [vmem:[%s10289_s30 + $0xb0] sm:$0x1] }
  0xd1   : > { %v10984_v11 = vsel %vm10639_vm7, %v2890_v48, %v2891_v5  ;;  %v11068_v5 = vrot.slane %v2143_v39, 5  ;;  %v11086_v22 = vrot.slane %v2140_v52, 4  ;;  %v2195_v39 = vshrl.u32 %v11079_v27, 16  ;;  %v8189_v52 = vld [vmem:[%s10289_s30 + $0xa8] sm:$0xe] }
  0xd6   : > { %9043 = vmatmul.mubr.msk.bf16.gmra.mrb[24].mxu0 %vm739_vm3, %v8011_v9  ;;  %v10191_v9 = vld [vmem:[%s10289_s30 + $0x48] sm:$0xff]  }
  0xd7   : > { %9046 = vmatprep.mubr.msk.bf16.mxu0 %vm739_vm3, %v8012_v41  ;;  %v10990_v41 = vld [vmem:[%s10289_s30 + $0x64] sm:$0xf] }
  0xd8   : > { %v2902_v28 = vrot.slane %v10990_v41, 5 }
  0xda   : > { %v2904_v63 = vrot.slane %v2902_v28, 4 }
  0xdc   : > { %v11011_v26 = vsel %vm10639_vm7, %v2904_v63, %v2905_v40  ;;  %v8203_v40 = vrot.slane %v8187_v35, 9 }
  0xde   : > { %9047 = vmatmul.mubr.msk.bf16.gmra.mrb[28].mxu0 %vm739_vm3, %v8013_v38  ;;  %v8183_v38 = vld [vmem:[%s10289_s30 + $0x60] sm:$0xe] }
  0xdf   : > { %9052 = vmatprep.mubr.msk.bf16.mxu0 %vm739_vm3, %v10186_v61  ;;  %v8199_v57 = vrot.slane %v8183_v38, 9  ;;  %v11053_v61 = vld [vmem:[%s10289_s30 + $0x20] sm:$0x1] }
  0xe0   : > { %v2153_v63 = vshll.u32 %v11053_v61, 16 }
  0xe1   : > { %v11003_v50 = vsel %vm10639_vm7, %v8199_v57, %v2902_v28  ;;  %v10197_v57 = vld [vmem:[%s10289_s30 + $0x90] sm:$0xff]  }
  0xe6   : > { %9053 = vmatmul.mubr.msk.bf16.vlgmr.msra.gmra.mrb[0].mxu0 %vm739_vm3, %v10187_v10  ;;  %v8101_v10 = vld [vmem:[%s10289_s30 + $0x24] sm:$0xf] }
  0xe7   : > { %9085 = vmatpush3.bf16.msra.mxu0 %v2592_v15  ;;  %9056 = vmatprep.mubr.msk.bf16.mxu0 %vm739_vm3, %v10188_v12  ;;  %v2116_v12 = vor.u32 %v2115_v2, %v2112_v37  ;;  %v2126_v15 = vor.u32 %v2125_v49, %v11036_v7  ;;  %v2158_v38 = vshrl.u32 %v8101_v10, 16  ;;  %v2161_v28 = vshll.u32 %v8101_v10, 16 }
  0xe8   : > { %10145 = vmatprep.subr.msk.bf16.mxu0 %vm788_vm0, %v10957_v3  ;;  %v2182_v49 = vshrl.u32 %v8104_v1, 16 }
  0xe9   : > { %v2127_v44 = vrot.slane %v2126_v15, 4  ;;  %v2160_v53 = vrot.slane %v2158_v38, 4  ;;  %v2163_v37 = vrot.slane %v2161_v28, 5  ;;  %v11113_v15 = vrot.slane %v2153_v63, 5  ;;  %v8107_v28 = vld [vmem:[%s10289_s30 + $0x3c] sm:$0xf] }
  0xeb   : > { %v2164_v38 = vor.u32 %v2163_v37, %v2160_v53  ;;  %v2206_v37 = vshrl.u32 %v8107_v28, 16 }
  0xee   : > { %9057 = vmatmul.mubr.msk.bf16.gmra.mrb[4].mxu0 %vm739_vm3, %v10189_v32  ;;  %v11059_v32 = vld [vmem:[%s10289_s30 + $0x28] sm:$0xf] }
  0xef   : > { %9060 = vmatprep.mubr.msk.bf16.mxu0 %vm739_vm3, %v10190_v14  ;;  %v11062_v14 = vld [vmem:[%s10289_s30 + $0x94] sm:$0xf]  ;;  %v2171_v13 = vshrl.u32 %v11059_v32, 16 }
  0xf0   : > { %v2930_v48 = vrot.slane %v11062_v14, 5 }
  0xf1   : > { %v2173_v62 = vrot.slane %v2171_v13, 4 }
  0xf2   : > { %v2932_v30 = vrot.slane %v2930_v48, 4  ;;  %v11083_v17 = vsel %vm10639_vm7, %v8203_v40, %v2930_v48  ;;  %v2947_v48 = vrot.slane %v11107_v6, 5  ;;  %v8205_v40 = vrot.slane %v8189_v52, 9 }
  0xf3   : > { %12920 = vst [vmem:[#allocation6_spill] sm:$0xff] %v11083_v17 }
  0xf6   : > { %9061 = vmatmul.mubr.msk.bf16.gmra.mrb[8].mxu0 %vm739_vm3, %v10191_v9  ;;  %v2933_v9 = vrot.slane %v11065_v4, 5 }
  0xf7   : > { %9064 = vmatprep.mubr.msk.bf16.mxu0 %vm739_vm3, %v10192_v47  ;;  %v2149_v47 = vrot.slane %v2147_v45, 4  ;;  %v11104_v45 = vld [vmem:[%s10289_s30 + $0xac] sm:$0xf] }
  0xf8   : > { %v11090_v24 = vsel %vm10639_vm7, %v2932_v30, %v2933_v9  ;;  %v2944_v35 = vrot.slane %v11104_v45, 5  ;;  %v2132_v9 = vsel %vm10324_vm4, %v2127_v44, %v2131_v46  ;;  %v2197_v44 = vrot.slane %v2195_v39, 4 }
  0xf9   : > { %12921 = vst [vmem:[#allocation7_spill] sm:$0xff] %v11090_v24  ;;  %v2150_v42 = vor.u32 %v2149_v47, %v11068_v5 }
  0xfa   : > { %v2946_v30 = vrot.slane %v2944_v35, 4  ;;  %v11136_v46 = vsel %vm10639_vm7, %v8205_v40, %v2944_v35  ;;  %v2165_v35 = vrot.slane %v2164_v38, 4  ;;  %v11165_v38 = vld [vmem:[%s10289_s30 + $0xc8] sm:$0x1] }
  0xfb   : > { %v11120_v47 = vrot.slane %v2150_v42, 4  ;;  %12923 = vst [vmem:[#allocation8_spill] sm:$0xff] %v11136_v46  ;;  %v10200_v42 = vld [vmem:[%s10289_s30 + $0xb4] sm:$0xff]   ;;  %v2239_v46 = vshll.u32 %v10967_v33, 16 }
  0xfe   : > { %9065 = vmatmul.mubr.msk.bf16.gmra.mrb[12].mxu0 %vm739_vm3, %v10193_v23  ;;  %v2167_v23 = vshll.u32 %v11059_v32, 16 }
  0xff   : > { %9068 = vmatprep.mubr.msk.bf16.mxu0 %vm739_vm3, %v10194_v56  ;;  %v2117_v56 = vrot.slane %v2116_v12, 4 }
 0x100   : > { %v11098_v2 = vrot.slane %v2167_v23, 5  ;;  %v11125_v23 = vld [vmem:[%s10289_s30 + $0x40] sm:$0xf] }
 0x101   : > { %v2122_v12 = vsel %vm10324_vm4, %v2117_v56, %v11036_v7  ;;  %v10199_v56 = vld [vmem:[%s10289_s30 + $0xa8] sm:$0xff]   ;;  %v2215_v39 = vshll.u32 %v11125_v23, 16  ;;  %v2219_v52 = vshrl.u32 %v11125_v23, 16 }
 0x102   : > { %v2174_v13 = vor.u32 %v2173_v62, %v11098_v2  ;;  %v11139_v53 = vcombine.low %v2122_v12, %v2132_v9  ;;  %v11144_v62 = vsel %vm10639_vm7, %v2946_v30, %v2947_v48 }
 0x103   : > { %12925 = vst [vmem:[#allocation10_spill] sm:$0xff] %v11144_v62 }
 0x104   : > { %12924 = vst [vmem:[#allocation9_spill] sm:$0xff] %v11139_v53 }
 0x106   : > { %9069 = vmatmul.mubr.msk.bf16.gmra.mrb[16].mxu0 %vm739_vm3, %v10195_v55  ;;  %v11096_v55 = vld [vmem:[%s10289_s30 + $0x2c] sm:$0x1] }
 0x107   : > { %9072 = vmatprep.mubr.msk.bf16.mxu0 %vm739_vm3, %v10196_v25  ;;  %v2185_v25 = vshll.u32 %v8104_v1, 16  ;;  %v2177_v7 = vshll.u32 %v11096_v55, 16  ;;  %v11130_v1 = vld [vmem:[%s10289_s30 + $0x38] sm:$0x1] }
 0x108   : > { %v2201_v48 = vshll.u32 %v11130_v1, 16 }
 0x109   : > { %v2187_v63 = vrot.slane %v2185_v25, 5  ;;  %v8110_v25 = vld [vmem:[%s10289_s30 + $0x48] sm:$0xf]  ;;  %v2179_v9 = vrot.slane %v2177_v7, 5  ;;  %v2208_v7 = vrot.slane %v2206_v37, 4 }
 0x10a   : > { %v2230_v30 = vshrl.u32 %v8110_v25, 16  ;;  %v2233_v12 = vshll.u32 %v8110_v25, 16  ;;  %v11190_v25 = vld [vmem:[%s10289_s30 + $0x58] sm:$0xf] }
 0x10e   : > { %9073 = vmatmul.mubr.msk.bf16.gmra.mrb[20].mxu0 %vm739_vm3, %v10197_v57  ;;  %v2184_v57 = vrot.slane %v2182_v49, 4  ;;  %v2209_v49 = vshll.u32 %v8107_v28, 16 }
 0x10f   : > { %9076 = vmatprep.mubr.msk.bf16.mxu0 %vm739_vm3, %v10198_v29  ;;  %v11132_v29 = vrot.slane %v2191_v16, 5  ;;  %v2146_v16 = vsel %vm10324_vm4, %v11086_v22, %v11068_v5  ;;  %v2156_v5 = vsel %vm10324_vm4, %v11120_v47, %v11113_v15  ;;  %v2175_v22 = vrot.slane %v2174_v13, 4  ;;  %v11172_v47 = vld [vmem:[%s10289_s30 + $0x44] sm:$0x1] }
 0x110   : > { %v2188_v28 = vor.u32 %v2187_v63, %v2184_v57  ;;  %v2211_v57 = vrot.slane %v2209_v49, 5  ;;  %v8191_v63 = vld [vmem:[%s10289_s30 + $0xc0] sm:$0xe]  ;;  %v2961_v15 = vrot.slane %v11165_v38, 5  ;;  %v11174_v13 = vrot.slane %v2215_v39, 5 }
 0x111   : > { %v2198_v40 = vor.u32 %v2197_v44, %v11132_v29  ;;  %v2221_v44 = vrot.slane %v2219_v52, 4  ;;  %v8207_v21 = vrot.slane %v8191_v63, 9  ;;  %v11182_v49 = vrot.slane %v2201_v48, 5  ;;  %v8113_v52 = vld [vmem:[%s10289_s30 + $0x54] sm:$0xf] }
 0x112   : > { %v11180_v37 = vrot.slane %v2188_v28, 4  ;;  %v2180_v62 = vsel %vm10324_vm4, %v2175_v22, %v2179_v9  ;;  %v2243_v39 = vshrl.u32 %v10967_v33, 16  ;;  %v2225_v28 = vshll.u32 %v11172_v47, 16 }
 0x113   : > { %v2222_v9 = vor.u32 %v2221_v44, %v11174_v13  ;;  %v2232_v22 = vrot.slane %v2230_v30, 4  ;;  %v2235_v33 = vrot.slane %v2233_v12, 5  ;;  %v3062_v30 = vsel %vm788_vm0, %v10957_v3, 0 }
 0x114   : > { %v11213_v12 = vrot.slane %v2239_v46, 5  ;;  %v2227_v3 = vrot.slane %v2225_v28, 5  ;;  %v11228_v46 = vld [vmem:[%s10289_s30 + $0x5c] sm:$0x1] }
 0x116   : > { %9077 = vmatmul.mubr.msk.bf16.gmra.mrb[24].mxu0 %vm739_vm3, %v10199_v56  ;;  %v2958_v56 = vrot.slane %v11162_v8, 5 }
 0x117   : > { %9080 = vmatprep.mubr.msk.bf16.mxu0 %vm739_vm3, %v10200_v42  ;;  %v2170_v42 = vsel %vm10324_vm4, %v2165_v35, %v11098_v2  ;;  %v11196_v2 = vrot.slane %v2198_v40, 4  ;;  %v2212_v35 = vor.u32 %v2211_v57, %v2208_v7  ;;  %v2263_v40 = vshll.u32 %v11190_v25, 16 }
 0x118   : > { %v2960_v36 = vrot.slane %v2958_v56, 4  ;;  %v11194_v63 = vsel %vm10639_vm7, %v8207_v21, %v2958_v56  ;;  %v2254_v21 = vshrl.u32 %v8113_v52, 16  ;;  %v2257_v56 = vshll.u32 %v8113_v52, 16 }
 0x119   : > { %12926 = vst [vmem:[#allocation11_spill] sm:$0xff] %v11194_v63  ;;  %v2267_v7 = vshrl.u32 %v11190_v25, 16  ;;  %v2245_v57 = vrot.slane %v2243_v39, 4  ;;  %v2213_v44 = vrot.slane %v2212_v35, 4  ;;  %v2223_v39 = vrot.slane %v2222_v9, 4 }
 0x11a   : > { %v11201_v48 = vsel %vm10639_vm7, %v2960_v36, %v2961_v15  ;;  %v11209_v36 = vcombine.low %v2146_v16, %v2156_v5  ;;  %v11217_v15 = vcombine.low %v2170_v42, %v2180_v62  ;;  %v2204_v16 = vsel %vm10324_vm4, %v11196_v2, %v11182_v49  ;;  %v8116_v5 = vld [vmem:[%s10289_s30 + $0x60] sm:$0xf]  ;;  %v8119_v42 = vld [vmem:[%s10289_s30 + $0x6c] sm:$0xf] }
 0x11b   : > { %12927 = vst [vmem:[#allocation3_spill] sm:$0xff] %v11201_v48  ;;  %v2236_v52 = vor.u32 %v2235_v33, %v2232_v22  ;;  %v2249_v62 = vshll.u32 %v10970_v31, 16  ;;  %v2256_v24 = vrot.slane %v2254_v21, 4  ;;  %v11233_v48 = vrot.slane %v2263_v40, 5 }
 0x11c   : > { %12928 = vst [vmem:[#allocation12_spill] sm:$0xff] %v11209_v36  ;;  %12929 = vst [vmem:[#allocation13_spill] sm:$0xff] %v11217_v15  ;;  %v2246_v63 = vor.u32 %v2245_v57, %v11213_v12  ;;  %v2273_v49 = vshll.u32 %v11228_v46, 16  ;;  %v2278_v2 = vshrl.u32 %v8116_v5, 16  ;;  %v2281_v28 = vshll.u32 %v8116_v5, 16 }
 0x11d   : > { %v2287_v35 = vshll.u32 %v10990_v41, 16  ;;  %v2291_v9 = vshrl.u32 %v10990_v41, 16  ;;  %v2302_v31 = vshrl.u32 %v8119_v42, 16  ;;  %v2305_v22 = vshll.u32 %v8119_v42, 16  ;;  %v8122_v41 = vld [vmem:[%s10289_s30 + $0x78] sm:$0xf] }
 0x11e   : > { %9081 = vmatmul.mubr.msk.bf16.gmra.mrb[28].mxu0 %vm739_vm3, %v10201_v51  ;;  %v2194_v51 = vsel %vm10324_vm4, %v11180_v37, %v11132_v29  ;;  %v2269_v29 = vrot.slane %v2267_v7, 4  ;;  %v11236_v37 = vld [vmem:[%s10289_s30 + $0x70] sm:$0xf]  ;;  %v2218_v33 = vsel %vm10324_vm4, %v2213_v44, %v11174_v13  ;;  %v2228_v21 = vsel %vm10324_vm4, %v2223_v39, %v2227_v3  ;;  %v11254_v42 = vld [vmem:[%s12824_s1 + $0x18] sm:$0xf] }
 0x11f   : > { %9086 = vmatprep.mubr.msk.bf16.mxu0 %vm739_vm3, %v11139_v53  ;;  %v2259_v53 = vrot.slane %v2257_v56, 5  ;;  %v2311_v56 = vshll.u32 %v11236_v37, 16  ;;  %v2315_v40 = vshrl.u32 %v11236_v37, 16  ;;  %v2237_v7 = vrot.slane %v2236_v52, 4 }
 0x120   : > { %v2251_v57 = vrot.slane %v2249_v62, 5  ;;  %v2270_v17 = vor.u32 %v2269_v29, %v11233_v48  ;;  %v2247_v13 = vrot.slane %v2246_v63, 4  ;;  %v2275_v3 = vrot.slane %v2273_v49, 5  ;;  %v11263_v29 = vld [vmem:[%s10289_s30 + $0x74] sm:$0x1] }
 0x121   : > { %v2260_v5 = vor.u32 %v2259_v53, %v2256_v24  ;;  %v2280_v44 = vrot.slane %v2278_v2, 4  ;;  %v2283_v39 = vrot.slane %v2281_v28, 5  ;;  %v11260_v24 = vrot.slane %v2287_v35, 5 }
 0x122   : > { %v2293_v53 = vrot.slane %v2291_v9, 4  ;;  %v2304_v52 = vrot.slane %v2302_v31, 4  ;;  %v2307_v62 = vrot.slane %v2305_v22, 5  ;;  %v11265_v59 = vrot.slane %v2311_v56, 5 }
 0x123   : > { %v2317_v20 = vrot.slane %v2315_v40, 4  ;;  %v2329_v63 = vshll.u32 %v8122_v41, 16  ;;  %v2271_v49 = vrot.slane %v2270_v17, 4  ;;  %v2335_v2 = vshll.u32 %v11020_v58, 16 }
 0x124   : > { %v2339_v28 = vshrl.u32 %v11020_v58, 16  ;;  %v11271_v35 = vcombine.low %v2194_v51, %v2204_v16  ;;  %v11273_v9 = vcombine.low %v2218_v33, %v2228_v21  ;;  %v2242_v31 = vsel %vm10324_vm4, %v2237_v7, %v11213_v12  ;;  %v11285_v58 = vld [vmem:[%s10289_s30 + $0x88] sm:$0xf] }
 0x125   : > { %v2252_v22 = vsel %vm10324_vm4, %v2247_v13, %v2251_v57  ;;  %v2284_v56 = vor.u32 %v2283_v39, %v2280_v44  ;;  %v2294_v40 = vor.u32 %v2293_v53, %v11260_v24  ;;  %v2297_v17 = vshll.u32 %v10993_v18, 16 }
 0x126   : > { %9087 = vmatmul.mubr.msk.bf16.vlgmr.msra.gmra.mrb[0].mxu0 %vm739_vm3, %v11209_v36  ;;  %v2326_v36 = vshrl.u32 %v8122_v41, 16  ;;  %12930 = vst [vmem:[#allocation14_spill] sm:$0xff] %v11271_v35  ;;  %12931 = vst [vmem:[#allocation15_spill] sm:$0xff] %v11273_v9  ;;  %v8125_v41 = vld [vmem:[%s10289_s30 + $0x84] sm:$0xf]  ;;  %v2308_v51 = vor.u32 %v2307_v62, %v2304_v52  ;;  %v2318_v16 = vor.u32 %v2317_v20, %v11265_v59  ;;  %v2331_v21 = vrot.slane %v2329_v63, 5 }
 0x127   : > { %9119 = vmatpush3.bf16.msra.mxu0 %v3062_v30  ;;  %9090 = vmatprep.mubr.msk.bf16.mxu0 %vm739_vm3, %v11217_v15  ;;  %v2261_v30 = vrot.slane %v2260_v5, 4  ;;  %v2321_v5 = vshll.u32 %v11263_v29, 16  ;;  %v2276_v7 = vsel %vm10324_vm4, %v2271_v49, %v2275_v3  ;;  %v11293_v57 = vrot.slane %v2335_v2, 5  ;;  %v8128_v49 = vld [vmem:[%s10289_s30 + $0x90] sm:$0xf] }
 0x128   : > { %10146 = vmatprep.subr.msk.bf16.mxu0 %vm788_vm0, %v11254_v42  ;;  %v2328_v33 = vrot.slane %v2326_v36, 4  ;;  %v2341_v18 = vrot.slane %v2339_v28, 4  ;;  %v2350_v13 = vshrl.u32 %v8125_v41, 16  ;;  %v2353_v44 = vshll.u32 %v8125_v41, 16 }
 0x129   : > { %v2266_v12 = vsel %vm10324_vm4, %v2261_v30, %v11233_v48  ;;  %v2359_v20 = vshll.u32 %v11285_v58, 16  ;;  %v2363_v36 = vshrl.u32 %v11285_v58, 16  ;;  %v2285_v48 = vrot.slane %v2284_v56, 4 }
 0x12a   : > { %v2295_v39 = vrot.slane %v2294_v40, 4  ;;  %v2299_v3 = vrot.slane %v2297_v17, 5  ;;  %v2323_v53 = vrot.slane %v2321_v5, 5  ;;  %v2309_v52 = vrot.slane %v2308_v51, 4 }
 0x12b   : > { %v2319_v62 = vrot.slane %v2318_v16, 4  ;;  %v2332_v63 = vor.u32 %v2331_v21, %v2328_v33  ;;  %v2345_v30 = vshll.u32 %v11023_v0, 16  ;;  %v11303_v2 = vcombine.low %v2242_v31, %v2252_v22  ;;  %v8131_v16 = vld [vmem:[%s10289_s30 + $0x9c] sm:$0xf]  ;;  %v11320_v33 = vld [vmem:[%s10289_s30 + $0xa0] sm:$0xf] }
 0x12c   : > { %v11305_v28 = vcombine.low %v2266_v12, %v2276_v7  ;;  %v2342_v41 = vor.u32 %v2341_v18, %v11293_v57  ;;  %v2352_v56 = vrot.slane %v2350_v13, 4  ;;  %v2355_v40 = vrot.slane %v2353_v44, 5 }
 0x12d   : > { %12932 = vst [vmem:[#allocation16_spill] sm:$0xff] %v11303_v2  ;;  %v11311_v17 = vrot.slane %v2359_v20, 5  ;;  %v2365_v5 = vrot.slane %v2363_v36, 4  ;;  %v2290_v51 = vsel %vm10324_vm4, %v2285_v48, %v11260_v24  ;;  %v2300_v0 = vsel %vm10324_vm4, %v2295_v39, %v2299_v3 }
 0x12e   : > { %9091 = vmatmul.mubr.msk.bf16.gmra.mrb[4].mxu0 %vm739_vm3, %v11271_v35  ;;  %12933 = vst [vmem:[#allocation17_spill] sm:$0xff] %v11305_v28  ;;  %v11309_v35 = vld [vmem:[%s10289_s30 + $0x8c] sm:$0x1]  ;;  %v2374_v31 = vshrl.u32 %v8128_v49, 16  ;;  %v2377_v22 = vshll.u32 %v8128_v49, 16  ;;  %v2314_v21 = vsel %vm10324_vm4, %v2309_v52, %v11265_v59  ;;  %v2324_v12 = vsel %vm10324_vm4, %v2319_v62, %v2323_v53 }
 0x12f   : > { %9094 = vmatprep.mubr.msk.bf16.mxu0 %vm739_vm3, %v11273_v9  ;;  %v2333_v7 = vrot.slane %v2332_v63, 4  ;;  %v2347_v18 = vrot.slane %v2345_v30, 5  ;;  %v2343_v13 = vrot.slane %v2342_v41, 4  ;;  %v2369_v24 = vshll.u32 %v11309_v35, 16 }
 0x130   : > { %v2383_v44 = vshll.u32 %v11062_v14, 16  ;;  %v2387_v20 = vshrl.u32 %v11062_v14, 16  ;;  %v2398_v36 = vshrl.u32 %v8131_v16, 16  ;;  %v2401_v48 = vshll.u32 %v8131_v16, 16 }
 0x131   : > { %v2407_v59 = vshll.u32 %v11320_v33, 16  ;;  %v2411_v39 = vshrl.u32 %v11320_v33, 16  ;;  %v2356_v3 = vor.u32 %v2355_v40, %v2352_v56  ;;  %v2366_v53 = vor.u32 %v2365_v5, %v11311_v17  ;;  %v11349_v40 = vld [vmem:[%s10289_s30 + $0xa4] sm:$0x1] }
 0x132   : > { %v2376_v52 = vrot.slane %v2374_v31, 4  ;;  %v2379_v62 = vrot.slane %v2377_v22, 5  ;;  %v11337_v14 = vcombine.low %v2290_v51, %v2300_v0  ;;  %v11339_v63 = vcombine.low %v2314_v21, %v2324_v12  ;;  %v8134_v22 = vld [vmem:[%s10289_s30 + $0xa8] sm:$0xf] }
 0x133   : > { %v2338_v30 = vsel %vm10324_vm4, %v2333_v7, %v11293_v57  ;;  %v2348_v49 = vsel %vm10324_vm4, %v2343_v13, %v2347_v18  ;;  %v2371_v41 = vrot.slane %v2369_v24, 5  ;;  %v11346_v16 = vrot.slane %v2383_v44, 5 }
 0x134   : > { %12934 = vst [vmem:[#allocation18_spill] sm:$0xff] %v11337_v14  ;;  %12935 = vst [vmem:[#allocation19_spill] sm:$0xff] %v11339_v63  ;;  %v2389_v56 = vrot.slane %v2387_v20, 4  ;;  %v2400_v5 = vrot.slane %v2398_v36, 4  ;;  %v2403_v51 = vrot.slane %v2401_v48, 5  ;;  %v2409_v0 = vrot.slane %v2407_v59, 5 }
 0x135   : > { %v2413_v31 = vrot.slane %v2411_v39, 4  ;;  %v2357_v21 = vrot.slane %v2356_v3, 4  ;;  %v2367_v12 = vrot.slane %v2366_v53, 4  ;;  %v2393_v57 = vshll.u32 %v11065_v4, 16  ;;  %v8137_v20 = vld [vmem:[%s10289_s30 + $0xb4] sm:$0xf] }
 0x136   : > { %9095 = vmatmul.mubr.msk.bf16.gmra.mrb[8].mxu0 %vm739_vm3, %v11303_v2  ;;  %v2417_v7 = vshll.u32 %v11349_v40, 16  ;;  %v11354_v18 = vcombine.low %v2338_v30, %v2348_v49  ;;  %v2390_v13 = vor.u32 %v2389_v56, %v11346_v16  ;;  %v2422_v24 = vshrl.u32 %v8134_v22, 16  ;;  %v11359_v2 = vld [vmem:[%s10289_s30 + $0xb8] sm:$0xf] }
 0x137   : > { %9098 = vmatprep.mubr.msk.bf16.mxu0 %vm739_vm3, %v11305_v28  ;;  %v2380_v28 = vor.u32 %v2379_v62, %v2376_v52  ;;  %v2425_v44 = vshll.u32 %v8134_v22, 16  ;;  %v2404_v36 = vor.u32 %v2403_v51, %v2400_v5  ;;  %v2414_v48 = vor.u32 %v2413_v31, %v2409_v0 }
 0x138   : > { %12936 = vst [vmem:[#allocation20_spill] sm:$0xff] %v11354_v18  ;;  %v2431_v59 = vshll.u32 %v11104_v45, 16  ;;  %v2435_v4 = vshrl.u32 %v11104_v45, 16  ;;  %v2362_v39 = vsel %vm10324_vm4, %v2357_v21, %v11311_v17  ;;  %v2372_v3 = vsel %vm10324_vm4, %v2367_v12, %v2371_v41 }
 0x139   : > { %v2381_v53 = vrot.slane %v2380_v28, 4  ;;  %v2395_v52 = vrot.slane %v2393_v57, 5  ;;  %v2446_v62 = vshrl.u32 %v8137_v20, 16  ;;  %v2449_v30 = vshll.u32 %v8137_v20, 16  ;;  %v8140_v20 = vld [vmem:[%s10289_s30 + $0xc0] sm:$0xf] }
 0x13a   : > { %v2455_v49 = vshll.u32 %v11359_v2, 16  ;;  %v2459_v56 = vshrl.u32 %v11359_v2, 16  ;;  %v2391_v45 = vrot.slane %v2390_v13, 4  ;;  %v2419_v5 = vrot.slane %v2417_v7, 5 }
 0x13b   : > { %v2424_v51 = vrot.slane %v2422_v24, 4  ;;  %v2427_v31 = vrot.slane %v2425_v44, 5  ;;  %v2405_v22 = vrot.slane %v2404_v36, 4  ;;  %v2433_v17 = vrot.slane %v2431_v59, 5  ;;  %v11383_v24 = vld [vmem:[%s10289_s30 + $0xbc] sm:$0x1] }
 0x13c   : > { %v2437_v21 = vrot.slane %v2435_v4, 4  ;;  %v2448_v28 = vrot.slane %v2446_v62, 4  ;;  %v2451_v41 = vrot.slane %v2449_v30, 5  ;;  %v2457_v12 = vrot.slane %v2455_v49, 5 }
 0x13d   : > { %v2461_v57 = vrot.slane %v2459_v56, 4  ;;  %v2386_v9 = vsel %vm10324_vm4, %v2381_v53, %v11346_v16  ;;  %v2396_v7 = vsel %vm10324_vm4, %v2391_v45, %v2395_v52  ;;  %v2428_v13 = vor.u32 %v2427_v31, %v2424_v51 }
 0x13e   : > { %9099 = vmatmul.mubr.msk.bf16.gmra.mrb[12].mxu0 %vm739_vm3, %v11337_v14  ;;  %v11374_v14 = vcombine.low %v2362_v39, %v2372_v3  ;;  %v2410_v44 = vsel %vm10324_vm4, %v2405_v22, %v2409_v0  ;;  %v2441_v59 = vshll.u32 %v11107_v6, 16  ;;  %v2470_v16 = vshrl.u32 %v8140_v20, 16 }
 0x13f   : > { %9102 = vmatprep.mubr.msk.bf16.mxu0 %vm739_vm3, %v11339_v63  ;;  %v2415_v63 = vrot.slane %v2414_v48, 4  ;;  %v2438_v48 = vor.u32 %v2437_v21, %v2433_v17  ;;  %v2473_v4 = vshll.u32 %v8140_v20, 16  ;;  %v2479_v39 = vshll.u32 %v11162_v8, 16 }
 0x140   : > { %12937 = vst [vmem:[#allocation21_spill] sm:$0xff] %v11374_v14  ;;  %v2483_v3 = vshrl.u32 %v11162_v8, 16  ;;  %v2452_v53 = vor.u32 %v2451_v41, %v2448_v28  ;;  %v2462_v52 = vor.u32 %v2461_v57, %v2457_v12  ;;  %v2465_v62 = vshll.u32 %v11383_v24, 16 }
 0x141   : > { %v2420_v36 = vsel %vm10324_vm4, %v2415_v63, %v2419_v5  ;;  %v11397_v0 = vcombine.low %v2386_v9, %v2396_v7  ;;  %v2429_v63 = vrot.slane %v2428_v13, 4  ;;  %v2439_v49 = vrot.slane %v2438_v48, 4 }
 0x142   : > { %v11399_v30 = vcombine.low %v2410_v44, %v2420_v36  ;;  %v2443_v6 = vrot.slane %v2441_v59, 5  ;;  %v2472_v56 = vrot.slane %v2470_v16, 4  ;;  %v2475_v45 = vrot.slane %v2473_v4, 5  ;;  %v8176_v44 = vld [vmem:[%s10289_s30 + $0xc] sm:$0xe] }
 0x143   : > { %12938 = vst [vmem:[#allocation22_spill] sm:$0xff] %v11397_v0  ;;  %v2481_v5 = vrot.slane %v2479_v39, 5  ;;  %v2485_v51 = vrot.slane %v2483_v3, 4  ;;  %v2453_v31 = vrot.slane %v2452_v53, 4  ;;  %v2463_v22 = vrot.slane %v2462_v52, 4 }
 0x144   : > { %12939 = vst [vmem:[#allocation23_spill] sm:$0xff] %v11399_v30  ;;  %v2467_v21 = vrot.slane %v2465_v62, 5  ;;  %v2434_v8 = vsel %vm10324_vm4, %v2429_v63, %v2433_v17  ;;  %v2444_v9 = vsel %vm10324_vm4, %v2439_v49, %v2443_v6  ;;  %v2476_v28 = vor.u32 %v2475_v45, %v2472_v56  ;;  %v8177_v52 = vld [vmem:[%s10289_s30 + $0x18] sm:$0xe]  ;;  %v8178_v63 = vld [vmem:[%s10289_s30 + $0x24] sm:$0xe] }
 0x145   : > { %v2486_v41 = vor.u32 %v2485_v51, %v2481_v5  ;;  %v2489_v57 = vshll.u32 %v11165_v38, 16  ;;  %v2458_v20 = vsel %vm10324_vm4, %v2453_v31, %v2457_v12  ;;  %v2853_v13 = vrot.slane %v11007_v19, 5 }
 0x146   : > { %9103 = vmatmul.mubr.msk.bf16.gmra.mrb[16].mxu0 %vm739_vm3, %v11354_v18  ;;  %v2468_v7 = vsel %vm10324_vm4, %v2463_v22, %v2467_v21  ;;  %v11416_v17 = vcombine.low %v2434_v8, %v2444_v9  ;;  %v2477_v48 = vrot.slane %v2476_v28, 4  ;;  %v8192_v4 = vrot.slane %v8176_v44, 9  ;;  %v8180_v28 = vld [vmem:[%s10289_s30 + $0x3c] sm:$0xe]  ;;  %v10217_v18 = vld [vmem:[%s10289_s30 + $0xcc] sm:$0xff]  }
 0x147   : > { %9106 = vmatprep.mubr.msk.bf16.mxu0 %vm739_vm3, %v11374_v14  ;;  %v11418_v36 = vcombine.low %v2458_v20, %v2468_v7  ;;  %v2487_v59 = vrot.slane %v2486_v41, 4  ;;  %v2491_v16 = vrot.slane %v2489_v57, 5  ;;  %v2855_v38 = vrot.slane %v2853_v13, 4 }
 0x148   : > { %12940 = vst [vmem:[#allocation24_spill] sm:$0xff] %v11416_v17  ;;  %v2856_v39 = vrot.slane %v11034_v34, 5  ;;  %v2482_v19 = vsel %vm10324_vm4, %v2477_v48, %v2481_v5  ;;  %v2860_v3 = vrot.slane %v11030_v43, 5  ;;  %v2854_v53 = vsel %vm10639_vm7, %v8192_v4, %v2853_v13 }
 0x149   : > { %12941 = vst [vmem:[#allocation25_spill] sm:$0xff] %v11418_v36  ;;  %v2492_v12 = vsel %vm10324_vm4, %v2487_v59, %v2491_v16  ;;  %v2867_v62 = vrot.slane %v11059_v32, 5  ;;  %v8193_v56 = vrot.slane %v8177_v52, 9  ;;  %v2863_v5 = vrot.slane %v11053_v61, 5  ;;  %v11463_v16 = vld [vmem:[%s12824_s1 + $0x1c] sm:$0xf] }
 0x14a   : > { %v2857_v34 = vsel %vm10639_vm7, %v2855_v38, %v2856_v39  ;;  %v11437_v49 = vcombine.low %v2482_v19, %v2492_v12  ;;  %v2862_v45 = vrot.slane %v2860_v3, 4  ;;  %v8194_v43 = vrot.slane %v8178_v63, 9  ;;  %v8182_v38 = vld [vmem:[%s10289_s30 + $0x54] sm:$0xe] }
 0x14b   : > { %v8209_v6 = vcombine.low %v2854_v53, %v2857_v34  ;;  %v2869_v51 = vrot.slane %v2867_v62, 4  ;;  %v2870_v31 = vrot.slane %v11096_v55, 5  ;;  %v2861_v32 = vsel %vm10639_vm7, %v8193_v56, %v2860_v3  ;;  %v8179_v55 = vld [vmem:[%s10289_s30 + $0x30] sm:$0xe] }
 0x14c   : > { %12942 = vst [vmem:[#allocation26_spill] sm:$0xff] %v11437_v49  ;;  %v2864_v22 = vsel %vm10639_vm7, %v2862_v45, %v2863_v5  ;;  %v2874_v21 = vrot.slane %v11079_v27, 5  ;;  %v2868_v61 = vsel %vm10639_vm7, %v8194_v43, %v2867_v62  ;;  %v2881_v9 = vrot.slane %v11125_v23, 5  ;;  %v8184_v62 = vld [vmem:[%s10289_s30 + $0x6c] sm:$0xe] }
 0x14d   : > { %v2871_v8 = vsel %vm10639_vm7, %v2869_v51, %v2870_v31  ;;  %v8210_v41 = vcombine.low %v2861_v32, %v2864_v22  ;;  %v8195_v20 = vrot.slane %v8179_v55, 9  ;;  %v2877_v13 = vrot.slane %v11130_v1, 5  ;;  %v8186_v51 = vld [vmem:[%s10289_s30 + $0x84] sm:$0xe] }
 0x14e   : > { %9107 = vmatmul.mubr.msk.bf16.gmra.mrb[20].mxu0 %vm739_vm3, %v11397_v0  ;;  %v8211_v57 = vcombine.low %v2868_v61, %v2871_v8  ;;  %v2876_v7 = vrot.slane %v2874_v21, 4  ;;  %v3421_v27 = vsel %vm788_vm0, %v11254_v42, 0  ;;  %v8196_v44 = vrot.slane %v8180_v28, 9  ;;  %v8188_v61 = vld [vmem:[%s10289_s30 + $0x9c] sm:$0xe] }
 0x14f   : > { %9110 = vmatprep.mubr.msk.bf16.mxu0 %vm739_vm3, %v11399_v30  ;;  %v2883_v48 = vrot.slane %v2881_v9, 4  ;;  %v2884_v59 = vrot.slane %v11172_v47, 5  ;;  %v2875_v23 = vsel %vm10639_vm7, %v8195_v20, %v2874_v21  ;;  %v2895_v4 = vrot.slane %v11190_v25, 5  ;;  %v8190_v20 = vld [vmem:[%s10289_s30 + $0xb4] sm:$0xe] }
 0x150   : > { %v2878_v1 = vsel %vm10639_vm7, %v2876_v7, %v2877_v13  ;;  %v2882_v47 = vsel %vm10639_vm7, %v8196_v44, %v2881_v9  ;;  %v8198_v12 = vrot.slane %v8182_v38, 9  ;;  %v2898_v53 = vrot.slane %v11228_v46, 5  ;;  %v12948_v44 = vld [vmem:[#allocation6_spill] sm:$0xff]  ;;  %v12954_v38 = vld [vmem:[#allocation11_spill] sm:$0xff] }
 0x151   : > { %v2885_v42 = vsel %vm10639_vm7, %v2883_v48, %v2884_v59  ;;  %v8212_v39 = vcombine.low %v2875_v23, %v2878_v1  ;;  %v2897_v3 = vrot.slane %v2895_v4, 4  ;;  %v2909_v52 = vrot.slane %v11236_v37, 5  ;;  %v12949_v48 = vld [vmem:[#allocation7_spill] sm:$0xff] }
 0x152   : > { %v8213_v19 = vcombine.low %v2882_v47, %v2885_v42  ;;  %v2896_v34 = vsel %vm10639_vm7, %v8198_v12, %v2895_v4  ;;  %v2912_v45 = vrot.slane %v11263_v29, 5  ;;  %v12943_v46 = vcombine.low %v10979_v60, %v10984_v11  ;;  %v12951_v47 = vld [vmem:[#allocation8_spill] sm:$0xff]  ;;  %v12952_v42 = vld [vmem:[#allocation10_spill] sm:$0xff]  ;;  %v11755_v0 = vld [vmem:[%s10289_s30 + $0xd0] sm:$0xf] }
 0x153   : > { %v2899_v25 = vsel %vm10639_vm7, %v2897_v3, %v2898_v53  ;;  %v2911_v56 = vrot.slane %v2909_v52, 4  ;;  %v2923_v43 = vrot.slane %v11285_v58, 5  ;;  %v8202_v32 = vrot.slane %v8186_v51, 9  ;;  %v10203_v12 = vld [vmem:[%s10289_s30 + $0x24] sm:$0xff]   ;;  %v10204_v3 = vld [vmem:[%s10289_s30 + $0x30] sm:$0xff]  }
 0x154   : > { %v8215_v63 = vcombine.low %v2896_v34, %v2899_v25  ;;  %v2926_v22 = vrot.slane %v11309_v35, 5  ;;  %v12944_v60 = vcombine.low %v11003_v50, %v11011_v26  ;;  %v2937_v21 = vrot.slane %v11320_v33, 5  ;;  %v12945_v50 = vld [vmem:[#allocation4_spill] sm:$0xff]  ;;  %v12946_v26 = vld [vmem:[#allocation5_spill] sm:$0xff] }
 0x155   : > { %v2913_v37 = vsel %vm10639_vm7, %v2911_v56, %v2912_v45  ;;  %v2925_v29 = vrot.slane %v2923_v43, 4  ;;  %v2924_v11 = vsel %vm10639_vm7, %v8202_v32, %v2923_v43  ;;  %v8204_v55 = vrot.slane %v8188_v61, 9  ;;  %v11552_v34 = vld [vmem:[%s12824_s1 + $0x20] sm:$0xf]  ;;  %v11585_v32 = vld [vmem:[%s10289_s30 + $0x70] sm:$0xf] }
 0x156   : > { %9111 = vmatmul.mubr.msk.bf16.gmra.mrb[24].mxu0 %vm739_vm3, %v11416_v17  ;;  %v2939_v35 = vrot.slane %v2937_v21, 4  ;;  %v2940_v9 = vrot.slane %v11349_v40, 5  ;;  %v12947_v28 = vcombine.low %v12945_v50, %v12946_v26  ;;  %v8206_v7 = vrot.slane %v8190_v20, 9  ;;  %v10205_v25 = vld [vmem:[%s10289_s30 + $0x3c] sm:$0xff]   ;;  %v10209_v61 = vld [vmem:[%s10289_s30 + $0x6c] sm:$0xff]  }
 0x157   : > { %9114 = vmatprep.mubr.msk.bf16.mxu0 %vm739_vm3, %v11418_v36  ;;  %v2927_v58 = vsel %vm10639_vm7, %v2925_v29, %v2926_v22  ;;  %v12950_v59 = vcombine.low %v12948_v44, %v12949_v48  ;;  %v12953_v4 = vcombine.low %v12951_v47, %v12952_v42  ;;  %v4147_v53 = vsel %vm788_vm0, %v11463_v16, 0  ;;  %v10208_v43 = vld [vmem:[%s10289_s30 + $0x60] sm:$0xff]   ;;  %v11588_v29 = vld [vmem:[%s10289_s30 + $0x74] sm:$0x1]  ;;  %v8394_v22 = vld [vmem:[%s10289_s30 + $0x6c] sm:$0xe] }
 0x158   : > { %v8219_v8 = vcombine.low %v2924_v11, %v2927_v58  ;;  %v2941_v33 = vsel %vm10639_vm7, %v2939_v35, %v2940_v9  ;;  %v4460_v11 = vrot.slane %v11588_v29, 5  ;;  %v8410_v58 = vrot.slane %v8394_v22, 9  ;;  %v10210_v35 = vld [vmem:[%s10289_s30 + $0x78] sm:$0xff]   ;;  %v8309_v26 = vld [vmem:[%s10289_s30 + $0x24] sm:$0xf] }
 0x159   : > { %v11602_v9 = vld [vmem:[%s10289_s30 + $0x1c] sm:$0xf]  ;;  %v8396_v44 = vld [vmem:[%s10289_s30 + $0x84] sm:$0xe]  ;;  %v11654_v22 = vld [vmem:[%s10289_s30 + $0x34] sm:$0xf] }
 0x15a   : > { %v3678_v20 = vshrl.u32 %v11602_v9, 16  ;;  %v10211_v42 = vld [vmem:[%s10289_s30 + $0x84] sm:$0xff]  }
 0x15b   : > { %v11725_v17 = vld [vmem:[%s10289_s30 + $0x44] sm:$0x1] }
 0x15e   : > { %9115 = vmatmul.mubr.msk.bf16.gmra.mrb[28].mxu0 %vm739_vm3, %v11437_v49  ;;  %v10215_v49 = vld [vmem:[%s10289_s30 + $0xb4] sm:$0xff]  }
 0x15f   : > { %9120 = vmatprep.mubr.msk.bf16.mxu0 %vm739_vm3, %v8209_v6  ;;  %v8200_v6 = vrot.slane %v8184_v62, 9  ;;  %v11565_v62 = vld [vmem:[%s10289_s30 + $0x5c] sm:$0x1] }
 0x160   : > { %v4446_v56 = vrot.slane %v11565_v62, 5 }
 0x161   : > { %v2910_v5 = vsel %vm10639_vm7, %v8200_v6, %v2909_v52  ;;  %v10206_v52 = vld [vmem:[%s10289_s30 + $0x48] sm:$0xff]  }
 0x162   : > { %v8217_v31 = vcombine.low %v2910_v5, %v2913_v37  ;;  %v10207_v5 = vld [vmem:[%s10289_s30 + $0x54] sm:$0xff]  }
 0x166   : > { %9121 = vmatmul.mubr.msk.bf16.vlgmr.msra.gmra.mrb[0].mxu0 %vm739_vm3, %v8210_v41  ;;  %v2938_v41 = vsel %vm10639_vm7, %v8204_v55, %v2937_v21 }
 0x167   : > { %9153 = vmatpush3.bf16.msra.mxu0 %v3421_v27  ;;  %9124 = vmatprep.mubr.msk.bf16.mxu0 %vm739_vm3, %v8211_v57  ;;  %v2951_v57 = vrot.slane %v11359_v2, 5  ;;  %v8221_v40 = vcombine.low %v2938_v41, %v2941_v33  ;;  %v2954_v27 = vrot.slane %v11383_v24, 5  ;;  %v10202_v24 = vld [vmem:[%s10289_s30 + $0x18] sm:$0xff]  }
 0x168   : > { %10147 = vmatprep.subr.msk.bf16.mxu0 %vm788_vm0, %v11463_v16  ;;  %v11562_v16 = vld [vmem:[%s10289_s30 + $0x58] sm:$0xf] }
 0x169   : > { %v2953_v13 = vrot.slane %v2951_v57, 4  ;;  %v2952_v23 = vsel %vm10639_vm7, %v8206_v7, %v2951_v57  ;;  %v4443_v6 = vrot.slane %v11562_v16, 5  ;;  %v3674_v57 = vshll.u32 %v11602_v9, 16  ;;  %v11618_v7 = vld [vmem:[%s10289_s30 + $0x8c] sm:$0x1] }
 0x16b   : > { %v2955_v2 = vsel %vm10639_vm7, %v2953_v13, %v2954_v27  ;;  %v3689_v13 = vshrl.u32 %v8309_v26, 16  ;;  %v3692_v27 = vshll.u32 %v8309_v26, 16 }
 0x16c   : > { %v8223_v1 = vcombine.low %v2952_v23, %v2955_v2  ;;  %v11625_v23 = vld [vmem:[%s10289_s30 + $0x28] sm:$0xf]  ;;  %v8412_v2 = vrot.slane %v8396_v44, 9 }
 0x16e   : > { %9125 = vmatmul.mubr.msk.bf16.gmra.mrb[4].mxu0 %vm739_vm3, %v8212_v39  ;;  %v12955_v39 = vld [vmem:[#allocation3_spill] sm:$0xff] }
 0x16f   : > { %9128 = vmatprep.mubr.msk.bf16.mxu0 %vm739_vm3, %v8213_v19  ;;  %v12956_v19 = vcombine.low %v12954_v38, %v12955_v39  ;;  %v11631_v38 = vrot.slane %v3674_v57, 5  ;;  %v3680_v39 = vrot.slane %v3678_v20, 4  ;;  %v10213_v20 = vld [vmem:[%s10289_s30 + $0x9c] sm:$0xff]  }
 0x176   : > { %9129 = vmatmul.mubr.msk.bf16.gmra.mrb[8].mxu0 %vm739_vm3, %v12943_v46  ;;  %v4445_v46 = vrot.slane %v4443_v6, 4 }
 0x177   : > { %9132 = vmatprep.mubr.msk.bf16.mxu0 %vm739_vm3, %v8215_v63  ;;  %v8392_v63 = vld [vmem:[%s10289_s30 + $0x54] sm:$0xe] }
 0x178   : > { %v8408_v45 = vrot.slane %v8392_v63, 9  ;;  %v11579_v51 = vsel %vm10639_vm7, %v4445_v46, %v4446_v56  ;;  %v3702_v63 = vshrl.u32 %v11625_v23, 16  ;;  %v8312_v46 = vld [vmem:[%s10289_s30 + $0x30] sm:$0xf] }
 0x17a   : > { %v11574_v37 = vsel %vm10639_vm7, %v8408_v45, %v4443_v6  ;;  %v11648_v45 = vld [vmem:[%s10289_s30 + $0x2c] sm:$0x1]  ;;  %v3704_v26 = vrot.slane %v3702_v63, 4 }
 0x17b   : > { %v4418_v10 = vrot.slane %v11648_v45, 5 }
 0x17e   : > { %9133 = vmatmul.mubr.msk.bf16.gmra.mrb[12].mxu0 %vm739_vm3, %v12944_v60  ;;  %v4457_v60 = vrot.slane %v11585_v32, 5 }
 0x17f   : > { %9136 = vmatprep.mubr.msk.bf16.mxu0 %vm739_vm3, %v8217_v31 }
 0x180   : > { %v4459_v21 = vrot.slane %v4457_v60, 4  ;;  %v11598_v55 = vsel %vm10639_vm7, %v8410_v58, %v4457_v60  ;;  %v11657_v60 = vld [vmem:[%s10289_s30 + $0xa0] sm:$0xf] }
 0x182   : > { %v11606_v50 = vsel %vm10639_vm7, %v4459_v21, %v4460_v11  ;;  %v11660_v11 = vld [vmem:[%s10289_s30 + $0xa4] sm:$0x1] }
 0x183   : > { %12957 = vst [vmem:[#allocation4_spill] sm:$0xff] %v11606_v50  ;;  %v11844_v50 = vld [vmem:[%s10289_s30 + $0x80] sm:$0x1] }
 0x186   : > { %9137 = vmatmul.mubr.msk.bf16.gmra.mrb[16].mxu0 %vm739_vm3, %v12947_v28  ;;  %v11720_v28 = vld [vmem:[%s10289_s30 + $0x4c] sm:$0xf] }
 0x187   : > { %9140 = vmatprep.mubr.msk.bf16.mxu0 %vm739_vm3, %v8219_v8  ;;  %v8306_v8 = vld [vmem:[%s10289_s30 + $0x18] sm:$0xf] }
 0x188   : > { %v3665_v41 = vshrl.u32 %v8306_v8, 16  ;;  %v3668_v33 = vshll.u32 %v8306_v8, 16  ;;  %v4485_v8 = vrot.slane %v11657_v60, 5 }
 0x18a   : > { %v4487_v44 = vrot.slane %v4485_v8, 4 }
 0x18e   : > { %9141 = vmatmul.mubr.msk.bf16.gmra.mrb[20].mxu0 %vm739_vm3, %v12950_v59  ;;  %v4474_v59 = vrot.slane %v11618_v7, 5 }
 0x18f   : > { %9144 = vmatprep.mubr.msk.bf16.mxu0 %vm739_vm3, %v8221_v40  ;;  %v11615_v40 = vld [vmem:[%s10289_s30 + $0x88] sm:$0xf] }
 0x190   : > { %v4471_v48 = vrot.slane %v11615_v40, 5 }
 0x192   : > { %v4473_v47 = vrot.slane %v4471_v48, 4 }
 0x196   : > { %9145 = vmatmul.mubr.msk.bf16.gmra.mrb[24].mxu0 %vm739_vm3, %v12953_v4  ;;  %v11629_v4 = vld [vmem:[%s10289_s30 + $0x20] sm:$0x1] }
 0x197   : > { %9148 = vmatprep.mubr.msk.bf16.mxu0 %vm739_vm3, %v8223_v1  ;;  %v3667_v1 = vrot.slane %v3665_v41, 4  ;;  %v3684_v56 = vshll.u32 %v11629_v4, 16  ;;  %v3713_v41 = vshrl.u32 %v8312_v46, 16 }
 0x19e   : > { %9149 = vmatmul.mubr.msk.bf16.gmra.mrb[28].mxu0 %vm739_vm3, %v12956_v19  ;;  %v11635_v19 = vsel %vm10639_vm7, %v8412_v2, %v4471_v48  ;;  %v8315_v2 = vld [vmem:[%s10289_s30 + $0x3c] sm:$0xf] }
 0x19f   : > { %9154 = vmatprep.mubr.msk.bf16.mxu0 %vm739_vm3, %v10202_v24  ;;  %v3670_v24 = vrot.slane %v3668_v33, 5  ;;  %12958 = vst [vmem:[#allocation5_spill] sm:$0xff] %v11635_v19  ;;  %v3716_v33 = vshll.u32 %v8312_v46, 16  ;;  %v8318_v46 = vld [vmem:[%s10289_s30 + $0x48] sm:$0xf] }
 0x1a1   : > { %v3718_v63 = vrot.slane %v3716_v33, 5 }
 0x1a6   : > { %9155 = vmatmul.mubr.msk.bf16.vlgmr.msra.gmra.mrb[0].mxu0 %vm739_vm3, %v10203_v12  ;;  %v10212_v12 = vld [vmem:[%s10289_s30 + $0x90] sm:$0xff]  }
 0x1a7   : > { %9187 = vmatpush3.bf16.msra.mxu0 %v4147_v53  ;;  %9158 = vmatprep.mubr.msk.bf16.mxu0 %vm739_vm3, %v10204_v3  ;;  %v3691_v3 = vrot.slane %v3689_v13, 4  ;;  %v3694_v53 = vrot.slane %v3692_v27, 5  ;;  %v3708_v13 = vshll.u32 %v11648_v45, 16  ;;  %v3722_v27 = vshll.u32 %v11654_v22, 16 }
 0x1a8   : > { %10148 = vmatprep.subr.msk.bf16.mxu0 %vm788_vm0, %v11552_v34 }
 0x1a9   : > { %v3695_v58 = vor.u32 %v3694_v53, %v3691_v3 }
 0x1ae   : > { %9159 = vmatmul.mubr.msk.bf16.gmra.mrb[4].mxu0 %vm739_vm3, %v10205_v25  ;;  %v3698_v25 = vshll.u32 %v11625_v23, 16 }
 0x1af   : > { %9162 = vmatprep.mubr.msk.bf16.mxu0 %vm739_vm3, %v10206_v52  ;;  %v11641_v52 = vsel %vm10639_vm7, %v4473_v47, %v4474_v59  ;;  %v3726_v59 = vshrl.u32 %v11654_v22, 16 }
 0x1b0   : > { %12959 = vst [vmem:[#allocation6_spill] sm:$0xff] %v11641_v52  ;;  %v11663_v21 = vrot.slane %v3698_v25, 5  ;;  %v3715_v25 = vrot.slane %v3713_v41, 4  ;;  %v11702_v41 = vld [vmem:[%s10289_s30 + $0xbc] sm:$0x1] }
 0x1b2   : > { %v3705_v53 = vor.u32 %v3704_v26, %v11663_v21  ;;  %v11699_v26 = vld [vmem:[%s10289_s30 + $0xb8] sm:$0xf] }
 0x1b6   : > { %9163 = vmatmul.mubr.msk.bf16.gmra.mrb[8].mxu0 %vm739_vm3, %v10207_v5  ;;  %v3671_v5 = vor.u32 %v3670_v24, %v3667_v1  ;;  %v11674_v1 = vld [vmem:[%s10289_s30 + $0x40] sm:$0xf] }
 0x1b7   : > { %9166 = vmatprep.mubr.msk.bf16.mxu0 %vm739_vm3, %v10208_v43  ;;  %v3681_v43 = vor.u32 %v3680_v39, %v11631_v38  ;;  %v3686_v39 = vrot.slane %v3684_v56, 5  ;;  %v3737_v56 = vshrl.u32 %v8315_v2, 16 }
 0x1b8   : > { %v3672_v48 = vrot.slane %v3671_v5, 4  ;;  %v11691_v5 = vld [vmem:[%s10289_s30 + $0x38] sm:$0x1] }
 0x1b9   : > { %v3682_v24 = vrot.slane %v3681_v43, 4  ;;  %v11693_v43 = vrot.slane %v3722_v27, 5  ;;  %v8400_v27 = vld [vmem:[%s10289_s30 + $0xb4] sm:$0xe] }
 0x1ba   : > { %v3677_v33 = vsel %vm10324_vm4, %v3672_v48, %v11631_v38  ;;  %v8416_v6 = vrot.slane %v8400_v27, 9  ;;  %v3732_v38 = vshll.u32 %v11691_v5, 16  ;;  %v3761_v27 = vshrl.u32 %v8318_v46, 16 }
 0x1be   : > { %9167 = vmatmul.mubr.msk.bf16.gmra.mrb[12].mxu0 %vm739_vm3, %v10209_v61  ;;  %v8398_v61 = vld [vmem:[%s10289_s30 + $0x9c] sm:$0xe] }
 0x1bf   : > { %9170 = vmatprep.mubr.msk.bf16.mxu0 %vm739_vm3, %v10210_v35  ;;  %v4488_v35 = vrot.slane %v11660_v11, 5  ;;  %v8414_v57 = vrot.slane %v8398_v61, 9  ;;  %v3740_v61 = vshll.u32 %v8315_v2, 16  ;;  %v11715_v2 = vrot.slane %v3705_v53, 4 }
 0x1c1   : > { %v11678_v47 = vsel %vm10639_vm7, %v8414_v57, %v4485_v8  ;;  %v11685_v3 = vsel %vm10639_vm7, %v4487_v44, %v4488_v35  ;;  %v3728_v8 = vrot.slane %v3726_v59, 4  ;;  %v3750_v35 = vshrl.u32 %v11674_v1, 16 }
 0x1c2   : > { %12960 = vst [vmem:[#allocation7_spill] sm:$0xff] %v11678_v47  ;;  %12961 = vst [vmem:[#allocation8_spill] sm:$0xff] %v11685_v3  ;;  %v11708_v57 = vrot.slane %v3708_v13, 5  ;;  %v4502_v44 = vrot.slane %v11702_v41, 5  ;;  %v3687_v59 = vsel %vm10324_vm4, %v3682_v24, %v3686_v39  ;;  %v3739_v13 = vrot.slane %v3737_v56, 4 }
 0x1c3   : > { %v3742_v48 = vrot.slane %v3740_v61, 5  ;;  %v3729_v36 = vor.u32 %v3728_v8, %v11693_v43  ;;  %v3752_v39 = vrot.slane %v3750_v35, 4  ;;  %v3764_v56 = vshll.u32 %v8318_v46, 16  ;;  %v8321_v61 = vld [vmem:[%s10289_s30 + $0x54] sm:$0xf] }
 0x1c4   : > { %v3770_v8 = vshll.u32 %v11720_v28, 16  ;;  %v3788_v46 = vshll.u32 %v8321_v61, 16 }
 0x1c6   : > { %9171 = vmatmul.mubr.msk.bf16.gmra.mrb[16].mxu0 %vm739_vm3, %v10211_v42  ;;  %v10214_v42 = vld [vmem:[%s10289_s30 + $0xa8] sm:$0xff]  }
 0x1c7   : > { %9174 = vmatprep.mubr.msk.bf16.mxu0 %vm739_vm3, %v10212_v12  ;;  %v11681_v12 = vrot.slane %v3695_v58, 4  ;;  %v3746_v58 = vshll.u32 %v11674_v1, 16 }
 0x1c9   : > { %v11727_v24 = vrot.slane %v3746_v58, 5  ;;  %v3701_v58 = vsel %vm10324_vm4, %v11681_v12, %v11663_v21  ;;  %v3711_v21 = vsel %vm10324_vm4, %v11715_v2, %v11708_v57  ;;  %v3730_v12 = vrot.slane %v3729_v36, 4  ;;  %v11765_v36 = vld [vmem:[%s10289_s30 + $0x50] sm:$0x1] }
 0x1ca   : > { %v11767_v2 = vrot.slane %v3770_v8, 5  ;;  %v3798_v8 = vshrl.u32 %v11562_v16, 16 }
 0x1ce   : > { %9175 = vmatmul.mubr.msk.bf16.gmra.mrb[20].mxu0 %vm739_vm3, %v10213_v20  ;;  %v4499_v20 = vrot.slane %v11699_v26, 5 }
 0x1cf   : > { %9178 = vmatprep.mubr.msk.bf16.mxu0 %vm739_vm3, %v10214_v42  ;;  %v3719_v42 = vor.u32 %v3718_v63, %v3715_v25  ;;  %v10216_v25 = vld [vmem:[%s10289_s30 + $0xc0] sm:$0xff]   ;;  %v8355_v63 = vcombine.low %v3677_v33, %v3687_v59  ;;  %v3734_v33 = vrot.slane %v3732_v38, 5  ;;  %v3785_v59 = vshrl.u32 %v8321_v61, 16 }
 0x1d0   : > { %v4501_v31 = vrot.slane %v4499_v20, 4  ;;  %v11731_v53 = vsel %vm10639_vm7, %v8416_v6, %v4499_v20  ;;  %v3774_v6 = vshrl.u32 %v11720_v28, 16  ;;  %v3743_v20 = vor.u32 %v3742_v48, %v3739_v13  ;;  %v8402_v48 = vld [vmem:[%s10289_s30 + $0xcc] sm:$0xe]  ;;  %v11783_v61 = vld [vmem:[%s10289_s30 + $0x64] sm:$0xf] }
 0x1d1   : > { %12962 = vst [vmem:[#allocation10_spill] sm:$0xff] %v11731_v53  ;;  %v3720_v35 = vrot.slane %v3719_v42, 4  ;;  %v11758_v42 = vld [vmem:[%s10289_s30 + $0xd4] sm:$0x1]  ;;  %v3763_v38 = vrot.slane %v3761_v27, 4  ;;  %v3766_v13 = vrot.slane %v3764_v56, 5 }
 0x1d2   : > { %v11737_v30 = vsel %vm10639_vm7, %v4501_v31, %v4502_v44  ;;  %v3756_v31 = vshll.u32 %v11725_v17, 16  ;;  %v3753_v44 = vor.u32 %v3752_v39, %v11727_v24  ;;  %v4516_v57 = vrot.slane %v11758_v42, 5 }
 0x1d3   : > { %12963 = vst [vmem:[#allocation11_spill] sm:$0xff] %v11737_v30  ;;  %v3776_v39 = vrot.slane %v3774_v6, 4  ;;  %v8418_v14 = vrot.slane %v8402_v48, 9  ;;  %v11773_v27 = vrot.slane %v3743_v20, 4  ;;  %v3735_v30 = vsel %vm10324_vm4, %v3730_v12, %v3734_v33  ;;  %v8324_v6 = vld [vmem:[%s10289_s30 + $0x60] sm:$0xf] }
 0x1d4   : > { %v11775_v56 = vrot.slane %v3756_v31, 5  ;;  %v3794_v53 = vshll.u32 %v11562_v16, 16  ;;  %v3780_v20 = vshll.u32 %v11765_v36, 16  ;;  %v3787_v12 = vrot.slane %v3785_v59, 4 }
 0x1d5   : > { %v3777_v33 = vor.u32 %v3776_v39, %v11767_v2  ;;  %v3790_v16 = vrot.slane %v3788_v46, 5  ;;  %v3800_v46 = vrot.slane %v3798_v8, 4  ;;  %v3749_v39 = vsel %vm10324_vm4, %v11773_v27, %v11727_v24  ;;  %v11824_v27 = vld [vmem:[%s10289_s30 + $0x7c] sm:$0xf] }
 0x1d6   : > { %9179 = vmatmul.mubr.msk.bf16.gmra.mrb[24].mxu0 %vm739_vm3, %v10215_v49  ;;  %v4513_v49 = vrot.slane %v11755_v0, 5  ;;  %v11804_v59 = vrot.slane %v3794_v53, 5 }
 0x1d7   : > { %9182 = vmatprep.mubr.msk.bf16.mxu0 %vm739_vm3, %v10216_v25  ;;  %v3725_v25 = vsel %vm10324_vm4, %v3720_v35, %v11693_v43  ;;  %v11789_v43 = vrot.slane %v3753_v44, 4  ;;  %v3767_v35 = vor.u32 %v3766_v13, %v3763_v38  ;;  %v3818_v44 = vshll.u32 %v11783_v61, 16 }
 0x1d8   : > { %v4515_v15 = vrot.slane %v4513_v49, 4  ;;  %v11787_v48 = vsel %vm10639_vm7, %v8418_v14, %v4513_v49  ;;  %v3809_v14 = vshrl.u32 %v8324_v6, 16  ;;  %v3812_v49 = vshll.u32 %v8324_v6, 16 }
 0x1d9   : > { %12964 = vst [vmem:[#allocation3_spill] sm:$0xff] %v11787_v48  ;;  %v3822_v38 = vshrl.u32 %v11783_v61, 16  ;;  %v4617_v13 = vsel %vm788_vm0, %v11552_v34, 0  ;;  %v8327_v34 = vld [vmem:[%s10289_s30 + $0x6c] sm:$0xf]  ;;  %v3768_v53 = vrot.slane %v3767_v35, 4  ;;  %v3791_v6 = vor.u32 %v3790_v16, %v3787_v12 }
 0x1da   : > { %v11794_v31 = vsel %vm10639_vm7, %v4515_v15, %v4516_v57  ;;  %v8356_v15 = vcombine.low %v3701_v58, %v3711_v21  ;;  %v8357_v57 = vcombine.low %v3725_v25, %v3735_v30  ;;  %v3782_v58 = vrot.slane %v3780_v20, 5  ;;  %v11816_v21 = vld [vmem:[%s10289_s30 + $0x68] sm:$0x1]  ;;  %v8330_v30 = vld [vmem:[%s10289_s30 + $0x78] sm:$0xf] }
 0x1db   : > { %12965 = vst [vmem:[#allocation27_spill] sm:$0xff] %v11794_v31  ;;  %v3778_v8 = vrot.slane %v3777_v33, 4  ;;  %v3811_v25 = vrot.slane %v3809_v14, 4  ;;  %v3814_v3 = vrot.slane %v3812_v49, 5  ;;  %v11821_v31 = vrot.slane %v3818_v44, 5 }
 0x1dc   : > { %v3824_v24 = vrot.slane %v3822_v38, 4  ;;  %v3801_v48 = vor.u32 %v3800_v46, %v11804_v59  ;;  %v3836_v20 = vshll.u32 %v8327_v34, 16  ;;  %v3842_v35 = vshll.u32 %v11585_v32, 16 }
 0x1dd   : > { %v3846_v33 = vshrl.u32 %v11585_v32, 16  ;;  %v3860_v12 = vshll.u32 %v8330_v30, 16  ;;  %v3773_v16 = vsel %vm10324_vm4, %v3768_v53, %v11767_v2  ;;  %v3783_v14 = vsel %vm10324_vm4, %v3778_v8, %v3782_v58  ;;  %v8333_v32 = vld [vmem:[%s10289_s30 + $0x84] sm:$0xf] }
 0x1de   : > { %9183 = vmatmul.mubr.msk.bf16.gmra.mrb[28].mxu0 %vm739_vm3, %v10217_v18  ;;  %v3759_v18 = vsel %vm10324_vm4, %v11789_v43, %v11775_v56  ;;  %v3828_v56 = vshll.u32 %v11816_v21, 16  ;;  %v3833_v43 = vshrl.u32 %v8327_v34, 16  ;;  %v3866_v49 = vshll.u32 %v11824_v27, 16 }
 0x1df   : > { %9188 = vmatprep.mubr.msk.bf16.mxu0 %vm739_vm3, %v8355_v63  ;;  %v3804_v63 = vshll.u32 %v11565_v62, 16  ;;  %v3857_v62 = vshrl.u32 %v8330_v30, 16  ;;  %v3870_v44 = vshrl.u32 %v11824_v27, 16  ;;  %v3792_v38 = vrot.slane %v3791_v6, 4 }
 0x1e0   : > { %v3815_v34 = vor.u32 %v3814_v3, %v3811_v25  ;;  %v3825_v47 = vor.u32 %v3824_v24, %v11821_v31  ;;  %v3802_v30 = vrot.slane %v3801_v48, 4  ;;  %v3830_v52 = vrot.slane %v3828_v56, 5 }
 0x1e1   : > { %v3806_v46 = vrot.slane %v3804_v63, 5  ;;  %v3835_v19 = vrot.slane %v3833_v43, 4  ;;  %v3838_v2 = vrot.slane %v3836_v20, 5  ;;  %v11841_v58 = vrot.slane %v3842_v35, 5 }
 0x1e2   : > { %v3848_v53 = vrot.slane %v3846_v33, 4  ;;  %v3859_v8 = vrot.slane %v3857_v62, 4  ;;  %v3862_v6 = vrot.slane %v3860_v12, 5  ;;  %v11846_v3 = vrot.slane %v3866_v49, 5  ;;  %v8336_v49 = vld [vmem:[%s10289_s30 + $0x90] sm:$0xf] }
 0x1e3   : > { %v3872_v63 = vrot.slane %v3870_v44, 4  ;;  %v3884_v48 = vshll.u32 %v8333_v32, 16  ;;  %v3816_v25 = vrot.slane %v3815_v34, 4  ;;  %v3826_v24 = vrot.slane %v3825_v47, 4  ;;  %v11860_v44 = vld [vmem:[%s10289_s30 + $0x94] sm:$0xf] }
 0x1e4   : > { %v8358_v56 = vcombine.low %v3749_v39, %v3759_v18  ;;  %v8359_v43 = vcombine.low %v3773_v16, %v3783_v14  ;;  %v3797_v20 = vsel %vm10324_vm4, %v3792_v38, %v11804_v59  ;;  %v3807_v35 = vsel %vm10324_vm4, %v3802_v30, %v3806_v46 }
 0x1e5   : > { %v3839_v33 = vor.u32 %v3838_v2, %v3835_v19  ;;  %v3849_v62 = vor.u32 %v3848_v53, %v11841_v58  ;;  %v3852_v12 = vshll.u32 %v11588_v29, 16  ;;  %v3876_v47 = vshll.u32 %v11844_v50, 16 }
 0x1e6   : > { %9189 = vmatmul.mubr.msk.bf16.vlgmr.msra.gmra.mrb[0].mxu0 %vm739_vm3, %v8356_v15  ;;  %v3881_v15 = vshrl.u32 %v8333_v32, 16  ;;  %v3873_v39 = vor.u32 %v3872_v63, %v11846_v3  ;;  %v3886_v16 = vrot.slane %v3884_v48, 5  ;;  %v3821_v59 = vsel %vm10324_vm4, %v3816_v25, %v11821_v31 }
 0x1e7   : > { %9221 = vmatpush3.bf16.msra.mxu0 %v4617_v13  ;;  %9192 = vmatprep.mubr.msk.bf16.mxu0 %vm739_vm3, %v8357_v57  ;;  %v3890_v13 = vshll.u32 %v11615_v40, 16  ;;  %v3894_v57 = vshrl.u32 %v11615_v40, 16  ;;  %v3863_v40 = vor.u32 %v3862_v6, %v3859_v8  ;;  %v3831_v19 = vsel %vm10324_vm4, %v3826_v24, %v3830_v52 }
 0x1e8   : > { %v3883_v18 = vrot.slane %v3881_v15, 4  ;;  %v3905_v38 = vshrl.u32 %v8336_v49, 16  ;;  %v3908_v46 = vshll.u32 %v8336_v49, 16  ;;  %v3914_v34 = vshll.u32 %v11860_v44, 16  ;;  %v8339_v15 = vld [vmem:[%s10289_s30 + $0x9c] sm:$0xf]  ;;  %10149 = vmatprep.subr.msk.bf16.mxu0 %vm788_vm0, %v5020_v54 }
 0x1e9   : > { %v11868_v14 = vrot.slane %v3890_v13, 5  ;;  %v3896_v29 = vrot.slane %v3894_v57, 4  ;;  %v3918_v32 = vshrl.u32 %v11860_v44, 16  ;;  %v3840_v30 = vrot.slane %v3839_v33, 4  ;;  %v11878_v13 = vld [vmem:[%s10289_s30 + $0x98] sm:$0x1] }
 0x1ea   : > { %v3850_v31 = vrot.slane %v3849_v62, 4  ;;  %v3854_v2 = vrot.slane %v3852_v12, 5  ;;  %v3878_v53 = vrot.slane %v3876_v47, 5  ;;  %v3864_v52 = vrot.slane %v3863_v40, 4 }
 0x1eb   : > { %v3874_v8 = vrot.slane %v3873_v39, 4  ;;  %v3887_v6 = vor.u32 %v3886_v16, %v3883_v18  ;;  %v3900_v63 = vshll.u32 %v11618_v7, 16  ;;  %v8360_v48 = vcombine.low %v3797_v20, %v3807_v35  ;;  %v8342_v20 = vld [vmem:[%s10289_s30 + $0xa8] sm:$0xf]  ;;  %v11889_v35 = vld [vmem:[%s10289_s30 + $0xac] sm:$0xf] }
 0x1ec   : > { %v8361_v25 = vcombine.low %v3821_v59, %v3831_v19  ;;  %v3897_v24 = vor.u32 %v3896_v29, %v11868_v14  ;;  %v3907_v57 = vrot.slane %v3905_v38, 4  ;;  %v3920_v33 = vrot.slane %v3918_v32, 4 }
 0x1ed   : > { %v3845_v62 = vsel %vm10324_vm4, %v3840_v30, %v11841_v58  ;;  %v3855_v12 = vsel %vm10324_vm4, %v3850_v31, %v3854_v2  ;;  %v3929_v7 = vshrl.u32 %v8339_v15, 16  ;;  %v3932_v47 = vshll.u32 %v8339_v15, 16  ;;  %v11912_v15 = vld [vmem:[%s10289_s30 + $0xb0] sm:$0x1] }
 0x1ee   : > { %9193 = vmatmul.mubr.msk.bf16.gmra.mrb[4].mxu0 %vm739_vm3, %v8358_v56  ;;  %v3910_v56 = vrot.slane %v3908_v46, 5  ;;  %v3869_v49 = vsel %vm10324_vm4, %v3864_v52, %v11846_v3  ;;  %v3879_v40 = vsel %vm10324_vm4, %v3874_v8, %v3878_v53  ;;  %v3888_v39 = vrot.slane %v3887_v6, 4 }
 0x1ef   : > { %9196 = vmatprep.mubr.msk.bf16.mxu0 %vm739_vm3, %v8359_v43  ;;  %v11880_v43 = vrot.slane %v3914_v34, 5  ;;  %v3902_v18 = vrot.slane %v3900_v63, 5  ;;  %v3898_v16 = vrot.slane %v3897_v24, 4  ;;  %v3924_v58 = vshll.u32 %v11878_v13, 16 }
 0x1f0   : > { %v3938_v59 = vshll.u32 %v11657_v60, 16  ;;  %v3942_v19 = vshrl.u32 %v11657_v60, 16  ;;  %v3953_v29 = vshrl.u32 %v8342_v20, 16  ;;  %v3956_v38 = vshll.u32 %v8342_v20, 16 }
 0x1f1   : > { %v3962_v46 = vshll.u32 %v11889_v35, 16  ;;  %v3966_v3 = vshrl.u32 %v11889_v35, 16  ;;  %v3911_v34 = vor.u32 %v3910_v56, %v3907_v57  ;;  %v3921_v32 = vor.u32 %v3920_v33, %v11880_v43  ;;  %v8345_v56 = vld [vmem:[%s10289_s30 + $0xb4] sm:$0xf] }
 0x1f2   : > { %v3931_v30 = vrot.slane %v3929_v7, 4  ;;  %v3934_v31 = vrot.slane %v3932_v47, 5  ;;  %v8362_v2 = vcombine.low %v3845_v62, %v3855_v12  ;;  %v8363_v53 = vcombine.low %v3869_v49, %v3879_v40 }
 0x1f3   : > { %v3893_v60 = vsel %vm10324_vm4, %v3888_v39, %v11868_v14  ;;  %v3903_v52 = vsel %vm10324_vm4, %v3898_v16, %v3902_v18  ;;  %v3926_v8 = vrot.slane %v3924_v58, 5  ;;  %v11909_v6 = vrot.slane %v3938_v59, 5  ;;  %v8348_v39 = vld [vmem:[%s10289_s30 + $0xc0] sm:$0xf]  ;;  %v11920_v18 = vld [vmem:[%s10289_s30 + $0xc4] sm:$0xf] }
 0x1f4   : > { %v3944_v63 = vrot.slane %v3942_v19, 4  ;;  %v3964_v24 = vrot.slane %v3962_v46, 5  ;;  %v3968_v57 = vrot.slane %v3966_v3, 4  ;;  %v3912_v33 = vrot.slane %v3911_v34, 4 }
 0x1f5   : > { %v3922_v62 = vrot.slane %v3921_v32, 4  ;;  %v3935_v12 = vor.u32 %v3934_v31, %v3931_v30  ;;  %v3948_v14 = vshll.u32 %v11660_v11, 16  ;;  %v3972_v7 = vshll.u32 %v11912_v15, 16 }
 0x1f6   : > { %9197 = vmatmul.mubr.msk.bf16.gmra.mrb[8].mxu0 %vm739_vm3, %v8360_v48  ;;  %v3955_v48 = vrot.slane %v3953_v29, 4  ;;  %v8364_v47 = vcombine.low %v3893_v60, %v3903_v52  ;;  %v3945_v20 = vor.u32 %v3944_v63, %v11909_v6  ;;  %v3977_v49 = vshrl.u32 %v8345_v56, 16 }
 0x1f7   : > { %9200 = vmatprep.mubr.msk.bf16.mxu0 %vm739_vm3, %v8361_v25  ;;  %v3958_v25 = vrot.slane %v3956_v38, 5  ;;  %v3980_v40 = vshll.u32 %v8345_v56, 16  ;;  %v3969_v58 = vor.u32 %v3968_v57, %v3964_v24  ;;  %v3986_v59 = vshll.u32 %v11699_v26, 16 }
 0x1f8   : > { %v3990_v19 = vshrl.u32 %v11699_v26, 16  ;;  %v3917_v11 = vsel %vm10324_vm4, %v3912_v33, %v11880_v43  ;;  %v3927_v29 = vsel %vm10324_vm4, %v3922_v62, %v3926_v8  ;;  %v3936_v38 = vrot.slane %v3935_v12, 4  ;;  %v8351_v33 = vld [vmem:[%s10289_s30 + $0xcc] sm:$0xf] }
 0x1f9   : > { %v3959_v16 = vor.u32 %v3958_v25, %v3955_v48  ;;  %v3950_v46 = vrot.slane %v3948_v14, 5  ;;  %v4001_v3 = vshrl.u32 %v8348_v39, 16  ;;  %v4004_v34 = vshll.u32 %v8348_v39, 16 }
 0x1fa   : > { %v4010_v32 = vshll.u32 %v11920_v18, 16  ;;  %v4014_v30 = vshrl.u32 %v11920_v18, 16  ;;  %v3946_v31 = vrot.slane %v3945_v20, 4  ;;  %v3974_v26 = vrot.slane %v3972_v7, 5  ;;  %v11940_v7 = vld [vmem:[%s10289_s30 + $0xc8] sm:$0x1] }
 0x1fb   : > { %v3960_v60 = vrot.slane %v3959_v16, 4  ;;  %v3970_v52 = vrot.slane %v3969_v58, 4  ;;  %v3988_v43 = vrot.slane %v3986_v59, 5  ;;  %v3992_v63 = vrot.slane %v3990_v19, 4 }
 0x1fc   : > { %v8365_v48 = vcombine.low %v3917_v11, %v3927_v29  ;;  %v4003_v8 = vrot.slane %v4001_v3, 4  ;;  %v4006_v25 = vrot.slane %v4004_v34, 5  ;;  %v4012_v57 = vrot.slane %v4010_v32, 5 }
 0x1fd   : > { %v4016_v56 = vrot.slane %v4014_v30, 4  ;;  %v3941_v62 = vsel %vm10324_vm4, %v3936_v38, %v11909_v6  ;;  %v3951_v12 = vsel %vm10324_vm4, %v3946_v31, %v3950_v46  ;;  %v3965_v20 = vsel %vm10324_vm4, %v3960_v60, %v3964_v24 }
 0x1fe   : > { %9201 = vmatmul.mubr.msk.bf16.gmra.mrb[12].mxu0 %vm739_vm3, %v8362_v2  ;;  %v3979_v2 = vrot.slane %v3977_v49, 4  ;;  %v3975_v49 = vsel %vm10324_vm4, %v3970_v52, %v3974_v26  ;;  %v3996_v39 = vshll.u32 %v11702_v41, 16  ;;  %v4025_v6 = vshrl.u32 %v8351_v33, 16 }
 0x1ff   : > { %9204 = vmatprep.mubr.msk.bf16.mxu0 %vm739_vm3, %v8363_v53  ;;  %v3982_v53 = vrot.slane %v3980_v40, 5  ;;  %v3993_v40 = vor.u32 %v3992_v63, %v3988_v43  ;;  %v4028_v16 = vshll.u32 %v8351_v33, 16  ;;  %v4034_v58 = vshll.u32 %v11755_v0, 16 }
 0x200   : > { %v4038_v59 = vshrl.u32 %v11755_v0, 16  ;;  %v4007_v19 = vor.u32 %v4006_v25, %v4003_v8  ;;  %v4017_v11 = vor.u32 %v4016_v56, %v4012_v57  ;;  %v8366_v29 = vcombine.low %v3941_v62, %v3951_v12  ;;  %v8387_v56 = vld [vmem:[%s10289_s30 + $0x18] sm:$0xe] }
 0x201   : > { %v3983_v14 = vor.u32 %v3982_v53, %v3979_v2  ;;  %v8367_v24 = vcombine.low %v3965_v20, %v3975_v49  ;;  %v3994_v46 = vrot.slane %v3993_v40, 4  ;;  %v3998_v3 = vrot.slane %v3996_v39, 5 }
 0x202   : > { %v4027_v34 = vrot.slane %v4025_v6, 4  ;;  %v4030_v32 = vrot.slane %v4028_v16, 5  ;;  %v4036_v41 = vrot.slane %v4034_v58, 5  ;;  %v4040_v30 = vrot.slane %v4038_v59, 4  ;;  %v8388_v16 = vld [vmem:[%s10289_s30 + $0x24] sm:$0xe] }
 0x203   : > { %v3984_v38 = vrot.slane %v3983_v14, 4  ;;  %v4008_v31 = vrot.slane %v4007_v19, 4  ;;  %v4018_v26 = vrot.slane %v4017_v11, 4  ;;  %v3999_v53 = vsel %vm10324_vm4, %v3994_v46, %v3998_v3  ;;  %v8389_v58 = vld [vmem:[%s10289_s30 + $0x30] sm:$0xe] }
 0x204   : > { %v4031_v60 = vor.u32 %v4030_v32, %v4027_v34  ;;  %v4041_v52 = vor.u32 %v4040_v30, %v4036_v41  ;;  %v4044_v63 = vshll.u32 %v11758_v42, 16  ;;  %v4408_v25 = vrot.slane %v11602_v9, 5  ;;  %v8390_v34 = vld [vmem:[%s10289_s30 + $0x3c] sm:$0xe]  ;;  %v8391_v32 = vld [vmem:[%s10289_s30 + $0x48] sm:$0xe] }
 0x205   : > { %v3989_v0 = vsel %vm10324_vm4, %v3984_v38, %v3988_v43  ;;  %v8403_v20 = vrot.slane %v8387_v56, 9  ;;  %v4411_v42 = vrot.slane %v11629_v4, 5  ;;  %v4415_v40 = vrot.slane %v11625_v23, 5 }
 0x206   : > { %9205 = vmatmul.mubr.msk.bf16.gmra.mrb[16].mxu0 %vm739_vm3, %v8364_v47  ;;  %v4020_v47 = vshll.u32 %v11940_v7, 16  ;;  %v8368_v43 = vcombine.low %v3989_v0, %v3999_v53  ;;  %v4032_v62 = vrot.slane %v4031_v60, 4  ;;  %v4042_v12 = vrot.slane %v4041_v52, 4 }
 0x207   : > { %9208 = vmatprep.mubr.msk.bf16.mxu0 %vm739_vm3, %v8365_v48  ;;  %v4013_v48 = vsel %vm10324_vm4, %v4008_v31, %v4012_v57  ;;  %v4046_v14 = vrot.slane %v4044_v63, 5  ;;  %v4410_v49 = vrot.slane %v4408_v25, 4  ;;  %v4409_v39 = vsel %vm10639_vm7, %v8403_v20, %v4408_v25 }
 0x208   : > { %v4022_v2 = vrot.slane %v4020_v47, 5  ;;  %v4037_v57 = vsel %vm10324_vm4, %v4032_v62, %v4036_v41  ;;  %v4422_v4 = vrot.slane %v11654_v22, 5  ;;  %v8404_v11 = vrot.slane %v8388_v16, 9 }
 0x209   : > { %v4047_v9 = vsel %vm10324_vm4, %v4042_v12, %v4046_v14  ;;  %v4412_v6 = vsel %vm10639_vm7, %v4410_v49, %v4411_v42  ;;  %v4417_v47 = vrot.slane %v4415_v40, 4  ;;  %v4429_v46 = vrot.slane %v11674_v1, 5  ;;  %v8395_v12 = vld [vmem:[%s10289_s30 + $0x78] sm:$0xe] }
 0x20a   : > { %v4023_v8 = vsel %vm10324_vm4, %v4018_v26, %v4022_v2  ;;  %v8370_v59 = vcombine.low %v4037_v57, %v4047_v9  ;;  %v8420_v19 = vcombine.low %v4409_v39, %v4412_v6  ;;  %v4424_v23 = vrot.slane %v4422_v4, 4 }
 0x20b   : > { %v8369_v33 = vcombine.low %v4013_v48, %v4023_v8  ;;  %v4416_v22 = vsel %vm10639_vm7, %v8404_v11, %v4415_v40  ;;  %v4419_v38 = vsel %vm10639_vm7, %v4417_v47, %v4418_v10  ;;  %v8406_v31 = vrot.slane %v8390_v34, 9  ;;  %v8397_v40 = vld [vmem:[%s10289_s30 + $0x90] sm:$0xe]  ;;  %v12970_v10 = vld [vmem:[#allocation6_spill] sm:$0xff]  ;;  %v12973_v34 = vld [vmem:[#allocation8_spill] sm:$0xff] }
 0x20c   : > { %v8421_v41 = vcombine.low %v4416_v22, %v4419_v38  ;;  %v4431_v26 = vrot.slane %v4429_v46, 4  ;;  %v4432_v2 = vrot.slane %v11725_v17, 5  ;;  %v8407_v0 = vrot.slane %v8391_v32, 9  ;;  %v8401_v22 = vld [vmem:[%s10289_s30 + $0xc0] sm:$0xe] }
 0x20d   : > { %v4439_v1 = vrot.slane %v11765_v36, 5  ;;  %v4430_v60 = vsel %vm10639_vm7, %v8406_v31, %v4429_v46  ;;  %v4450_v63 = vrot.slane %v11783_v61, 5  ;;  %v8393_v36 = vld [vmem:[%s10289_s30 + $0x60] sm:$0xe]  ;;  %v4464_v61 = vrot.slane %v11824_v27, 5  ;;  %v12976_v31 = vld [vmem:[#allocation11_spill] sm:$0xff] }
 0x20e   : > { %9209 = vmatmul.mubr.msk.bf16.gmra.mrb[20].mxu0 %vm739_vm3, %v8366_v29  ;;  %v8405_v29 = vrot.slane %v8389_v58, 9  ;;  %v8409_v25 = vrot.slane %v8393_v36, 9  ;;  %v8411_v20 = vrot.slane %v8395_v12, 9  ;;  %v4467_v42 = vrot.slane %v11844_v50, 5 }
 0x20f   : > { %9212 = vmatprep.mubr.msk.bf16.mxu0 %vm739_vm3, %v8367_v24  ;;  %v4425_v24 = vrot.slane %v11691_v5, 5  ;;  %v4436_v5 = vrot.slane %v11720_v28, 5  ;;  %v4433_v28 = vsel %vm10639_vm7, %v4431_v26, %v4432_v2  ;;  %v4452_v56 = vrot.slane %v4450_v63, 4  ;;  %v12979_v2 = vld [vmem:[#allocation27_spill] sm:$0xff] }
 0x210   : > { %v4423_v3 = vsel %vm10639_vm7, %v8405_v29, %v4422_v4  ;;  %v8423_v48 = vcombine.low %v4430_v60, %v4433_v28  ;;  %v4466_v49 = vrot.slane %v4464_v61, 4  ;;  %v4465_v57 = vsel %vm10639_vm7, %v8411_v20, %v4464_v61 }
 0x211   : > { %v4426_v45 = vsel %vm10639_vm7, %v4424_v23, %v4425_v24  ;;  %v4438_v53 = vrot.slane %v4436_v5, 4  ;;  %v4437_v52 = vsel %vm10639_vm7, %v8407_v0, %v4436_v5  ;;  %v4478_v9 = vrot.slane %v11860_v44, 5 }
 0x212   : > { %v8422_v30 = vcombine.low %v4423_v3, %v4426_v45  ;;  %v4468_v27 = vsel %vm10639_vm7, %v4466_v49, %v4467_v42  ;;  %v8413_v6 = vrot.slane %v8397_v40, 9  ;;  %v4481_v16 = vrot.slane %v11878_v13, 5  ;;  %v12972_v45 = vld [vmem:[#allocation7_spill] sm:$0xff] }
 0x213   : > { %v4440_v17 = vsel %vm10639_vm7, %v4438_v53, %v4439_v1  ;;  %v8428_v39 = vcombine.low %v4465_v57, %v4468_v27  ;;  %v4480_v50 = vrot.slane %v4478_v9, 4  ;;  %v4492_v58 = vrot.slane %v11889_v35, 5 }
 0x214   : > { %v8424_v8 = vcombine.low %v4437_v52, %v4440_v17  ;;  %v4479_v4 = vsel %vm10639_vm7, %v8413_v6, %v4478_v9  ;;  %v4495_v47 = vrot.slane %v11912_v15, 5  ;;  %v4506_v35 = vrot.slane %v11920_v18, 5  ;;  %v12138_v17 = vld [vmem:[%s12826_s3] sm:$0xf] }
 0x215   : > { %v4482_v44 = vsel %vm10639_vm7, %v4480_v50, %v4481_v16  ;;  %v4494_v13 = vrot.slane %v4492_v58, 4  ;;  %v8417_v46 = vrot.slane %v8401_v22, 9  ;;  %v4509_v15 = vrot.slane %v11940_v7, 5  ;;  %v12978_v7 = vld [vmem:[#allocation3_spill] sm:$0xff] }
 0x216   : > { %9213 = vmatmul.mubr.msk.bf16.gmra.mrb[24].mxu0 %vm739_vm3, %v8368_v43  ;;  %v4453_v43 = vrot.slane %v11816_v21, 5  ;;  %v12966_v21 = vcombine.low %v11574_v37, %v11579_v51  ;;  %v12967_v37 = vld [vmem:[#allocation4_spill] sm:$0xff]  ;;  %v4508_v3 = vrot.slane %v4506_v35, 4  ;;  %v12974_v5 = vcombine.low %v12972_v45, %v12973_v34 }
 0x217   : > { %9216 = vmatprep.mubr.msk.bf16.mxu0 %vm739_vm3, %v8369_v33  ;;  %v4451_v33 = vsel %vm10639_vm7, %v8409_v25, %v4450_v63  ;;  %v12968_v51 = vcombine.low %v11598_v55, %v12967_v37  ;;  %v12969_v55 = vld [vmem:[#allocation5_spill] sm:$0xff]  ;;  %v4496_v24 = vsel %vm10639_vm7, %v4494_v13, %v4495_v47  ;;  %v4507_v32 = vsel %vm10639_vm7, %v8417_v46, %v4506_v35 }
 0x218   : > { %v4454_v62 = vsel %vm10639_vm7, %v4452_v56, %v4453_v43  ;;  %v12971_v29 = vcombine.low %v12969_v55, %v12970_v10  ;;  %v12980_v0 = vcombine.low %v12978_v7, %v12979_v2  ;;  %v10230_v53 = vmov 0.0   ;;  %v12145_v63 = vld [vmem:[%s12827_s4] ss:$0 sm:$0xff] }
 0x219   : > { %v8426_v14 = vcombine.low %v4451_v33, %v4454_v62  ;;  %4890 = vst.msk [vmem:[#allocation2 + $0x30] sm:$0xff] %vm739_vm3, %v10230_v53  ;;  %4891 = vst.msk [vmem:[#allocation2 + $0x38] sm:$0xff] %vm739_vm3, %v10230_v53  ;;  %v5070_v1 = vsel %vm788_vm0, %v5020_v54, 0 }
 0x21a   : > { %4883 = vst.msk [vmem:[#allocation2] sm:$0xff] %vm739_vm3, %v10230_v53  ;;  %4884 = vst.msk [vmem:[#allocation2 + $0x8] sm:$0xff] %vm739_vm3, %v10230_v53  ;;  %9595 = vmatpush3.bf16.msra.mxu1 %v5070_v1 }
 0x21b   : > { %4887 = vst.msk [vmem:[#allocation2 + $0x18] sm:$0xff] %vm739_vm3, %v10230_v53  ;;  %4888 = vst.msk [vmem:[#allocation2 + $0x20] sm:$0xff] %vm739_vm3, %v10230_v53  ;;  %10151 = vmatprep.subr.msk.bf16.mxu1 %vm788_vm0, %v12138_v17 }
 0x21c   : > { %4893 = vst.msk [vmem:[#allocation2 + $0x48] sm:$0xff] %vm739_vm3, %v10230_v53  ;;  %4894 = vst.msk [vmem:[#allocation2 + $0x50] sm:$0xff] %vm739_vm3, %v10230_v53 }
 0x21d   : > { %4896 = vst.msk [vmem:[#allocation2 + $0x60] sm:$0xff] %vm739_vm3, %v10230_v53  ;;  %4897 = vst.msk [vmem:[#allocation2 + $0x68] sm:$0xff] %vm739_vm3, %v10230_v53 }
 0x21e   : > { %9217 = vmatmul.mubr.msk.bf16.gmra.mrb[28].mxu0 %vm739_vm3, %v8370_v59  ;;  %v8399_v59 = vld [vmem:[%s10289_s30 + $0xa8] sm:$0xe]  ;;  %4899 = vst.msk [vmem:[#allocation2 + $0x78] sm:$0xff] %vm739_vm3, %v10230_v53  ;;  %4900 = vst.msk [vmem:[#allocation2 + $0x80] sm:$0xff] %vm739_vm3, %v10230_v53 }
 0x21f   : > { %9222 = vmatprep.mubr.msk.bf16.mxu0 %vm739_vm3, %v8420_v19  ;;  %v8430_v19 = vcombine.low %v4479_v4, %v4482_v44  ;;  %v8415_v11 = vrot.slane %v8399_v59, 9  ;;  %4902 = vst.msk [vmem:[#allocation2 + $0x90] sm:$0xff] %vm739_vm3, %v10230_v53  ;;  %4903 = vst.msk [vmem:[#allocation2 + $0x98] sm:$0xff] %vm739_vm3, %v10230_v53 }
 0x220   : > { %4905 = vst.msk [vmem:[#allocation2 + $0xa8] sm:$0xff] %vm739_vm3, %v10230_v53  ;;  %4906 = vst.msk [vmem:[#allocation2 + $0xb0] sm:$0xff] %vm739_vm3, %v10230_v53 }
 0x221   : > { %v4493_v23 = vsel %vm10639_vm7, %v8415_v11, %v4492_v58  ;;  %4908 = vst.msk [vmem:[#allocation2 + $0xc0] sm:$0xff] %vm739_vm3, %v10230_v53  ;;  %4909 = vst.msk [vmem:[#allocation2 + $0xc8] sm:$0xff] %vm739_vm3, %v10230_v53  ;;  %v4972_v60 = vld [vmem:[#allocation2] sm:$0xff]  ;;  %v4973_v28 = vld [vmem:[#allocation2 + $0x8] sm:$0xff] }
 0x222   : > { %v8432_v38 = vcombine.low %v4493_v23, %v4496_v24  ;;  %4911 = vst.msk [vmem:[#allocation2 + $0xd8] sm:$0xff] %vm739_vm3, %v10230_v53  ;;  %4912 = vst.msk [vmem:[#allocation2 + $0xe0] sm:$0xff] %vm739_vm3, %v10230_v53  ;;  %v5004_v52 = vpack.c.bf16 %v4973_v28, %v4972_v60 }
 0x223   : > { %4914 = vst.msk [vmem:[#allocation2 + $0xf0] sm:$0xff] %vm739_vm3, %v10230_v53  ;;  %4915 = vst.msk [vmem:[#allocation2 + $0xf8] sm:$0xff] %vm739_vm3, %v10230_v53 }
 0x224   : > { %4917 = vst.msk [vmem:[#allocation2 + $0x108] sm:$0xff] %vm739_vm3, %v10230_v53  ;;  %4918 = vst.msk [vmem:[#allocation2 + $0x110] sm:$0xff] %vm739_vm3, %v10230_v53 }
 0x225   : > { %4920 = vst.msk [vmem:[#allocation2 + $0x120] sm:$0xff] %vm739_vm3, %v10230_v53  ;;  %4921 = vst.msk [vmem:[#allocation2 + $0x128] sm:$0xff] %vm739_vm3, %v10230_v53 }
 0x226   : > { %9223 = vmatmul.mubr.msk.bf16.vlgmr.msra.gmra.mrb[0].mxu0 %vm739_vm3, %v8421_v41  ;;  %v4510_v41 = vsel %vm10639_vm7, %v4508_v3, %v4509_v15  ;;  %4923 = vst.msk [vmem:[#allocation2 + $0x138] sm:$0xff] %vm739_vm3, %v10230_v53  ;;  %4924 = vst.msk [vmem:[#allocation2 + $0x140] sm:$0xff] %vm739_vm3, %v10230_v53 }
 0x227   : > { %9226 = vmatprep.mubr.msk.bf16.mxu0 %vm739_vm3, %v8422_v30  ;;  %v8434_v18 = vcombine.low %v4507_v32, %v4510_v41  ;;  %v12975_v30 = vld [vmem:[#allocation10_spill] sm:$0xff]  ;;  %4926 = vst.msk [vmem:[#allocation2 + $0x150] sm:$0xff] %vm739_vm3, %v10230_v53  ;;  %4927 = vst.msk [vmem:[#allocation2 + $0x158] sm:$0xff] %vm739_vm3, %v10230_v53  ;;  %9255 = vmatpush3.bf16.msra.mxu0 %v5070_v1 }
 0x228   : > { %v12977_v26 = vcombine.low %v12975_v30, %v12976_v31  ;;  %4929 = vst.msk [vmem:[#allocation2 + $0x168] sm:$0xff] %vm739_vm3, %v10230_v53  ;;  %4930 = vst.msk [vmem:[#allocation2 + $0x170] sm:$0xff] %vm739_vm3, %v10230_v53 }
 0x229   : > { %4932 = vst.msk [vmem:[#allocation2 + $0x180] sm:$0xff] %vm739_vm3, %v10230_v53  ;;  %4933 = vst.msk [vmem:[#allocation2 + $0x188] sm:$0xff] %vm739_vm3, %v10230_v53 }
 0x22a   : > { %4935 = vst.msk [vmem:[#allocation2 + $0x198] sm:$0xff] %vm739_vm3, %v10230_v53  ;;  %4936 = vst.msk [vmem:[#allocation2 + $0x1a0] sm:$0xff] %vm739_vm3, %v10230_v53 }
 0x22b   : > { %4892 = vst.msk [vmem:[#allocation2 + $0x40] sm:$0x3] %vm4885_vm8, %v10230_v53  ;;  %4886 = vst.msk [vmem:[#allocation2 + $0x10] sm:$0x3] %vm4885_vm8, %v10230_v53 }
 0x22c   : > { %4889 = vst.msk [vmem:[#allocation2 + $0x28] sm:$0x3] %vm4885_vm8, %v10230_v53  ;;  %4895 = vst.msk [vmem:[#allocation2 + $0x58] sm:$0x3] %vm4885_vm8, %v10230_v53 }
 0x22d   : > { %4898 = vst.msk [vmem:[#allocation2 + $0x70] sm:$0x3] %vm4885_vm8, %v10230_v53  ;;  %4901 = vst.msk [vmem:[#allocation2 + $0x88] sm:$0x3] %vm4885_vm8, %v10230_v53 }
 0x22e   : > { %9227 = vmatmul.mubr.msk.bf16.gmra.mrb[4].mxu0 %vm739_vm3, %v8423_v48  ;;  %4904 = vst.msk [vmem:[#allocation2 + $0xa0] sm:$0x3] %vm4885_vm8, %v10230_v53  ;;  %4907 = vst.msk [vmem:[#allocation2 + $0xb8] sm:$0x3] %vm4885_vm8, %v10230_v53 }
 0x22f   : > { %9230 = vmatprep.mubr.msk.bf16.mxu0 %vm739_vm3, %v8424_v8  ;;  %4910 = vst.msk [vmem:[#allocation2 + $0xd0] sm:$0x3] %vm4885_vm8, %v10230_v53  ;;  %4913 = vst.msk [vmem:[#allocation2 + $0xe8] sm:$0x3] %vm4885_vm8, %v10230_v53 }
 0x230   : > { %4916 = vst.msk [vmem:[#allocation2 + $0x100] sm:$0x3] %vm4885_vm8, %v10230_v53  ;;  %4919 = vst.msk [vmem:[#allocation2 + $0x118] sm:$0x3] %vm4885_vm8, %v10230_v53 }
 0x231   : > { %4922 = vst.msk [vmem:[#allocation2 + $0x130] sm:$0x3] %vm4885_vm8, %v10230_v53  ;;  %4925 = vst.msk [vmem:[#allocation2 + $0x148] sm:$0x3] %vm4885_vm8, %v10230_v53 }
 0x232   : > { %4928 = vst.msk [vmem:[#allocation2 + $0x160] sm:$0x3] %vm4885_vm8, %v10230_v53  ;;  %4931 = vst.msk [vmem:[#allocation2 + $0x178] sm:$0x3] %vm4885_vm8, %v10230_v53 }
 0x233   : > { %4934 = vst.msk [vmem:[#allocation2 + $0x190] sm:$0x3] %vm4885_vm8, %v10230_v53  ;;  %4937 = vst.msk [vmem:[#allocation2 + $0x1a8] sm:$0x3] %vm4885_vm8, %v10230_v53 }
 0x236   : > { %9231 = vmatmul.mubr.msk.bf16.gmra.mrb[8].mxu0 %vm739_vm3, %v12966_v21 }
 0x237   : > { %9234 = vmatprep.mubr.msk.bf16.mxu0 %vm739_vm3, %v8426_v14 }
 0x23e   : > { %9235 = vmatmul.mubr.msk.bf16.gmra.mrb[12].mxu0 %vm739_vm3, %v12968_v51 }
 0x23f   : > { %9238 = vmatprep.mubr.msk.bf16.mxu0 %vm739_vm3, %v8428_v39 }
 0x246   : > { %9239 = vmatmul.mubr.msk.bf16.gmra.mrb[16].mxu0 %vm739_vm3, %v12971_v29 }
 0x247   : > { %9242 = vmatprep.mubr.msk.bf16.mxu0 %vm739_vm3, %v8430_v19 }
 0x24e   : > { %9243 = vmatmul.mubr.msk.bf16.gmra.mrb[20].mxu0 %vm739_vm3, %v12974_v5 }
 0x24f   : > { %9246 = vmatprep.mubr.msk.bf16.mxu0 %vm739_vm3, %v8432_v38 }
 0x256   : > { %9247 = vmatmul.mubr.msk.bf16.gmra.mrb[24].mxu0 %vm739_vm3, %v12977_v26 }
 0x257   : > { %9250 = vmatprep.mubr.msk.bf16.mxu0 %vm739_vm3, %v8434_v18 }
 0x25e   : > { %9251 = vmatmul.mubr.msk.bf16.gmra.mrb[28].mxu0 %vm739_vm3, %v12980_v0 }
 0x25f   : > { %9256 = vmatprep.mubr.msk.bf16.mxu0 %vm739_vm3, %v5004_v52 }
 0x2f9   : > { %v9224_v36 = vpop.f32.mrb[0].mxu0 }
 0x2fa   : > { %v4821_v48 = vadd.f32 %v9224_v36, %v12145_v63  ;;  %v4653_v8 = vpop.f32.mrb[1].mxu0 }
 0x2fb   : > { %v4819_v25 = vadd.f32 %v12145_v63, %v4653_v8  ;;  %v9225_v56 = vpop.f32.mrb[2].mxu0 }
 0x2fc   : > { %v4853_v43 = vmax.f32 %v4821_v48, 0.0  ;;  %v4822_v33 = vadd.f32 %v9225_v56, %v12145_v63  ;;  %v4656_v62 = vpop.f32.mrb[3].mxu0 }
 0x2fd   : > { %v4851_v61 = vmax.f32 %v4819_v25, 0.0  ;;  %v4820_v12 = vadd.f32 %v12145_v63, %v4656_v62 }
 0x2fe   : > { %4941 = vst.msk [vmem:[#allocation2 + $0x31] sm:$0xff] %vm739_vm3, %v4853_v43  ;;  %v4854_v14 = vmax.f32 %v4822_v33, 0.0 }
 0x2ff   : > { %4939 = vst.msk [vmem:[#allocation2 + $0x19] sm:$0xff] %vm739_vm3, %v4851_v61  ;;  %v4852_v20 = vmax.f32 %v4820_v12, 0.0 }
 0x300   : > { %4942 = vst.msk [vmem:[#allocation2 + $0x39] sm:$0xff] %vm739_vm3, %v4854_v14 }
 0x301   : > { %4940 = vst.msk [vmem:[#allocation2 + $0x21] sm:$0xff] %vm739_vm3, %v4852_v20  ;;  %v9228_v49 = vpop.f32.mrb[4].mxu0 }
 0x302   : > { %v4825_v42 = vadd.f32 %v9228_v49, %v12145_v63  ;;  %v4669_v21 = vpop.f32.mrb[5].mxu0 }
 0x303   : > { %v4823_v57 = vadd.f32 %v12145_v63, %v4669_v21  ;;  %v9229_v27 = vpop.f32.mrb[6].mxu0 }
 0x304   : > { %v4857_v9 = vmax.f32 %v4825_v42, 0.0  ;;  %v4826_v40 = vadd.f32 %v9229_v27, %v12145_v63  ;;  %v4672_v39 = vpop.f32.mrb[7].mxu0 }
 0x305   : > { %v4855_v6 = vmax.f32 %v4823_v57, 0.0  ;;  %v4824_v50 = vadd.f32 %v12145_v63, %v4672_v39  ;;  %v4976_v19 = vld [vmem:[#allocation2 + $0x30] sm:$0xff] }
 0x306   : > { %4945 = vst.msk [vmem:[#allocation2 + $0x61] sm:$0xff] %vm739_vm3, %v4857_v9  ;;  %v4858_v16 = vmax.f32 %v4826_v40, 0.0  ;;  %v4974_v4 = vld [vmem:[#allocation2 + $0x18] sm:$0xff] }
 0x307   : > { %4943 = vst.msk [vmem:[#allocation2 + $0x49] sm:$0xff] %vm739_vm3, %v4855_v6  ;;  %v4856_v37 = vmax.f32 %v4824_v50, 0.0  ;;  %v4977_v51 = vld [vmem:[#allocation2 + $0x38] sm:$0xff] }
 0x308   : > { %4946 = vst.msk [vmem:[#allocation2 + $0x69] sm:$0xff] %vm739_vm3, %v4858_v16  ;;  %v4975_v44 = vld [vmem:[#allocation2 + $0x20] sm:$0xff]  ;;  %v12166_v47 = vpack.c.bf16 %v4977_v51, %v4976_v19 }
 0x309   : > { %4944 = vst.msk [vmem:[#allocation2 + $0x51] sm:$0xff] %vm739_vm3, %v4856_v37  ;;  %v9232_v58 = vpop.f32.mrb[8].mxu0  ;;  %v12163_v59 = vpack.c.bf16 %v4975_v44, %v4974_v4 }
 0x30a   : > { %v4829_v11 = vadd.f32 %v9232_v58, %v12145_v63  ;;  %v4685_v13 = vpop.f32.mrb[9].mxu0 }
 0x30b   : > { %v4827_v55 = vadd.f32 %v12145_v63, %v4685_v13  ;;  %v9233_v10 = vpop.f32.mrb[10].mxu0  ;;  %9257 = vmatmul.mubr.msk.bf16.vlgmr.msra.gmra.mrb[32].mxu0 %vm739_vm3, %v12163_v59 }
 0x30c   : > { %v4861_v29 = vmax.f32 %v4829_v11, 0.0  ;;  %v4830_v23 = vadd.f32 %v9233_v10, %v12145_v63  ;;  %v4688_v24 = vpop.f32.mrb[11].mxu0  ;;  %9260 = vmatprep.mubr.msk.bf16.mxu0 %vm739_vm3, %v12166_v47 }
 0x30d   : > { %v4859_v35 = vmax.f32 %v4827_v55, 0.0  ;;  %v4828_v22 = vadd.f32 %v12145_v63, %v4688_v24  ;;  %v4980_v32 = vld [vmem:[#allocation2 + $0x60] sm:$0xff] }
 0x30e   : > { %4949 = vst.msk [vmem:[#allocation2 + $0x91] sm:$0xff] %vm739_vm3, %v4861_v29  ;;  %v4862_v38 = vmax.f32 %v4830_v23, 0.0  ;;  %v4978_v15 = vld [vmem:[#allocation2 + $0x48] sm:$0xff] }
 0x30f   : > { %4947 = vst.msk [vmem:[#allocation2 + $0x79] sm:$0xff] %vm739_vm3, %v4859_v35  ;;  %v4860_v46 = vmax.f32 %v4828_v22, 0.0  ;;  %v4981_v3 = vld [vmem:[#allocation2 + $0x68] sm:$0xff] }
 0x310   : > { %4950 = vst.msk [vmem:[#allocation2 + $0x99] sm:$0xff] %vm739_vm3, %v4862_v38  ;;  %v4979_v45 = vld [vmem:[#allocation2 + $0x50] sm:$0xff]  ;;  %v12182_v30 = vpack.c.bf16 %v4981_v3, %v4980_v32  ;;  %v8485_v32 = vld [vmem:[%s12825_s2 + $0x4] sm:$0xf] }
 0x311   : > { %4948 = vst.msk [vmem:[#allocation2 + $0x81] sm:$0xff] %vm739_vm3, %v4860_v46  ;;  %v9236_v34 = vpop.f32.mrb[12].mxu0  ;;  %v12179_v5 = vpack.c.bf16 %v4979_v45, %v4978_v15  ;;  %v5234_v46 = vsel %vm788_vm0, %v12138_v17, 0 }
 0x312   : > { %v4833_v41 = vadd.f32 %v9236_v34, %v12145_v63  ;;  %v4701_v18 = vpop.f32.mrb[13].mxu0 }
 0x313   : > { %v4831_v31 = vadd.f32 %v12145_v63, %v4701_v18  ;;  %v9237_v26 = vpop.f32.mrb[14].mxu0  ;;  %9261 = vmatmul.mubr.msk.bf16.gmra.mrb[36].mxu0 %vm739_vm3, %v12179_v5 }
 0x314   : > { %v4865_v7 = vmax.f32 %v4833_v41, 0.0  ;;  %v4834_v2 = vadd.f32 %v9237_v26, %v12145_v63  ;;  %v4704_v0 = vpop.f32.mrb[15].mxu0  ;;  %9264 = vmatprep.mubr.msk.bf16.mxu0 %vm739_vm3, %v12182_v30 }
 0x315   : > { %v4863_v53 = vmax.f32 %v4831_v31, 0.0  ;;  %v4832_v54 = vadd.f32 %v12145_v63, %v4704_v0  ;;  %v4984_v25 = vld [vmem:[#allocation2 + $0x90] sm:$0xff] }
 0x316   : > { %4953 = vst.msk [vmem:[#allocation2 + $0xc1] sm:$0xff] %vm739_vm3, %v4865_v7  ;;  %v4866_v1 = vmax.f32 %v4834_v2, 0.0  ;;  %v4982_v52 = vld [vmem:[#allocation2 + $0x78] sm:$0xff] }
 0x317   : > { %4951 = vst.msk [vmem:[#allocation2 + $0xa9] sm:$0xff] %vm739_vm3, %v4863_v53  ;;  %v4864_v60 = vmax.f32 %v4832_v54, 0.0  ;;  %v4985_v28 = vld [vmem:[#allocation2 + $0x98] sm:$0xff] }
 0x318   : > { %4954 = vst.msk [vmem:[#allocation2 + $0xc9] sm:$0xff] %vm739_vm3, %v4866_v1  ;;  %v4983_v36 = vld [vmem:[#allocation2 + $0x80] sm:$0xff]  ;;  %v12198_v33 = vpack.c.bf16 %v4985_v28, %v4984_v25 }
 0x319   : > { %4952 = vst.msk [vmem:[#allocation2 + $0xb1] sm:$0xff] %vm739_vm3, %v4864_v60  ;;  %v9240_v48 = vpop.f32.mrb[16].mxu0  ;;  %v12195_v8 = vpack.c.bf16 %v4983_v36, %v4982_v52 }
 0x31a   : > { %v4837_v56 = vadd.f32 %v9240_v48, %v12145_v63  ;;  %v4717_v43 = vpop.f32.mrb[17].mxu0 }
 0x31b   : > { %v4835_v62 = vadd.f32 %v12145_v63, %v4717_v43  ;;  %v9241_v61 = vpop.f32.mrb[18].mxu0  ;;  %9265 = vmatmul.mubr.msk.bf16.gmra.mrb[40].mxu0 %vm739_vm3, %v12195_v8 }
 0x31c   : > { %v4869_v12 = vmax.f32 %v4837_v56, 0.0  ;;  %v4838_v14 = vadd.f32 %v9241_v61, %v12145_v63  ;;  %v4720_v20 = vpop.f32.mrb[19].mxu0  ;;  %9268 = vmatprep.mubr.msk.bf16.mxu0 %vm739_vm3, %v12198_v33 }
 0x31d   : > { %v4867_v49 = vmax.f32 %v4835_v62, 0.0  ;;  %v4836_v42 = vadd.f32 %v12145_v63, %v4720_v20  ;;  %v4988_v27 = vld [vmem:[#allocation2 + $0xc0] sm:$0xff] }
 0x31e   : > { %4957 = vst.msk [vmem:[#allocation2 + $0xf1] sm:$0xff] %vm739_vm3, %v4869_v12  ;;  %v4870_v21 = vmax.f32 %v4838_v14, 0.0  ;;  %v4986_v39 = vld [vmem:[#allocation2 + $0xa8] sm:$0xff] }
 0x31f   : > { %4955 = vst.msk [vmem:[#allocation2 + $0xd9] sm:$0xff] %vm739_vm3, %v4867_v49  ;;  %v4868_v57 = vmax.f32 %v4836_v42, 0.0  ;;  %v4989_v9 = vld [vmem:[#allocation2 + $0xc8] sm:$0xff] }
 0x320   : > { %4958 = vst.msk [vmem:[#allocation2 + $0xf9] sm:$0xff] %vm739_vm3, %v4870_v21  ;;  %v12210_v40 = vpack.c.bf16 %v4989_v9, %v4988_v27  ;;  %v4987_v6 = vld [vmem:[#allocation2 + $0xb0] sm:$0xff] }
 0x321   : > { %4956 = vst.msk [vmem:[#allocation2 + $0xe1] sm:$0xff] %vm739_vm3, %v4868_v57  ;;  %v9244_v50 = vpop.f32.mrb[20].mxu0  ;;  %v12213_v16 = vpack.c.bf16 %v4987_v6, %v4986_v39 }
 0x322   : > { %v4841_v37 = vadd.f32 %v9244_v50, %v12145_v63  ;;  %v4733_v51 = vpop.f32.mrb[21].mxu0  ;;  %9272 = vmatprep.mubr.msk.bf16.mxu1 %vm739_vm3, %v12210_v40 }
 0x323   : > { %v4839_v4 = vadd.f32 %v12145_v63, %v4733_v51  ;;  %v9245_v44 = vpop.f32.mrb[22].mxu0  ;;  %9269 = vmatmul.mubr.msk.bf16.gmra.mrb[44].mxu0 %vm739_vm3, %v12213_v16 }
 0x324   : > { %v4873_v58 = vmax.f32 %v4841_v37, 0.0  ;;  %v4842_v19 = vadd.f32 %v9245_v44, %v12145_v63  ;;  %v4736_v11 = vpop.f32.mrb[23].mxu0  ;;  %v5496_v44 = vsel %vm788_vm0, %v8485_v32, 0 }
 0x325   : > { %v4871_v13 = vmax.f32 %v4839_v4, 0.0  ;;  %v4840_v55 = vadd.f32 %v12145_v63, %v4736_v11  ;;  %v4992_v3 = vld [vmem:[#allocation2 + $0xf0] sm:$0xff]  ;;  %v12981_v4 = vld [vmem:[#allocation9_spill] sm:$0xff] }
 0x326   : > { %4961 = vst.msk [vmem:[#allocation2 + $0x121] sm:$0xff] %vm739_vm3, %v4873_v58  ;;  %v4874_v10 = vmax.f32 %v4842_v19, 0.0  ;;  %v4990_v24 = vld [vmem:[#allocation2 + $0xd8] sm:$0xff]  ;;  %v8502_v58 = vld [vmem:[%s12825_s2 + $0x8] sm:$0xf]  ;;  %v12983_v11 = vld [vmem:[#allocation13_spill] sm:$0xff] }
 0x327   : > { %4959 = vst.msk [vmem:[#allocation2 + $0x109] sm:$0xff] %vm739_vm3, %v4871_v13  ;;  %v4872_v29 = vmax.f32 %v4840_v55, 0.0  ;;  %v4993_v23 = vld [vmem:[#allocation2 + $0xf8] sm:$0xff]  ;;  %v12984_v13 = vld [vmem:[#allocation14_spill] sm:$0xff]  ;;  %v12985_v55 = vld [vmem:[#allocation15_spill] sm:$0xff] }
 0x328   : > { %4962 = vst.msk [vmem:[#allocation2 + $0x129] sm:$0xff] %vm739_vm3, %v4874_v10  ;;  %v4991_v35 = vld [vmem:[#allocation2 + $0xe0] sm:$0xff]  ;;  %v12232_v34 = vpack.c.bf16 %v4993_v23, %v4992_v3  ;;  %v12982_v19 = vld [vmem:[#allocation12_spill] sm:$0xff]  ;;  %v12988_v23 = vld [vmem:[#allocation18_spill] sm:$0xff] }
 0x329   : > { %4960 = vst.msk [vmem:[#allocation2 + $0x111] sm:$0xff] %vm739_vm3, %v4872_v29  ;;  %v9248_v22 = vpop.f32.mrb[24].mxu0  ;;  %v12227_v38 = vpack.c.bf16 %v4991_v35, %v4990_v24  ;;  %v12986_v10 = vld [vmem:[#allocation16_spill] sm:$0xff]  ;;  %v12987_v29 = vld [vmem:[#allocation17_spill] sm:$0xff]  ;;  %v12989_v24 = vld [vmem:[#allocation19_spill] sm:$0xff] }
 0x32a   : > { %v4845_v15 = vadd.f32 %v9248_v22, %v12145_v63  ;;  %v4749_v45 = vpop.f32.mrb[25].mxu0  ;;  %v12990_v35 = vld [vmem:[#allocation20_spill] sm:$0xff]  ;;  %v12991_v22 = vld [vmem:[#allocation21_spill] sm:$0xff]  ;;  %v12993_v3 = vld [vmem:[#allocation23_spill] sm:$0xff] }
 0x32b   : > { %v4843_v41 = vadd.f32 %v12145_v63, %v4749_v45  ;;  %v9249_v18 = vpop.f32.mrb[26].mxu0  ;;  %9273 = vmatmul.mubr.msk.bf16.vlgmr.msra.gmra.mrb[0].mxu1 %vm739_vm3, %v12227_v38  ;;  %v12995_v45 = vld [vmem:[#allocation25_spill] sm:$0xff] }
 0x32c   : > { %v4877_v31 = vmax.f32 %v4845_v15, 0.0  ;;  %v4846_v26 = vadd.f32 %v9249_v18, %v12145_v63  ;;  %9289 = vmatpush3.bf16.msra.mxu1 %v5234_v46  ;;  %v4752_v17 = vpop.f32.mrb[27].mxu0  ;;  %9276 = vmatprep.mubr.msk.bf16.mxu1 %vm739_vm3, %v12232_v34  ;;  %v12992_v46 = vld [vmem:[#allocation22_spill] sm:$0xff]  ;;  %v12994_v15 = vld [vmem:[#allocation24_spill] sm:$0xff] }
 0x32d   : > { %v4875_v7 = vmax.f32 %v4843_v41, 0.0  ;;  %v4844_v2 = vadd.f32 %v12145_v63, %v4752_v17  ;;  %10152 = vmatprep.subr.msk.bf16.mxu1 %vm788_vm0, %v8485_v32  ;;  %v4996_v36 = vld [vmem:[#allocation2 + $0x120] sm:$0xff]  ;;  %v5398_v41 = vld [vmem:[#allocation2 + $0x9] sm:$0xff] }
 0x32e   : > { %4965 = vst.msk [vmem:[#allocation2 + $0x151] sm:$0xff] %vm739_vm3, %v4877_v31  ;;  %v4878_v0 = vmax.f32 %v4846_v26, 0.0  ;;  %v4994_v1 = vld [vmem:[#allocation2 + $0x108] sm:$0xff]  ;;  %v5402_v17 = vld [vmem:[#allocation2 + $0x39] sm:$0xff] }
 0x32f   : > { %4963 = vst.msk [vmem:[#allocation2 + $0x139] sm:$0xff] %vm739_vm3, %v4875_v7  ;;  %v4876_v53 = vmax.f32 %v4844_v2, 0.0  ;;  %v4997_v54 = vld [vmem:[#allocation2 + $0x128] sm:$0xff]  ;;  %v5399_v7 = vld [vmem:[#allocation2 + $0x19] sm:$0xff] }
 0x330   : > { %4966 = vst.msk [vmem:[#allocation2 + $0x159] sm:$0xff] %vm739_vm3, %v4878_v0  ;;  %v4995_v60 = vld [vmem:[#allocation2 + $0x110] sm:$0xff]  ;;  %v12252_v56 = vpack.c.bf16 %v4997_v54, %v4996_v36  ;;  %v5397_v32 = vld [vmem:[#allocation2 + $0x1] sm:$0xff]  ;;  %v5790_v0 = vsel %vm788_vm0, %v8502_v58, 0 }
 0x331   : > { %4964 = vst.msk [vmem:[#allocation2 + $0x141] sm:$0xff] %vm739_vm3, %v4876_v53  ;;  %v9252_v28 = vpop.f32.mrb[28].mxu0  ;;  %v12249_v52 = vpack.c.bf16 %v4995_v60, %v4994_v1  ;;  %v5429_v18 = vpack.c.bf16 %v5398_v41, %v5397_v32  ;;  %v12996_v31 = vld [vmem:[#allocation26_spill] sm:$0xff]  ;;  %v5401_v53 = vld [vmem:[#allocation2 + $0x31] sm:$0xff] }
 0x332   : > { %v4849_v48 = vadd.f32 %v9252_v28, %v12145_v63  ;;  %v4765_v25 = vpop.f32.mrb[29].mxu0  ;;  %v5400_v26 = vld [vmem:[#allocation2 + $0x21] sm:$0xff]  ;;  %v12318_v54 = vpack.c.bf16 %v5402_v17, %v5401_v53  ;;  %v12323_v1 = vld [vmem:[%s12825_s2 + $0xc] sm:$0xf]  ;;  %v5404_v60 = vld [vmem:[#allocation2 + $0x51] sm:$0xff] }
 0x333   : > { %v4847_v43 = vadd.f32 %v12145_v63, %v4765_v25  ;;  %v9253_v62 = vpop.f32.mrb[30].mxu0  ;;  %9277 = vmatmul.mubr.msk.bf16.gmra.mrb[4].mxu1 %vm739_vm3, %v12249_v52  ;;  %v12315_v2 = vpack.c.bf16 %v5400_v26, %v5399_v7  ;;  %v5406_v28 = vld [vmem:[#allocation2 + $0x69] sm:$0xff]  ;;  %v5405_v25 = vld [vmem:[#allocation2 + $0x61] sm:$0xff] }
 0x334   : > { %v4881_v61 = vmax.f32 %v4849_v48, 0.0  ;;  %v4850_v12 = vadd.f32 %v9253_v62, %v12145_v63  ;;  %v4768_v14 = vpop.f32.mrb[31].mxu0  ;;  %9280 = vmatprep.mubr.msk.bf16.mxu1 %vm739_vm3, %v12252_v56  ;;  %v5403_v36 = vld [vmem:[#allocation2 + $0x49] sm:$0xff]  ;;  %v5408_v62 = vld [vmem:[#allocation2 + $0x81] sm:$0xff] }
 0x335   : > { %v4879_v20 = vmax.f32 %v4847_v43, 0.0  ;;  %v4848_v49 = vadd.f32 %v12145_v63, %v4768_v14  ;;  %v5000_v6 = vld [vmem:[#allocation2 + $0x150] sm:$0xff]  ;;  %v12331_v48 = vpack.c.bf16 %v5404_v60, %v5403_v36  ;;  %v12333_v43 = vpack.c.bf16 %v5406_v28, %v5405_v25  ;;  %v5693_v17 = vld [vmem:[#allocation2 + $0x1a] sm:$0xff]  ;;  %v5694_v7 = vld [vmem:[#allocation2 + $0x22] sm:$0xff] }
 0x336   : > { %4969 = vst.msk [vmem:[#allocation2 + $0x181] sm:$0xff] %vm739_vm3, %v4881_v61  ;;  %v4882_v42 = vmax.f32 %v4850_v12, 0.0  ;;  %v4998_v27 = vld [vmem:[#allocation2 + $0x138] sm:$0xff]  ;;  %v5692_v32 = vld [vmem:[#allocation2 + $0xa] sm:$0xff]  ;;  %v12384_v60 = vpack.c.bf16 %v5694_v7, %v5693_v17  ;;  %v6084_v28 = vsel %vm788_vm0, %v12323_v1, 0 }
 0x337   : > { %4967 = vst.msk [vmem:[#allocation2 + $0x169] sm:$0xff] %vm739_vm3, %v4879_v20  ;;  %v4880_v21 = vmax.f32 %v4848_v49, 0.0  ;;  %v5001_v57 = vld [vmem:[#allocation2 + $0x158] sm:$0xff]  ;;  %v12393_v25 = vld [vmem:[%s12825_s2 + $0x10] sm:$0xf] }
 0x338   : > { %4970 = vst.msk [vmem:[#allocation2 + $0x189] sm:$0xff] %vm739_vm3, %v4882_v42  ;;  %v4999_v9 = vld [vmem:[#allocation2 + $0x140] sm:$0xff]  ;;  %v12267_v50 = vpack.c.bf16 %v5001_v57, %v5000_v6  ;;  %v5409_v20 = vld [vmem:[#allocation2 + $0x91] sm:$0xff]  ;;  %v5411_v57 = vld [vmem:[#allocation2 + $0xa9] sm:$0xff] }
 0x339   : > { %4968 = vst.msk [vmem:[#allocation2 + $0x171] sm:$0xff] %vm739_vm3, %v4880_v21  ;;  %v12265_v39 = vpack.c.bf16 %v4999_v9, %v4998_v27  ;;  %v5410_v61 = vld [vmem:[#allocation2 + $0x99] sm:$0xff]  ;;  %v5412_v42 = vld [vmem:[#allocation2 + $0xb1] sm:$0xff]  ;;  %v5414_v21 = vld [vmem:[#allocation2 + $0xc9] sm:$0xff] }
 0x33a   : > { %v5407_v12 = vld [vmem:[#allocation2 + $0x79] sm:$0xff]  ;;  %v12341_v49 = vpack.c.bf16 %v5410_v61, %v5409_v20  ;;  %v12347_v27 = vpack.c.bf16 %v5412_v42, %v5411_v57  ;;  %v5413_v9 = vld [vmem:[#allocation2 + $0xc1] sm:$0xff] }
 0x33b   : > { %9281 = vmatmul.mubr.msk.bf16.gmra.mrb[8].mxu1 %vm739_vm3, %v12265_v39  ;;  %v12339_v14 = vpack.c.bf16 %v5408_v62, %v5407_v12  ;;  %v12349_v6 = vpack.c.bf16 %v5414_v21, %v5413_v9  ;;  %v5696_v53 = vld [vmem:[#allocation2 + $0x3a] sm:$0xff]  ;;  %v5697_v62 = vld [vmem:[#allocation2 + $0x4a] sm:$0xff]  ;;  %v5698_v61 = vld [vmem:[#allocation2 + $0x52] sm:$0xff] }
 0x33c   : > { %9284 = vmatprep.mubr.msk.bf16.mxu1 %vm739_vm3, %v12267_v50  ;;  %v5700_v12 = vld [vmem:[#allocation2 + $0x6a] sm:$0xff]  ;;  %v12401_v20 = vpack.c.bf16 %v5698_v61, %v5697_v62  ;;  %v5701_v21 = vld [vmem:[#allocation2 + $0x7a] sm:$0xff]  ;;  %v5702_v57 = vld [vmem:[#allocation2 + $0x82] sm:$0xff] }
 0x33d   : > { %v5703_v9 = vld [vmem:[#allocation2 + $0x92] sm:$0xff]  ;;  %v5712_v7 = vld [vmem:[#allocation2 + $0xfa] sm:$0xff] }
 0x33e   : > { %v5002_v63 = vld [vmem:[#allocation2 + $0x168] sm:$0xff]  ;;  %v5711_v17 = vld [vmem:[#allocation2 + $0xf2] sm:$0xff] }
 0x33f   : > { %v12443_v62 = vpack.c.bf16 %v5712_v7, %v5711_v17  ;;  %v5719_v7 = vld [vmem:[#allocation2 + $0x152] sm:$0xff] }
 0x340   : > { %v5003_v37 = vld [vmem:[#allocation2 + $0x170] sm:$0xff] }
 0x341   : > { %v12273_v51 = vpack.c.bf16 %v5003_v37, %v5002_v63  ;;  %v5416_v63 = vld [vmem:[#allocation2 + $0xe1] sm:$0xff]  ;;  %v5418_v37 = vld [vmem:[#allocation2 + $0xf9] sm:$0xff]  ;;  %v5428_v41 = vld [vmem:[#allocation2 + $0x171] sm:$0xff] }
 0x343   : > { %9285 = vmatmul.mubr.msk.bf16.gmra.mrb[12].mxu1 %vm739_vm3, %v12273_v51 }
 0x344   : > { %9290 = vmatprep.mubr.msk.bf16.mxu1 %vm739_vm3, %v12981_v4  ;;  %v5415_v4 = vld [vmem:[#allocation2 + $0xd9] sm:$0xff] }
 0x34b   : > { %9291 = vmatmul.mubr.msk.bf16.vlgmr.msra.gmra.mrb[16].mxu1 %vm739_vm3, %v12982_v19 }
 0x34c   : > { %9323 = vmatpush3.bf16.msra.mxu1 %v5496_v44  ;;  %9294 = vmatprep.mubr.msk.bf16.mxu1 %vm739_vm3, %v12983_v11  ;;  %v12355_v44 = vpack.c.bf16 %v5416_v63, %v5415_v4  ;;  %v5420_v11 = vld [vmem:[#allocation2 + $0x111] sm:$0xff]  ;;  %v5704_v63 = vld [vmem:[#allocation2 + $0x9a] sm:$0xff] }
 0x34d   : > { %10153 = vmatprep.subr.msk.bf16.mxu1 %vm788_vm0, %v8502_v58  ;;  %v5417_v58 = vld [vmem:[#allocation2 + $0xf1] sm:$0xff]  ;;  %v12411_v4 = vpack.c.bf16 %v5704_v63, %v5703_v9 }
 0x34e   : > { %v12357_v19 = vpack.c.bf16 %v5418_v37, %v5417_v58  ;;  %v12409_v37 = vpack.c.bf16 %v5702_v57, %v5701_v21  ;;  %v5715_v57 = vld [vmem:[#allocation2 + $0x122] sm:$0xff]  ;;  %v5716_v9 = vld [vmem:[#allocation2 + $0x12a] sm:$0xff] }
 0x353   : > { %9295 = vmatmul.mubr.msk.bf16.gmra.mrb[20].mxu1 %vm739_vm3, %v12984_v13  ;;  %v5422_v13 = vld [vmem:[#allocation2 + $0x129] sm:$0xff] }
 0x354   : > { %9298 = vmatprep.mubr.msk.bf16.mxu1 %vm739_vm3, %v12985_v55  ;;  %v5419_v55 = vld [vmem:[#allocation2 + $0x109] sm:$0xff] }
 0x35b   : > { %9299 = vmatmul.mubr.msk.bf16.gmra.mrb[24].mxu1 %vm739_vm3, %v12986_v10  ;;  %v12363_v10 = vpack.c.bf16 %v5420_v11, %v5419_v55  ;;  %v5705_v11 = vld [vmem:[#allocation2 + $0xaa] sm:$0xff] }
 0x35c   : > { %9302 = vmatprep.mubr.msk.bf16.mxu1 %vm739_vm3, %v12987_v29  ;;  %v5421_v29 = vld [vmem:[#allocation2 + $0x121] sm:$0xff] }
 0x363   : > { %9303 = vmatmul.mubr.msk.bf16.gmra.mrb[28].mxu1 %vm739_vm3, %v12988_v23  ;;  %v12365_v23 = vpack.c.bf16 %v5422_v13, %v5421_v29  ;;  %v5706_v13 = vld [vmem:[#allocation2 + $0xb2] sm:$0xff]  ;;  %v5707_v29 = vld [vmem:[#allocation2 + $0xc2] sm:$0xff] }
 0x364   : > { %9306 = vmatprep.mubr.msk.bf16.mxu1 %vm739_vm3, %v12989_v24  ;;  %v5424_v24 = vld [vmem:[#allocation2 + $0x141] sm:$0xff] }
 0x36b   : > { %9307 = vmatmul.mubr.msk.bf16.gmra.mrb[0].mxu1 %vm739_vm3, %v12990_v35  ;;  %v5426_v35 = vld [vmem:[#allocation2 + $0x159] sm:$0xff] }
 0x36c   : > { %9310 = vmatprep.mubr.msk.bf16.mxu1 %vm739_vm3, %v12991_v22  ;;  %v5423_v22 = vld [vmem:[#allocation2 + $0x139] sm:$0xff] }
 0x373   : > { %9311 = vmatmul.mubr.msk.bf16.gmra.mrb[4].mxu1 %vm739_vm3, %v12992_v46  ;;  %v12371_v46 = vpack.c.bf16 %v5424_v24, %v5423_v22  ;;  %v5708_v24 = vld [vmem:[#allocation2 + $0xca] sm:$0xff] }
 0x374   : > { %9314 = vmatprep.mubr.msk.bf16.mxu1 %vm739_vm3, %v12993_v3  ;;  %v5425_v3 = vld [vmem:[#allocation2 + $0x151] sm:$0xff] }
 0x37b   : > { %9315 = vmatmul.mubr.msk.bf16.gmra.mrb[8].mxu1 %vm739_vm3, %v12994_v15  ;;  %v12373_v15 = vpack.c.bf16 %v5426_v35, %v5425_v3  ;;  %v12425_v3 = vpack.c.bf16 %v5706_v13, %v5705_v11 }
 0x37c   : > { %9318 = vmatprep.mubr.msk.bf16.mxu1 %vm739_vm3, %v12995_v45  ;;  %v5691_v45 = vld [vmem:[#allocation2 + $0x2] sm:$0xff] }
 0x383   : > { %9319 = vmatmul.mubr.msk.bf16.gmra.mrb[12].mxu1 %vm739_vm3, %v12996_v31  ;;  %v5723_v31 = vpack.c.bf16 %v5692_v32, %v5691_v45  ;;  %v12427_v45 = vpack.c.bf16 %v5708_v24, %v5707_v29  ;;  %v12459_v29 = vpack.c.bf16 %v5716_v9, %v5715_v57  ;;  %v5721_v9 = vld [vmem:[#allocation2 + $0x16a] sm:$0xff] }
 0x384   : > { %9324 = vmatprep.mubr.msk.bf16.mxu1 %vm739_vm3, %v5429_v18  ;;  %v5427_v18 = vld [vmem:[#allocation2 + $0x169] sm:$0xff] }
 0x385   : > { %v12379_v26 = vpack.c.bf16 %v5428_v41, %v5427_v18  ;;  %v5709_v41 = vld [vmem:[#allocation2 + $0xda] sm:$0xff]  ;;  %v5710_v18 = vld [vmem:[#allocation2 + $0xe2] sm:$0xff] }
 0x38b   : > { %9325 = vmatmul.mubr.msk.bf16.vlgmr.msra.gmra.mrb[16].mxu1 %vm739_vm3, %v12315_v2 }
 0x38c   : > { %9357 = vmatpush3.bf16.msra.mxu1 %v5790_v0  ;;  %9328 = vmatprep.mubr.msk.bf16.mxu1 %vm739_vm3, %v12318_v54  ;;  %v5695_v0 = vld [vmem:[#allocation2 + $0x32] sm:$0xff] }
 0x38d   : > { %10154 = vmatprep.subr.msk.bf16.mxu1 %vm788_vm0, %v12323_v1  ;;  %v12388_v36 = vpack.c.bf16 %v5696_v53, %v5695_v0  ;;  %v5699_v1 = vld [vmem:[#allocation2 + $0x62] sm:$0xff] }
 0x38e   : > { %v12403_v42 = vpack.c.bf16 %v5700_v12, %v5699_v1  ;;  %v5713_v1 = vld [vmem:[#allocation2 + $0x10a] sm:$0xff]  ;;  %v5714_v12 = vld [vmem:[#allocation2 + $0x112] sm:$0xff] }
 0x38f   : > { %v12457_v13 = vpack.c.bf16 %v5714_v12, %v5713_v1 }
 0x393   : > { %9329 = vmatmul.mubr.msk.bf16.gmra.mrb[20].mxu1 %vm739_vm3, %v12331_v48 }
 0x394   : > { %9332 = vmatprep.mubr.msk.bf16.mxu1 %vm739_vm3, %v12333_v43 }
 0x39b   : > { %9333 = vmatmul.mubr.msk.bf16.gmra.mrb[24].mxu1 %vm739_vm3, %v12339_v14 }
 0x39c   : > { %9336 = vmatprep.mubr.msk.bf16.mxu1 %vm739_vm3, %v12341_v49 }
 0x3a3   : > { %9337 = vmatmul.mubr.msk.bf16.gmra.mrb[28].mxu1 %vm739_vm3, %v12347_v27 }
 0x3a4   : > { %9340 = vmatprep.mubr.msk.bf16.mxu1 %vm739_vm3, %v12349_v6 }
 0x3ab   : > { %9341 = vmatmul.mubr.msk.bf16.gmra.mrb[0].mxu1 %vm739_vm3, %v12355_v44 }
 0x3ac   : > { %9344 = vmatprep.mubr.msk.bf16.mxu1 %vm739_vm3, %v12357_v19 }
 0x3b3   : > { %9345 = vmatmul.mubr.msk.bf16.gmra.mrb[4].mxu1 %vm739_vm3, %v12363_v10 }
 0x3b4   : > { %9348 = vmatprep.mubr.msk.bf16.mxu1 %vm739_vm3, %v12365_v23 }
 0x3bb   : > { %9349 = vmatmul.mubr.msk.bf16.gmra.mrb[8].mxu1 %vm739_vm3, %v12371_v46 }
 0x3bc   : > { %9352 = vmatprep.mubr.msk.bf16.mxu1 %vm739_vm3, %v12373_v15 }
 0x3c3   : > { %9353 = vmatmul.mubr.msk.bf16.gmra.mrb[12].mxu1 %vm739_vm3, %v12379_v26 }
 0x3c4   : > { %9358 = vmatprep.mubr.msk.bf16.mxu1 %vm739_vm3, %v5723_v31 }
 0x3cb   : > { %9359 = vmatmul.mubr.msk.bf16.vlgmr.msra.gmra.mrb[16].mxu1 %vm739_vm3, %v12384_v60 }
 0x3cc   : > { %9391 = vmatpush3.bf16.msra.mxu1 %v6084_v28  ;;  %9362 = vmatprep.mubr.msk.bf16.mxu1 %vm739_vm3, %v12388_v36  ;;  %v12441_v28 = vpack.c.bf16 %v5710_v18, %v5709_v41  ;;  %v5717_v41 = vld [vmem:[#allocation2 + $0x13a] sm:$0xff]  ;;  %v5718_v18 = vld [vmem:[#allocation2 + $0x142] sm:$0xff] }
 0x3cd   : > { %10155 = vmatprep.subr.msk.bf16.mxu1 %vm788_vm0, %v12393_v25  ;;  %v12473_v12 = vpack.c.bf16 %v5718_v18, %v5717_v41  ;;  %v8553_v41 = vld [vmem:[%s12825_s2 + $0x14] sm:$0xf]  ;;  %v8570_v18 = vld [vmem:[%s12825_s2 + $0x18] sm:$0xf] }
 0x3d3   : > { %9363 = vmatmul.mubr.msk.bf16.gmra.mrb[20].mxu1 %vm739_vm3, %v12401_v20 }
 0x3d4   : > { %9366 = vmatprep.mubr.msk.bf16.mxu1 %vm739_vm3, %v12403_v42 }
 0x3db   : > { %9367 = vmatmul.mubr.msk.bf16.gmra.mrb[24].mxu1 %vm739_vm3, %v12409_v37 }
 0x3dc   : > { %9370 = vmatprep.mubr.msk.bf16.mxu1 %vm739_vm3, %v12411_v4 }
 0x3de   : > { %v12417_v58 = vpop.f32.mrb[32].mxu0 }
 0x3df   : > { %v12419_v55 = vpop.f32.mrb[33].mxu0 }
 0x3e0   : > { %v12421_v35 = vpop.f32.mrb[34].mxu0 }
 0x3e1   : > { %v12423_v22 = vpop.f32.mrb[35].mxu0 }
 0x3e3   : > { %9371 = vmatmul.mubr.msk.bf16.gmra.mrb[28].mxu1 %vm739_vm3, %v12425_v3 }
 0x3e4   : > { %9374 = vmatprep.mubr.msk.bf16.mxu1 %vm739_vm3, %v12427_v45 }
 0x3e6   : > { %v12433_v32 = vpop.f32.mrb[36].mxu0 }
 0x3e7   : > { %v12435_v31 = vpop.f32.mrb[37].mxu0 }
 0x3e8   : > { %v12437_v0 = vpop.f32.mrb[38].mxu0 }
 0x3e9   : > { %v12439_v53 = vpop.f32.mrb[39].mxu0 }
 0x3eb   : > { %9375 = vmatmul.mubr.msk.bf16.gmra.mrb[0].mxu1 %vm739_vm3, %v12441_v28 }
 0x3ec   : > { %9378 = vmatprep.mubr.msk.bf16.mxu1 %vm739_vm3, %v12443_v62 }
 0x3ee   : > { %v12449_v61 = vpop.f32.mrb[40].mxu0 }
 0x3ef   : > { %v12451_v21 = vpop.f32.mrb[41].mxu0 }
 0x3f0   : > { %12997 = vst [vmem:[#allocation4_spill] sm:$0xff] %v12451_v21  ;;  %v12453_v63 = vpop.f32.mrb[42].mxu0 }
 0x3f1   : > { %12998 = vst [vmem:[#allocation5_spill] sm:$0xff] %v12453_v63  ;;  %v12455_v11 = vpop.f32.mrb[43].mxu0  ;;  %v5720_v63 = vld [vmem:[#allocation2 + $0x15a] sm:$0xff] }
 0x3f2   : > { %12999 = vst [vmem:[#allocation6_spill] sm:$0xff] %v12455_v11  ;;  %v12475_v57 = vpack.c.bf16 %v5720_v63, %v5719_v7  ;;  %v6378_v63 = vsel %vm788_vm0, %v12393_v25, 0  ;;  %v6309_v7 = vld [vmem:[#allocation2 + $0x181] sm:$0xff] }
 0x3f3   : > { %9379 = vmatmul.mubr.msk.bf16.gmra.mrb[4].mxu1 %vm739_vm3, %v12457_v13 }
 0x3f4   : > { %9382 = vmatprep.mubr.msk.bf16.mxu1 %vm739_vm3, %v12459_v29 }
 0x3f6   : > { %v12465_v24 = vpop.f32.mrb[44].mxu0 }
 0x3f7   : > { %13000 = vst [vmem:[#allocation7_spill] sm:$0xff] %v12465_v24  ;;  %v12467_v17 = vpop.f32.mrb[45].mxu0  ;;  %v5722_v24 = vld [vmem:[#allocation2 + $0x172] sm:$0xff] }
 0x3f8   : > { %v12469_v21 = vpop.f32.mrb[46].mxu0  ;;  %v12481_v11 = vpack.c.bf16 %v5722_v24, %v5721_v9  ;;  %v6672_v24 = vsel %vm788_vm0, %v8553_v41, 0 }
 0x3f9   : > { %v12471_v1 = vpop.f32.mrb[47].mxu0 }
 0x3fb   : > { %9383 = vmatmul.mubr.msk.bf16.gmra.mrb[8].mxu1 %vm739_vm3, %v12473_v12 }
 0x3fc   : > { %9386 = vmatprep.mubr.msk.bf16.mxu1 %vm739_vm3, %v12475_v57 }
 0x403   : > { %9387 = vmatmul.mubr.msk.bf16.gmra.mrb[12].mxu1 %vm739_vm3, %v12481_v11 }
 0x404   : > { %9392 = vmatprep.mubr.msk.bf16.mxu1 %vm739_vm3, %v12163_v59  ;;  %v6016_v59 = vld [vmem:[#allocation2 + $0x188] sm:$0xff] }
 0x40b   : > { %9393 = vmatmul.mubr.msk.bf16.vlgmr.msra.gmra.mrb[16].mxu1 %vm739_vm3, %v12166_v47  ;;  %v6015_v47 = vld [vmem:[#allocation2 + $0x180] sm:$0xff] }
 0x40c   : > { %9425 = vmatpush3.bf16.msra.mxu1 %v6378_v63  ;;  %9396 = vmatprep.mubr.msk.bf16.mxu1 %vm739_vm3, %v12179_v5  ;;  %v12521_v25 = vpack.c.bf16 %v6016_v59, %v6015_v47  ;;  %v6967_v63 = vsel %vm788_vm0, %v8570_v18, 0  ;;  %v6604_v59 = vld [vmem:[#allocation2 + $0x18a] sm:$0xff]  ;;  %v6869_v47 = vld [vmem:[#allocation2 + $0x38] sm:$0xff] }
 0x40d   : > { %10156 = vmatprep.subr.msk.bf16.mxu1 %vm788_vm0, %v8553_v41  ;;  %v8587_v41 = vld [vmem:[%s12825_s2 + $0x1c] sm:$0xf] }
 0x413   : > { %9397 = vmatmul.mubr.msk.bf16.gmra.mrb[20].mxu1 %vm739_vm3, %v12182_v30 }
 0x414   : > { %9400 = vmatprep.mubr.msk.bf16.mxu1 %vm739_vm3, %v12195_v8 }
 0x41b   : > { %9401 = vmatmul.mubr.msk.bf16.gmra.mrb[24].mxu1 %vm739_vm3, %v12198_v33 }
 0x41c   : > { %9404 = vmatprep.mubr.msk.bf16.mxu1 %vm739_vm3, %v12213_v16 }
 0x423   : > { %9405 = vmatmul.mubr.msk.bf16.gmra.mrb[28].mxu1 %vm739_vm3, %v12210_v40 }
 0x424   : > { %9408 = vmatprep.mubr.msk.bf16.mxu1 %vm739_vm3, %v12227_v38 }
 0x42b   : > { %9409 = vmatmul.mubr.msk.bf16.gmra.mrb[0].mxu1 %vm739_vm3, %v12232_v34 }
 0x42c   : > { %9412 = vmatprep.mubr.msk.bf16.mxu1 %vm739_vm3, %v12249_v52 }
 0x433   : > { %9413 = vmatmul.mubr.msk.bf16.gmra.mrb[4].mxu1 %vm739_vm3, %v12252_v56 }
 0x434   : > { %9416 = vmatprep.mubr.msk.bf16.mxu1 %vm739_vm3, %v12265_v39 }
 0x43b   : > { %9417 = vmatmul.mubr.msk.bf16.gmra.mrb[8].mxu1 %vm739_vm3, %v12267_v50 }
 0x43c   : > { %9420 = vmatprep.mubr.msk.bf16.mxu1 %vm739_vm3, %v12273_v51 }
 0x443   : > { %9421 = vmatmul.mubr.msk.bf16.gmra.mrb[12].mxu1 %vm739_vm3, %v12521_v25 }
 0x444   : > { %9426 = vmatprep.mubr.msk.bf16.mxu1 %vm739_vm3, %v12315_v2  ;;  %v6310_v2 = vld [vmem:[#allocation2 + $0x189] sm:$0xff] }
 0x445   : > { %v12560_v9 = vpack.c.bf16 %v6310_v2, %v6309_v7  ;;  %v7261_v7 = vsel %vm788_vm0, %v8587_v41, 0 }
 0x44b   : > { %9427 = vmatmul.mubr.msk.bf16.vlgmr.msra.gmra.mrb[16].mxu1 %vm739_vm3, %v12318_v54 }
 0x44c   : > { %9459 = vmatpush3.bf16.msra.mxu1 %v6672_v24  ;;  %9430 = vmatprep.mubr.msk.bf16.mxu1 %vm739_vm3, %v12331_v48 }
 0x44d   : > { %10157 = vmatprep.subr.msk.bf16.mxu1 %vm788_vm0, %v8570_v18  ;;  %v6868_v18 = vld [vmem:[#allocation2 + $0x30] sm:$0xff] }
 0x44e   : > { %v6900_v2 = vpack.c.bf16 %v6869_v47, %v6868_v18  ;;  %v13003_v47 = vld [vmem:[#allocation6_spill] sm:$0xff] }
 0x453   : > { %9431 = vmatmul.mubr.msk.bf16.gmra.mrb[20].mxu1 %vm739_vm3, %v12333_v43 }
 0x454   : > { %9434 = vmatprep.mubr.msk.bf16.mxu1 %vm739_vm3, %v12339_v14 }
 0x45b   : > { %9435 = vmatmul.mubr.msk.bf16.gmra.mrb[24].mxu1 %vm739_vm3, %v12341_v49 }
 0x45c   : > { %9438 = vmatprep.mubr.msk.bf16.mxu1 %vm739_vm3, %v12347_v27 }
 0x463   : > { %9439 = vmatmul.mubr.msk.bf16.gmra.mrb[28].mxu1 %vm739_vm3, %v12349_v6 }
 0x464   : > { %9442 = vmatprep.mubr.msk.bf16.mxu1 %vm739_vm3, %v12355_v44 }
 0x46b   : > { %9443 = vmatmul.mubr.msk.bf16.gmra.mrb[0].mxu1 %vm739_vm3, %v12357_v19 }
 0x46c   : > { %9446 = vmatprep.mubr.msk.bf16.mxu1 %vm739_vm3, %v12363_v10 }
 0x473   : > { %9447 = vmatmul.mubr.msk.bf16.gmra.mrb[4].mxu1 %vm739_vm3, %v12365_v23 }
 0x474   : > { %9450 = vmatprep.mubr.msk.bf16.mxu1 %vm739_vm3, %v12371_v46 }
 0x47b   : > { %9451 = vmatmul.mubr.msk.bf16.gmra.mrb[8].mxu1 %vm739_vm3, %v12373_v15 }
 0x47c   : > { %9454 = vmatprep.mubr.msk.bf16.mxu1 %vm739_vm3, %v12379_v26 }
 0x483   : > { %9455 = vmatmul.mubr.msk.bf16.gmra.mrb[12].mxu1 %vm739_vm3, %v12560_v9 }
 0x484   : > { %9460 = vmatprep.mubr.msk.bf16.mxu1 %vm739_vm3, %v12384_v60  ;;  %v6603_v60 = vld [vmem:[#allocation2 + $0x182] sm:$0xff] }
 0x485   : > { %v6620_v24 = vpack.c.bf16 %v6604_v59, %v6603_v60 }
 0x48b   : > { %9461 = vmatmul.mubr.msk.bf16.vlgmr.msra.gmra.mrb[16].mxu1 %vm739_vm3, %v12388_v36 }
 0x48c   : > { %9493 = vmatpush3.bf16.msra.mxu1 %v6967_v63  ;;  %9464 = vmatprep.mubr.msk.bf16.mxu1 %vm739_vm3, %v12401_v20  ;;  %v8604_v63 = vld [vmem:[%s12825_s2 + $0x20] sm:$0xf] }
 0x48d   : > { %10158 = vmatprep.subr.msk.bf16.mxu1 %vm788_vm0, %v8587_v41 }
 0x493   : > { %9465 = vmatmul.mubr.msk.bf16.gmra.mrb[20].mxu1 %vm739_vm3, %v12403_v42 }
 0x494   : > { %9468 = vmatprep.mubr.msk.bf16.mxu1 %vm739_vm3, %v12409_v37 }
 0x49b   : > { %9469 = vmatmul.mubr.msk.bf16.gmra.mrb[24].mxu1 %vm739_vm3, %v12411_v4 }
 0x49c   : > { %9472 = vmatprep.mubr.msk.bf16.mxu1 %vm739_vm3, %v12425_v3 }
 0x4a3   : > { %9473 = vmatmul.mubr.msk.bf16.gmra.mrb[28].mxu1 %vm739_vm3, %v12427_v45 }
 0x4a4   : > { %9476 = vmatprep.mubr.msk.bf16.mxu1 %vm739_vm3, %v12441_v28 }
 0x4ab   : > { %9477 = vmatmul.mubr.msk.bf16.gmra.mrb[0].mxu1 %vm739_vm3, %v12443_v62 }
 0x4ac   : > { %9480 = vmatprep.mubr.msk.bf16.mxu1 %vm739_vm3, %v12457_v13 }
 0x4b3   : > { %9481 = vmatmul.mubr.msk.bf16.gmra.mrb[4].mxu1 %vm739_vm3, %v12459_v29 }
 0x4b4   : > { %9484 = vmatprep.mubr.msk.bf16.mxu1 %vm739_vm3, %v12473_v12 }
 0x4bb   : > { %9485 = vmatmul.mubr.msk.bf16.gmra.mrb[8].mxu1 %vm739_vm3, %v12475_v57 }
 0x4bc   : > { %9488 = vmatprep.mubr.msk.bf16.mxu1 %vm739_vm3, %v12481_v11 }
 0x4c3   : > { %9489 = vmatmul.mubr.msk.bf16.gmra.mrb[12].mxu1 %vm739_vm3, %v6620_v24 }
 0x4c4   : > { %9494 = vmatprep.mubr.msk.bf16.mxu1 %vm739_vm3, %v6900_v2 }
 0x4cb   : > { %9495 = vmatmul.mubr.msk.bf16.vlgmr.msra.gmra.mrb[16].mxu1 %vm739_vm3, %v12179_v5  ;;  %v6898_v5 = vld [vmem:[#allocation2 + $0x198] sm:$0xff] }
 0x4cc   : > { %9527 = vmatpush3.bf16.msra.mxu1 %v7261_v7  ;;  %9498 = vmatprep.mubr.msk.bf16.mxu1 %vm739_vm3, %v12182_v30  ;;  %v6899_v30 = vld [vmem:[#allocation2 + $0x1a0] sm:$0xff] }
 0x4cd   : > { %10159 = vmatprep.subr.msk.bf16.mxu1 %vm788_vm0, %v8604_v63 }
 0x4d3   : > { %9499 = vmatmul.mubr.msk.bf16.gmra.mrb[20].mxu1 %vm739_vm3, %v12195_v8  ;;  %v6915_v8 = vpack.c.bf16 %v6899_v30, %v6898_v5 }
 0x4d4   : > { %9502 = vmatprep.mubr.msk.bf16.mxu1 %vm739_vm3, %v12198_v33  ;;  %v7555_v33 = vsel %vm788_vm0, %v8604_v63, 0 }
 0x4db   : > { %9503 = vmatmul.mubr.msk.bf16.gmra.mrb[24].mxu1 %vm739_vm3, %v12213_v16  ;;  %v7193_v16 = vld [vmem:[#allocation2 + $0x1a1] sm:$0xff] }
 0x4dc   : > { %9506 = vmatprep.mubr.msk.bf16.mxu1 %vm739_vm3, %v12210_v40  ;;  %v7192_v40 = vld [vmem:[#allocation2 + $0x199] sm:$0xff] }
 0x4e3   : > { %9507 = vmatmul.mubr.msk.bf16.gmra.mrb[28].mxu1 %vm739_vm3, %v12227_v38  ;;  %v7209_v38 = vpack.c.bf16 %v7193_v16, %v7192_v40 }
 0x4e4   : > { %9510 = vmatprep.mubr.msk.bf16.mxu1 %vm739_vm3, %v12232_v34  ;;  %v7486_v34 = vld [vmem:[#allocation2 + $0x19a] sm:$0xff] }
 0x4eb   : > { %9511 = vmatmul.mubr.msk.bf16.gmra.mrb[0].mxu1 %vm739_vm3, %v12249_v52  ;;  %v7487_v52 = vld [vmem:[#allocation2 + $0x1a2] sm:$0xff] }
 0x4ec   : > { %9514 = vmatprep.mubr.msk.bf16.mxu1 %vm739_vm3, %v12252_v56  ;;  %v7503_v56 = vpack.c.bf16 %v7487_v52, %v7486_v34 }
 0x4f3   : > { %9515 = vmatmul.mubr.msk.bf16.gmra.mrb[4].mxu1 %vm739_vm3, %v12265_v39 }
 0x4f4   : > { %9518 = vmatprep.mubr.msk.bf16.mxu1 %vm739_vm3, %v12267_v50  ;;  %v12700_v50 = vld [vmem:[%s12828_s5] ss:$0 sm:$0xff] }
 0x4fb   : > { %9519 = vmatmul.mubr.msk.bf16.gmra.mrb[8].mxu1 %vm739_vm3, %v12273_v51 }
 0x4fc   : > { %9522 = vmatprep.mubr.msk.bf16.mxu1 %vm739_vm3, %v12521_v25 }
 0x503   : > { %9523 = vmatmul.mubr.msk.bf16.gmra.mrb[12].mxu1 %vm739_vm3, %v6915_v8  ;;  %v13004_v8 = vld [vmem:[#allocation7_spill] sm:$0xff] }
 0x504   : > { %9528 = vmatprep.mubr.msk.bf16.mxu1 %vm739_vm3, %v12318_v54 }
 0x50b   : > { %9529 = vmatmul.mubr.msk.bf16.vlgmr.msra.gmra.mrb[16].mxu1 %vm739_vm3, %v12331_v48 }
 0x50c   : > { %9561 = vmatpush3.bf16.msra.mxu1 %v7555_v33  ;;  %9532 = vmatprep.mubr.msk.bf16.mxu1 %vm739_vm3, %v12333_v43 }
 0x513   : > { %9533 = vmatmul.mubr.msk.bf16.gmra.mrb[20].mxu1 %vm739_vm3, %v12339_v14 }
 0x514   : > { %9536 = vmatprep.mubr.msk.bf16.mxu1 %vm739_vm3, %v12341_v49 }
 0x51b   : > { %9537 = vmatmul.mubr.msk.bf16.gmra.mrb[24].mxu1 %vm739_vm3, %v12347_v27 }
 0x51c   : > { %9540 = vmatprep.mubr.msk.bf16.mxu1 %vm739_vm3, %v12349_v6 }
 0x523   : > { %9541 = vmatmul.mubr.msk.bf16.gmra.mrb[28].mxu1 %vm739_vm3, %v12355_v44 }
 0x524   : > { %9544 = vmatprep.mubr.msk.bf16.mxu1 %vm739_vm3, %v12357_v19 }
 0x52b   : > { %9545 = vmatmul.mubr.msk.bf16.gmra.mrb[0].mxu1 %vm739_vm3, %v12363_v10 }
 0x52c   : > { %9548 = vmatprep.mubr.msk.bf16.mxu1 %vm739_vm3, %v12365_v23 }
 0x533   : > { %9549 = vmatmul.mubr.msk.bf16.gmra.mrb[4].mxu1 %vm739_vm3, %v12371_v46 }
 0x534   : > { %9552 = vmatprep.mubr.msk.bf16.mxu1 %vm739_vm3, %v12373_v15 }
 0x53b   : > { %9553 = vmatmul.mubr.msk.bf16.gmra.mrb[8].mxu1 %vm739_vm3, %v12379_v26 }
 0x53c   : > { %9556 = vmatprep.mubr.msk.bf16.mxu1 %vm739_vm3, %v12560_v9  ;;  %v13002_v9 = vld [vmem:[#allocation5_spill] sm:$0xff] }
 0x543   : > { %9557 = vmatmul.mubr.msk.bf16.gmra.mrb[12].mxu1 %vm739_vm3, %v7209_v38 }
 0x544   : > { %9562 = vmatprep.mubr.msk.bf16.mxu1 %vm739_vm3, %v12388_v36 }
 0x54b   : > { %9563 = vmatmul.mubr.msk.bf16.vlgmr.msra.gmra.mrb[16].mxu1 %vm739_vm3, %v12401_v20 }
 0x54c   : > { %9566 = vmatprep.mubr.msk.bf16.mxu1 %vm739_vm3, %v12403_v42 }
 0x553   : > { %9567 = vmatmul.mubr.msk.bf16.gmra.mrb[20].mxu1 %vm739_vm3, %v12409_v37 }
 0x554   : > { %9570 = vmatprep.mubr.msk.bf16.mxu1 %vm739_vm3, %v12411_v4 }
 0x55b   : > { %9571 = vmatmul.mubr.msk.bf16.gmra.mrb[24].mxu1 %vm739_vm3, %v12425_v3 }
 0x55c   : > { %9574 = vmatprep.mubr.msk.bf16.mxu1 %vm739_vm3, %v12427_v45 }
 0x563   : > { %9575 = vmatmul.mubr.msk.bf16.gmra.mrb[28].mxu1 %vm739_vm3, %v12441_v28 }
 0x564   : > { %9578 = vmatprep.mubr.msk.bf16.mxu1 %vm739_vm3, %v12443_v62 }
 0x56b   : > { %9579 = vmatmul.mubr.msk.bf16.gmra.mrb[0].mxu1 %vm739_vm3, %v12457_v13 }
 0x56c   : > { %9582 = vmatprep.mubr.msk.bf16.mxu1 %vm739_vm3, %v12459_v29  ;;  %v13001_v29 = vld [vmem:[#allocation4_spill] sm:$0xff] }
 0x573   : > { %9583 = vmatmul.mubr.msk.bf16.gmra.mrb[4].mxu1 %vm739_vm3, %v12473_v12 }
 0x574   : > { %9586 = vmatprep.mubr.msk.bf16.mxu1 %vm739_vm3, %v12475_v57 }
 0x57b   : > { %9587 = vmatmul.mubr.msk.bf16.gmra.mrb[8].mxu1 %vm739_vm3, %v12481_v11 }
 0x57c   : > { %9590 = vmatprep.mubr.msk.bf16.mxu1 %vm739_vm3, %v6620_v24 }
 0x583   : > { %9591 = vmatmul.mubr.msk.bf16.gmra.mrb[12].mxu1 %vm739_vm3, %v7503_v56 }
 0x61e   : > { %v9564_v39 = vpop.f32.mrb[16].mxu1 }
 0x61f   : > { %v9596_v51 = vadd.f32 %v9564_v39, %v12417_v58  ;;  %v7591_v54 = vpop.f32.mrb[17].mxu1 }
 0x620   : > { %v9597_v48 = vadd.f32 %v7591_v54, %v12419_v55  ;;  %v9565_v43 = vpop.f32.mrb[18].mxu1 }
 0x621   : > { %v7759_v14 = vadd.f32 %v9596_v51, %v12700_v50  ;;  %v9598_v49 = vadd.f32 %v9565_v43, %v12421_v35  ;;  %v7594_v27 = vpop.f32.mrb[19].mxu1 }
 0x622   : > { %v7757_v6 = vadd.f32 %v9597_v48, %v12700_v50  ;;  %v9599_v44 = vadd.f32 %v7594_v27, %v12423_v22 }
 0x623   : > { %v7791_v19 = vmax.f32 %v7759_v14, 0.0  ;;  %v7760_v10 = vadd.f32 %v9598_v49, %v12700_v50 }
 0x624   : > { %v7789_v23 = vmax.f32 %v7757_v6, 0.0  ;;  %v7758_v46 = vadd.f32 %v9599_v44, %v12700_v50 }
 0x625   : > { %7823 = vst.msk [vmem:[%s12710_s28 + $0x10] sm:$0xff] %vm739_vm3, %v7791_v19  ;;  %v7792_v15 = vmax.f32 %v7760_v10, 0.0 }
 0x626   : > { %7821 = vst.msk [vmem:[%s12710_s28] sm:$0xff] %vm739_vm3, %v7789_v23  ;;  %v7790_v26 = vmax.f32 %v7758_v46, 0.0  ;;  %v9568_v36 = vpop.f32.mrb[20].mxu1 }
 0x627   : > { %7824 = vst.msk [vmem:[%s12710_s28 + $0x18] sm:$0xff] %vm739_vm3, %v7792_v15  ;;  %v9600_v20 = vadd.f32 %v9568_v36, %v12433_v32  ;;  %v7607_v42 = vpop.f32.mrb[21].mxu1 }
 0x628   : > { %7822 = vst.msk [vmem:[%s12710_s28 + $0x8] sm:$0xff] %vm739_vm3, %v7790_v26  ;;  %v9601_v37 = vadd.f32 %v7607_v42, %v12435_v31  ;;  %v9569_v4 = vpop.f32.mrb[22].mxu1 }
 0x629   : > { %v7763_v58 = vadd.f32 %v9600_v20, %v12700_v50  ;;  %v9602_v55 = vadd.f32 %v9569_v4, %v12437_v0  ;;  %v7610_v35 = vpop.f32.mrb[23].mxu1 }
 0x62a   : > { %v7761_v22 = vadd.f32 %v9601_v37, %v12700_v50  ;;  %v9603_v3 = vadd.f32 %v7610_v35, %v12439_v53 }
 0x62b   : > { %v7795_v45 = vmax.f32 %v7763_v58, 0.0  ;;  %v7764_v32 = vadd.f32 %v9602_v55, %v12700_v50 }
 0x62c   : > { %v7793_v28 = vmax.f32 %v7761_v22, 0.0  ;;  %v7762_v62 = vadd.f32 %v9603_v3, %v12700_v50 }
 0x62d   : > { %7827 = vst.msk [vmem:[%s12710_s28 + $0x30] sm:$0xff] %vm739_vm3, %v7795_v45  ;;  %v7796_v31 = vmax.f32 %v7764_v32, 0.0 }
 0x62e   : > { %7825 = vst.msk [vmem:[%s12710_s28 + $0x20] sm:$0xff] %vm739_vm3, %v7793_v28  ;;  %v7794_v11 = vmax.f32 %v7762_v62, 0.0  ;;  %v9572_v13 = vpop.f32.mrb[24].mxu1 }
 0x62f   : > { %7828 = vst.msk [vmem:[%s12710_s28 + $0x38] sm:$0xff] %vm739_vm3, %v7796_v31  ;;  %v9604_v0 = vadd.f32 %v9572_v13, %v12449_v61  ;;  %v7623_v53 = vpop.f32.mrb[25].mxu1 }
 0x630   : > { %7826 = vst.msk [vmem:[%s12710_s28 + $0x28] sm:$0xff] %vm739_vm3, %v7794_v11  ;;  %v9605_v12 = vadd.f32 %v7623_v53, %v13001_v29  ;;  %v9573_v57 = vpop.f32.mrb[26].mxu1 }
 0x631   : > { %v7767_v25 = vadd.f32 %v9604_v0, %v12700_v50  ;;  %v9606_v41 = vadd.f32 %v9573_v57, %v13002_v9  ;;  %v7626_v60 = vpop.f32.mrb[27].mxu1 }
 0x632   : > { %v7765_v59 = vadd.f32 %v9605_v12, %v12700_v50  ;;  %v9607_v24 = vadd.f32 %v7626_v60, %v13003_v47 }
 0x633   : > { %v7799_v18 = vmax.f32 %v7767_v25, 0.0  ;;  %v7768_v61 = vadd.f32 %v9606_v41, %v12700_v50 }
 0x634   : > { %v7797_v2 = vmax.f32 %v7765_v59, 0.0  ;;  %v7766_v7 = vadd.f32 %v9607_v24, %v12700_v50 }
 0x635   : > { %7831 = vst.msk [vmem:[%s12710_s28 + $0x50] sm:$0xff] %vm739_vm3, %v7799_v18  ;;  %v7800_v63 = vmax.f32 %v7768_v61, 0.0 }
 0x636   : > { %7829 = vst.msk [vmem:[%s12710_s28 + $0x40] sm:$0xff] %vm739_vm3, %v7797_v2  ;;  %v7798_v5 = vmax.f32 %v7766_v7, 0.0  ;;  %v9576_v30 = vpop.f32.mrb[28].mxu1 }
 0x637   : > { %7832 = vst.msk [vmem:[%s12710_s28 + $0x58] sm:$0xff] %vm739_vm3, %v7800_v63  ;;  %v9608_v33 = vadd.f32 %v9576_v30, %v13004_v8  ;;  %v7639_v40 = vpop.f32.mrb[29].mxu1 }
 0x638   : > { %7830 = vst.msk [vmem:[%s12710_s28 + $0x48] sm:$0xff] %vm739_vm3, %v7798_v5  ;;  %v9609_v16 = vadd.f32 %v7639_v40, %v12467_v17  ;;  %v9577_v38 = vpop.f32.mrb[30].mxu1 }
 0x639   : > { %v7771_v34 = vadd.f32 %v9608_v33, %v12700_v50  ;;  %v9610_v52 = vadd.f32 %v9577_v38, %v12469_v21  ;;  %v7642_v56 = vpop.f32.mrb[31].mxu1 }
 0x63a   : > { %v7769_v39 = vadd.f32 %v9609_v16, %v12700_v50  ;;  %v9611_v51 = vadd.f32 %v7642_v56, %v12471_v1 }
 0x63b   : > { %v7803_v54 = vmax.f32 %v7771_v34, 0.0  ;;  %v7772_v48 = vadd.f32 %v9610_v52, %v12700_v50 }
 0x63c   : > { %v7801_v43 = vmax.f32 %v7769_v39, 0.0  ;;  %v7770_v14 = vadd.f32 %v9611_v51, %v12700_v50 }
 0x63d   : > { %7835 = vst.msk [vmem:[%s12710_s28 + $0x70] sm:$0xff] %vm739_vm3, %v7803_v54  ;;  %v7804_v17 = vmax.f32 %v7772_v48, 0.0 }
 0x63e   : > { %7833 = vst.msk [vmem:[%s12710_s28 + $0x60] sm:$0xff] %vm739_vm3, %v7801_v43  ;;  %v7802_v21 = vmax.f32 %v7770_v14, 0.0  ;;  %v9580_v49 = vpop.f32.mrb[0].mxu1 }
 0x63f   : > { %7836 = vst.msk [vmem:[%s12710_s28 + $0x78] sm:$0xff] %vm739_vm3, %v7804_v17  ;;  %v7775_v1 = vadd.f32 %v9580_v49, %v12700_v50  ;;  %v7655_v27 = vpop.f32.mrb[1].mxu1 }
 0x640   : > { %7834 = vst.msk [vmem:[%s12710_s28 + $0x68] sm:$0xff] %vm739_vm3, %v7802_v21  ;;  %v7773_v6 = vadd.f32 %v12700_v50, %v7655_v27  ;;  %v9581_v44 = vpop.f32.mrb[2].mxu1 }
 0x641   : > { %v7807_v19 = vmax.f32 %v7775_v1, 0.0  ;;  %v7776_v10 = vadd.f32 %v9581_v44, %v12700_v50  ;;  %v7658_v23 = vpop.f32.mrb[3].mxu1 }
 0x642   : > { %v7805_v46 = vmax.f32 %v7773_v6, 0.0  ;;  %v7774_v15 = vadd.f32 %v12700_v50, %v7658_v23 }
 0x643   : > { %7839 = vst.msk [vmem:[%s12710_s28 + $0x90] sm:$0xff] %vm739_vm3, %v7807_v19  ;;  %v7808_v26 = vmax.f32 %v7776_v10, 0.0 }
 0x644   : > { %7837 = vst.msk [vmem:[%s12710_s28 + $0x80] sm:$0xff] %vm739_vm3, %v7805_v46  ;;  %v7806_v36 = vmax.f32 %v7774_v15, 0.0 }
 0x645   : > { %7840 = vst.msk [vmem:[%s12710_s28 + $0x98] sm:$0xff] %vm739_vm3, %v7808_v26 }
 0x646   : > { %7838 = vst.msk [vmem:[%s12710_s28 + $0x88] sm:$0xff] %vm739_vm3, %v7806_v36  ;;  %v9584_v20 = vpop.f32.mrb[4].mxu1 }
 0x647   : > { %v7779_v42 = vadd.f32 %v9584_v20, %v12700_v50  ;;  %v7671_v37 = vpop.f32.mrb[5].mxu1 }
 0x648   : > { %v7777_v4 = vadd.f32 %v12700_v50, %v7671_v37  ;;  %v9585_v58 = vpop.f32.mrb[6].mxu1 }
 0x649   : > { %v7811_v55 = vmax.f32 %v7779_v42, 0.0  ;;  %v7780_v35 = vadd.f32 %v9585_v58, %v12700_v50  ;;  %v7674_v22 = vpop.f32.mrb[7].mxu1 }
 0x64a   : > { %v7809_v3 = vmax.f32 %v7777_v4, 0.0  ;;  %v7778_v45 = vadd.f32 %v12700_v50, %v7674_v22 }
 0x64b   : > { %7843 = vst.msk [vmem:[%s12710_s28 + $0xb0] sm:$0xff] %vm739_vm3, %v7811_v55  ;;  %v7812_v32 = vmax.f32 %v7780_v35, 0.0 }
 0x64c   : > { %7841 = vst.msk [vmem:[%s12710_s28 + $0xa0] sm:$0xff] %vm739_vm3, %v7809_v3  ;;  %v7810_v28 = vmax.f32 %v7778_v45, 0.0 }
 0x64d   : > { %7844 = vst.msk [vmem:[%s12710_s28 + $0xb8] sm:$0xff] %vm739_vm3, %v7812_v32 }
 0x64e   : > { %7842 = vst.msk [vmem:[%s12710_s28 + $0xa8] sm:$0xff] %vm739_vm3, %v7810_v28  ;;  %v9588_v62 = vpop.f32.mrb[8].mxu1 }
 0x64f   : > { %v7783_v31 = vadd.f32 %v9588_v62, %v12700_v50  ;;  %v7687_v11 = vpop.f32.mrb[9].mxu1 }
 0x650   : > { %v7781_v13 = vadd.f32 %v12700_v50, %v7687_v11  ;;  %v9589_v0 = vpop.f32.mrb[10].mxu1 }
 0x651   : > { %v7815_v53 = vmax.f32 %v7783_v31, 0.0  ;;  %v7784_v29 = vadd.f32 %v9589_v0, %v12700_v50  ;;  %v7690_v12 = vpop.f32.mrb[11].mxu1 }
 0x652   : > { %v7813_v57 = vmax.f32 %v7781_v13, 0.0  ;;  %v7782_v25 = vadd.f32 %v12700_v50, %v7690_v12 }
 0x653   : > { %7847 = vst.msk [vmem:[%s12710_s28 + $0xd0] sm:$0xff] %vm739_vm3, %v7815_v53  ;;  %v7816_v9 = vmax.f32 %v7784_v29, 0.0 }
 0x654   : > { %7845 = vst.msk [vmem:[%s12710_s28 + $0xc0] sm:$0xff] %vm739_vm3, %v7813_v57  ;;  %v7814_v41 = vmax.f32 %v7782_v25, 0.0 }
 0x655   : > { %7848 = vst.msk [vmem:[%s12710_s28 + $0xd8] sm:$0xff] %vm739_vm3, %v7816_v9 }
 0x656   : > { %7846 = vst.msk [vmem:[%s12710_s28 + $0xc8] sm:$0xff] %vm739_vm3, %v7814_v41  ;;  %v9592_v60 = vpop.f32.mrb[12].mxu1 }
 0x657   : > { %v7787_v59 = vadd.f32 %v9592_v60, %v12700_v50  ;;  %v7703_v47 = vpop.f32.mrb[13].mxu1 }
 0x658   : > { %v7785_v24 = vadd.f32 %v12700_v50, %v7703_v47  ;;  %v9593_v18 = vpop.f32.mrb[14].mxu1 }
 0x659   : > { %v7819_v61 = vmax.f32 %v7787_v59, 0.0  ;;  %v7788_v2 = vadd.f32 %v9593_v18, %v12700_v50  ;;  %v7706_v7 = vpop.f32.mrb[15].mxu1 }
 0x65a   : > { %v7817_v63 = vmax.f32 %v7785_v24, 0.0  ;;  %v7786_v5 = vadd.f32 %v12700_v50, %v7706_v7 }
 0x65b   : > { %7851 = vst.msk [vmem:[%s12710_s28 + $0xf0] sm:$0xff] %vm739_vm3, %v7819_v61  ;;  %v7820_v30 = vmax.f32 %v7788_v2, 0.0 }
 0x65c   : > { %7849 = vst.msk [vmem:[%s12710_s28 + $0xe0] sm:$0xff] %vm739_vm3, %v7817_v63  ;;  %v7818_v8 = vmax.f32 %v7786_v5, 0.0 }
 0x65d   : > { %7852 = vst.msk [vmem:[%s12710_s28 + $0xf8] sm:$0xff] %vm739_vm3, %v7820_v30 }
 0x65e   : > { %7850 = vst.msk [vmem:[%s12710_s28 + $0xe8] sm:$0xff] %vm739_vm3, %v7818_v8 }
 0x65f PF: > { %s16_s21 = sadd.s32 1, %s10228_s21  }
 0x660   : > { %p13_p4 = scmp.ge.s32.totalorder %s16_s21, 4  }
 0x662   :  { %15 = sbr.rel (!%p13_p4) target bundleno = 1 (0x1), region = 94 }

</bundles_post_ra>
